<compile_context>
chip_gen: v7x
topology: tpu7x:2x2x1
jax: 0.10.0
libtpu: 0.0.40
codegen_flags: <defaults>
</compile_context>

<pallas_src>
import jax
import jax.numpy as jnp
from jax.experimental import pallas as pl
from jax.experimental.pallas import tpu as pltpu


def _silu(x):
    return x * jax.nn.sigmoid(x)


def _pick_block_batch(B, H, target_rows=256):
    """Largest batch tile Bt with Bt*H <= target_rows, preferring an even grid
    (B // Bt even) so v7x's two TensorCores both get work; larger Bt fills the
    MXU M dimension and amortizes per-step pipeline overhead."""
    divisors = [d for d in range(1, B + 1) if B % d == 0]
    cand = [d for d in divisors if d * H <= target_rows] or [divisors[0]]
    even = [d for d in cand if (B // d) % 2 == 0 and (B // d) >= 2]
    return max(even) if even else max(cand)


def _pack_params(params, W):
    """One-time host-side BN folding + lane packing of the (tiny) weights."""
    (w_exp, exp_s, exp_b, dw_w, dw_s, dw_b,
     se_w1, se_b1, se_w2, se_b2, w_pr, pr_s, pr_b) = params
    Cin, Cexp = w_exp.shape
    Cout = w_pr.shape[1]
    Csq = se_w1.shape[1]
    K = dw_w.shape[0]

    w_exp_f = w_exp * exp_s.reshape(1, Cexp)                # fold BN scale -> expand
    w_pr_f = w_pr * pr_s.reshape(1, Cout)                   # fold BN scale -> project
    dw_f = dw_w * dw_s.reshape(1, 1, Cexp)                  # fold BN scale -> depthwise

    eye_w = jnp.eye(W, dtype=jnp.float32)
    w_exp_big = jnp.kron(eye_w, w_exp_f)                    # (W*Cin,  W*Cexp) block-diag
    w_pr_big = jnp.kron(eye_w, w_pr_f)                      # (W*Cexp, W*Cout) block-diag
    b_exp = jnp.tile(exp_b.reshape(1, Cexp), (1, W))        # (1, W*Cexp)
    b_dw = jnp.tile(dw_b.reshape(1, Cexp), (1, W))          # (1, W*Cexp)
    b_pr = jnp.tile(pr_b.reshape(1, Cout), (1, W))          # (1, W*Cout)
    dw_packed = jnp.tile(dw_f.reshape(K * K, Cexp), (1, W))  # (K*K, W*Cexp)
    se_w1_t = jnp.transpose(se_w1)                          # (Csq, Cexp)
    se_b1_2d = se_b1.reshape(1, Csq)
    se_w2_p = jnp.tile(se_w2, (1, W))                       # (Csq, W*Cexp) host-tiled fc2
    se_b2_p = jnp.tile(se_b2.reshape(1, Cexp), (1, W))      # (1, W*Cexp)

    kern_params = (w_exp_big, b_exp, dw_packed, b_dw,
                   se_w1_t, se_b1_2d, se_w2_p, se_b2_p,
                   w_pr_big, b_pr)
    return kern_params, (Cin, Cexp, Csq, Cout, K)


def mbconv_forward_packed(x_packed, params, *, W, block_batch=None):
    """MBConv forward on packed activations (B, H, W*Cin) -> (B, H, W*Cout).
    Keeping activations in this layout across a stack of MBConv blocks avoids the
    per-block NCHW<->packed transposes (the biggest end-to-end win at model level)."""
    B, H, WCin = x_packed.shape
    kern_params, (Cin, Cexp, Csq, Cout, K) = _pack_params(params, W)
    pad = K // 2
    assert WCin == W * Cin
    assert Cin == Cout, "this kernel implements the residual (stride=1) MBConv config"
    assert WCin % 128 == 0 and H % 8 == 0, "packed layout must be lane/sublane aligned"

    Bt = block_batch if block_batch is not None else _pick_block_batch(B, H)
    assert B % Bt == 0
    WCexp, WCout = W * Cexp, W * Cout
    R = Bt * H                                  # flat row count / matmul M per tile

    def kernel(x_ref, wexp_ref, bexp_ref, dww_ref, bdw_ref,
               sew1_ref, seb1_ref, sew2p_ref, seb2p_ref,
               wpr_ref, bpr_ref, o_ref):
        x2 = x_ref[...].reshape(R, WCin)                     # (R, W*Cin), layout no-op

        # ---- 1x1 expand conv (BN folded) + bias + SiLU : MXU ------------------
        h = jnp.dot(x2, wexp_ref[...], preferred_element_type=jnp.float32)
        h = _silu(h + bexp_ref[...])                         # (R, W*Cexp)

        # ---- depthwise KxK conv, stride 1, 'SAME' ------------------------------
        # Horizontal taps: lane rolls by multiples of Cexp + iota masks for the
        # wrapped column (full-width vregs, XLU slot) -- replaces the unaligned
        # zero-halo buffer and the 9 misaligned window slices.
        lane = jax.lax.broadcasted_iota(jnp.int32, (1, WCexp), 1)
        hshift = []
        for kw in range(K):
            off = kw - pad
            if off == 0:
                hshift.append(h)
            else:
                rolled = pltpu.roll(h, (-off * Cexp) % WCexp, axis=1)
                valid = (lane < (W - off) * Cexp) if off > 0 else (lane >= (-off) * Cexp)
                hshift.append(jnp.where(valid, rolled, 0.0))

        # Vertical taps: sublane rolls over the flat (Bt*H) row axis + per-image
        # row masks.  Rows that wrap across image boundaries are exactly the rows
        # the zero-padding mask kills, so rolling the flat axis is safe.
        row = jax.lax.broadcasted_iota(jnp.int32, (R, 1), 0)
        row = (row & (H - 1)) if (H & (H - 1)) == 0 else (row % H)

        dww = dww_ref[...]                                   # (K*K, W*Cexp), BN folded
        acc = jnp.zeros((R, WCexp), jnp.float32)
        for kh in range(K):
            rc = hshift[0] * dww[kh * K:kh * K + 1, :]
            for kw in range(1, K):
                rc = rc + hshift[kw] * dww[kh * K + kw:kh * K + kw + 1, :]
            offh = kh - pad
            if offh == 0:
                acc = acc + rc
            else:
                rolled = pltpu.roll(rc, (-offh) % R, axis=0)
                valid = (row < H - offh) if offh > 0 else (row >= -offh)
                acc = acc + jnp.where(valid, rolled, 0.0)
        d = _silu(acc + bdw_ref[...])                        # (R, W*Cexp)
        d3 = d.reshape(Bt, H, WCexp)

        # ---- Squeeze-and-Excitation -------------------------------------------
        # Spatial mean: sublane reduce over H, then a log2(W) lane roll-tree
        # (block 0 of `s` ends up holding the sum over all W columns).
        col = jnp.sum(d3, axis=1)                            # (Bt, W*Cexp)
        if W & (W - 1) == 0:
            s = col
            shift = WCexp // 2
            while shift >= Cexp:
                s = s + pltpu.roll(s, shift, axis=1)
                shift //= 2
            pooled = s[:, :Cexp] * (1.0 / (H * W))           # (Bt, Cexp)
        else:
            s = col[:, 0:Cexp]
            for w in range(1, W):
                s = s + col[:, w * Cexp:(w + 1) * Cexp]
            pooled = s * (1.0 / (H * W))

        # fc1 (Cexp->Csq) on the VPU (tiny N); fc2 accumulated directly in the
        # packed W*Cexp lane layout via host-tiled weights (no in-kernel concat).
        sew1 = sew1_ref[...]                                 # (Csq, Cexp)
        sew2p = sew2p_ref[...]                               # (Csq, W*Cexp)
        seb1 = seb1_ref[...]                                 # (1, Csq)
        z = jnp.broadcast_to(seb2p_ref[...], (Bt, WCexp))
        for j in range(Csq):
            sj = jnp.sum(pooled * sew1[j:j + 1, :], axis=-1, keepdims=True)
            sj = _silu(sj + seb1[:, j:j + 1])                # (Bt, 1)
            z = z + sj * sew2p[j:j + 1, :]
        gate = jax.nn.sigmoid(z)                             # (Bt, W*Cexp), packed
        dg = (d3 * gate[:, None, :]).reshape(R, WCexp)

        # ---- 1x1 project conv (BN folded) + bias, residual, lane-dense store --
        p = jnp.dot(dg, wpr_ref[...], preferred_element_type=jnp.float32)
        p = p + bpr_ref[...]                                 # (R, W*Cout)
        # TODO(synk): StochasticDepth is identity (eval mode); train-mode row drop omitted.
        o_ref[...] = (p + x2).reshape(Bt, H, WCout).astype(o_ref.dtype)

    def const_spec(a):
        nd = a.ndim
        # NOTE: these weights are grid-invariant; pipeline_mode=pl.Buffered(1) would
        # save one buffer each -- left at the default for maximum compatibility.
        return pl.BlockSpec(a.shape, lambda i, _nd=nd: (0,) * _nd)

    grid_spec = pltpu.PrefetchScalarGridSpec(
        num_scalar_prefetch=0,
        grid=(B // Bt,),
        in_specs=[pl.BlockSpec((Bt, H, WCin), lambda i: (i, 0, 0))]
                 + [const_spec(a) for a in kern_params],
        out_specs=pl.BlockSpec((Bt, H, WCout), lambda i: (i, 0, 0)),
    )

    return pl.pallas_call(
        kernel,
        out_shape=jax.ShapeDtypeStruct((B, H, WCout), jnp.float32),
        grid_spec=grid_spec,
        compiler_params=pltpu.CompilerParams(
            # Batch-tile axis sharded over v7x's two TensorCores; neutral on v5e/v6e.
            # No vmem_limit override: footprint is a few MiB, default cap is fine.
            dimension_semantics=("parallel",)),
    )(x_packed, *kern_params)


def mbconv_forward(x_nchw, params, *, block_batch=None):
    """MBConv forward. x_nchw: (B, Cin, H, W) float32 (PyTorch layout). Returns NCHW."""
    B, Cin, H, W = x_nchw.shape
    x_packed = jnp.transpose(x_nchw, (0, 2, 3, 1)).reshape(B, H, W * Cin)
    out_packed = mbconv_forward_packed(x_packed, params, W=W, block_batch=block_batch)
    Cout = out_packed.shape[-1] // W
    return jnp.transpose(out_packed.reshape(B, H, W, Cout), (0, 3, 1, 2))


def init_params(key, Cin, Cexp, Csq, Cout, K):
    keys = jax.random.split(key, 10)

    def rnd(k, shape, scale):
        return scale * jax.random.normal(k, shape, jnp.float32)

    def bn(k, C):
        kg, kb, km, kv = jax.random.split(k, 4)
        gamma = 1.0 + 0.1 * jax.random.normal(kg, (C,), jnp.float32)
        beta = 0.1 * jax.random.normal(kb, (C,), jnp.float32)
        mean = 0.1 * jax.random.normal(km, (C,), jnp.float32)
        var = jnp.abs(jax.random.normal(kv, (C,), jnp.float32)) + 1.0
        scale = gamma / jnp.sqrt(var + 1e-5)
        bias = beta - mean * scale
        return scale.reshape(1, C), bias.reshape(1, C)

    w_exp = rnd(keys[0], (Cin, Cexp), 0.3)     # 1x1 expand conv (Cin -> Cexp), no bias
    dw_w = rnd(keys[1], (K, K, Cexp), 0.2)     # depthwise KxK, one filter per channel
    se_w1 = rnd(keys[2], (Cexp, Csq), 0.3)     # SE fc1 (1x1 conv) weight
    se_b1 = rnd(keys[3], (1, Csq), 0.1)        # SE fc1 bias
    se_w2 = rnd(keys[4], (Csq, Cexp), 0.3)     # SE fc2 weight
    se_b2 = rnd(keys[5], (1, Cexp), 0.1)       # SE fc2 bias
    w_pr = rnd(keys[6], (Cexp, Cout), 0.3)     # 1x1 project conv, no bias
    exp_s, exp_b = bn(keys[7], Cexp)           # BN after expand (eval, folded)
    dw_s, dw_b = bn(keys[8], Cexp)             # BN after depthwise
    pr_s, pr_b = bn(keys[9], Cout)             # BN after project
    return (w_exp, exp_s, exp_b, dw_w, dw_s, dw_b,
            se_w1, se_b1, se_w2, se_b2, w_pr, pr_s, pr_b)


def mbconv_reference(x_nchw, params, K):
    """Pure-JAX reference (lax.conv) for correctness checking."""
    (w_exp, exp_s, exp_b, dw_w, dw_s, dw_b,
     se_w1, se_b1, se_w2, se_b2, w_pr, pr_s, pr_b) = params
    x = jnp.transpose(x_nchw, (0, 2, 3, 1))
    Cexp = w_exp.shape[1]
    hi = jax.lax.Precision.HIGHEST

    h = jnp.einsum('bhwc,cd->bhwd', x, w_exp, precision=hi)
    h = _silu(h * exp_s.reshape(1, 1, 1, -1) + exp_b.reshape(1, 1, 1, -1))

    dw_hwio = dw_w.reshape(K, K, 1, Cexp)
    dn = jax.lax.conv_dimension_numbers(h.shape, dw_hwio.shape, ('NHWC', 'HWIO', 'NHWC'))
    d = jax.lax.conv_general_dilated(h, dw_hwio, (1, 1), 'SAME',
                                     dimension_numbers=dn, feature_group_count=Cexp,
                                     precision=hi)
    d = _silu(d * dw_s.reshape(1, 1, 1, -1) + dw_b.reshape(1, 1, 1, -1))

    pooled = jnp.mean(d, axis=(1, 2))                       # (B, Cexp)
    s = _silu(jnp.dot(pooled, se_w1, precision=hi) + se_b1)
    gate = jax.nn.sigmoid(jnp.dot(s, se_w2, precision=hi) + se_b2)
    d = d * gate[:, None, None, :]

    p = jnp.einsum('bhwc,cd->bhwd', d, w_pr, precision=hi)
    p = p * pr_s.reshape(1, 1, 1, -1) + pr_b.reshape(1, 1, 1, -1)
    out = p + x
    return jnp.transpose(out, (0, 3, 1, 2))


if __name__ == "__main__":
    B, Cin, H, W = 8, 8, 16, 16
    expand_ratio, K = 4, 3
    Cexp = Cin * expand_ratio            # adjust_channels(8, 4.0) = 32
    Csq = max(1, Cin // 4)               # 2
    Cout = Cin                           # stride=1, Cin==Cout -> use_res_connect

    key = jax.random.PRNGKey(0)
    kx, kp = jax.random.split(key)
    x = jax.random.normal(kx, (B, Cin, H, W), jnp.float32)
    params = init_params(kp, Cin, Cexp, Csq, Cout, K)

    out = jax.block_until_ready(mbconv_forward(x, params))
    ref = jax.block_until_ready(mbconv_reference(x, params, K))

    assert out.shape == (B, Cout, H, W)
    max_err = float(jnp.max(jnp.abs(out - ref)))
    if max_err > 1e-3:
        raise AssertionError(f"Pallas kernel mismatch vs reference: max_err={max_err}")
    print("KERNEL_OK")
</pallas_src>

<mosaic_0001>
module attributes {stable_mosaic.version = 11 : i64} {
  func.func @kernel(%arg0: i32, %arg1: memref<4x16x128xf32, #tpu.memory_space<vmem>>, %arg2: memref<128x512xf32, #tpu.memory_space<vmem>>, %arg3: memref<1x512xf32, #tpu.memory_space<vmem>>, %arg4: memref<9x512xf32, #tpu.memory_space<vmem>>, %arg5: memref<1x512xf32, #tpu.memory_space<vmem>>, %arg6: memref<2x32xf32, #tpu.memory_space<vmem>>, %arg7: memref<1x2xf32, #tpu.memory_space<vmem>>, %arg8: memref<2x512xf32, #tpu.memory_space<vmem>>, %arg9: memref<1x512xf32, #tpu.memory_space<vmem>>, %arg10: memref<512x128xf32, #tpu.memory_space<vmem>>, %arg11: memref<1x128xf32, #tpu.memory_space<vmem>>, %arg12: memref<4x16x128xf32, #tpu.memory_space<vmem>>) attributes {dimension_semantics = [#tpu.dimension_semantics<parallel>], iteration_bounds = array<i64: 2>, scalar_prefetch = 0 : i64, scratch_operands = 0 : i64, tpu.core_type = #tpu.core_type<tc>, window_params = [{transform_indices = @transform_0, window_bounds = array<i64: 4, 16, 128>}, {pipeline_mode = #tpu.pipeline_mode<synchronous>, transform_indices = @transform_1, window_bounds = array<i64: 128, 512>}, {pipeline_mode = #tpu.pipeline_mode<synchronous>, transform_indices = @transform_2, window_bounds = array<i64: 1, 512>}, {pipeline_mode = #tpu.pipeline_mode<synchronous>, transform_indices = @transform_3, window_bounds = array<i64: 9, 512>}, {pipeline_mode = #tpu.pipeline_mode<synchronous>, transform_indices = @transform_4, window_bounds = array<i64: 1, 512>}, {pipeline_mode = #tpu.pipeline_mode<synchronous>, transform_indices = @transform_5, window_bounds = array<i64: 2, 32>}, {pipeline_mode = #tpu.pipeline_mode<synchronous>, transform_indices = @transform_6, window_bounds = array<i64: 1, 2>}, {pipeline_mode = #tpu.pipeline_mode<synchronous>, transform_indices = @transform_7, window_bounds = array<i64: 2, 512>}, {pipeline_mode = #tpu.pipeline_mode<synchronous>, transform_indices = @transform_8, window_bounds = array<i64: 1, 512>}, {pipeline_mode = #tpu.pipeline_mode<synchronous>, transform_indices = @transform_9, window_bounds = array<i64: 512, 128>}, {pipeline_mode = #tpu.pipeline_mode<synchronous>, transform_indices = @transform_10, window_bounds = array<i64: 1, 128>}, {transform_indices = @transform_11, window_bounds = array<i64: 4, 16, 128>}]} {
    %c0 = arith.constant 0 : index
    %c0_0 = arith.constant 0 : index
    %c0_1 = arith.constant 0 : index
    %0 = vector.load %arg1[%c0, %c0_0, %c0_1] : memref<4x16x128xf32, #tpu.memory_space<vmem>>, vector<4x16x128xf32>
    %1 = vector.shape_cast %0 : vector<4x16x128xf32> to vector<64x128xf32>
    %c0_2 = arith.constant 0 : index
    %c0_3 = arith.constant 0 : index
    %2 = vector.load %arg2[%c0_2, %c0_3] : memref<128x512xf32, #tpu.memory_space<vmem>>, vector<128x512xf32>
    %cst = arith.constant dense<0.000000e+00> : vector<64x512xf32>
    %3 = tpu.matmul %1, %2, %cst {dimension_numbers = #tpu.dot_dimension_numbers<[1], [0], [0], [1], [0, 0, 1, 1], [], []>} : vector<64x128xf32>, vector<128x512xf32>, vector<64x512xf32> -> vector<64x512xf32>
    %c0_4 = arith.constant 0 : index
    %c0_5 = arith.constant 0 : index
    %4 = vector.load %arg3[%c0_4, %c0_5] : memref<1x512xf32, #tpu.memory_space<vmem>>, vector<1x512xf32>
    %5 = vector.broadcast %4 : vector<1x512xf32> to vector<64x512xf32>
    %6 = arith.addf %3, %5 : vector<64x512xf32>
    %7 = arith.negf %6 : vector<64x512xf32>
    %8 = math.exp %7 : vector<64x512xf32>
    %cst_6 = arith.constant 1.000000e+00 : f32
    %9 = vector.broadcast %cst_6 : f32 to vector<64x512xf32>
    %10 = arith.addf %9, %8 : vector<64x512xf32>
    %11 = arith.divf %9, %10 : vector<64x512xf32>
    %12 = arith.mulf %6, %11 : vector<64x512xf32>
    %13 = tpu.iota {dimensions = array<i32: 1>} : vector<1x512xi32>
    %c32_i32 = arith.constant 32 : i32
    %14 = tpu.dynamic_rotate %12 by %c32_i32 dim 1 : vector<64x512xf32>, i32 -> vector<64x512xf32>
    %c32_i32_7 = arith.constant 32 : i32
    %15 = vector.broadcast %c32_i32_7 : i32 to vector<1x512xi32>
    %16 = arith.cmpi sge, %13, %15 : vector<1x512xi32>
    %cst_8 = arith.constant 0.000000e+00 : f32
    %17 = vector.shape_cast %16 : vector<1x512xi1> to vector<1x512xi1>
    %18 = vector.broadcast %17 : vector<1x512xi1> to vector<64x512xi1>
    %19 = vector.broadcast %cst_8 : f32 to vector<64x512xf32>
    %20 = arith.select %18, %14, %19 : vector<64x512xi1>, vector<64x512xf32>
    %c480_i32 = arith.constant 480 : i32
    %21 = tpu.dynamic_rotate %12 by %c480_i32 dim 1 : vector<64x512xf32>, i32 -> vector<64x512xf32>
    %c480_i32_9 = arith.constant 480 : i32
    %22 = vector.broadcast %c480_i32_9 : i32 to vector<1x512xi32>
    %23 = arith.cmpi slt, %13, %22 : vector<1x512xi32>
    %cst_10 = arith.constant 0.000000e+00 : f32
    %24 = vector.shape_cast %23 : vector<1x512xi1> to vector<1x512xi1>
    %25 = vector.broadcast %24 : vector<1x512xi1> to vector<64x512xi1>
    %26 = vector.broadcast %cst_10 : f32 to vector<64x512xf32>
    %27 = arith.select %25, %21, %26 : vector<64x512xi1>, vector<64x512xf32>
    %28 = tpu.iota {dimensions = array<i32: 0>} : vector<64x1xi32>
    %c15_i32 = arith.constant 15 : i32
    %29 = vector.broadcast %c15_i32 : i32 to vector<64x1xi32>
    %30 = arith.andi %28, %29 : vector<64x1xi32>
    %c0_11 = arith.constant 0 : index
    %c0_12 = arith.constant 0 : index
    %31 = vector.load %arg4[%c0_11, %c0_12] : memref<9x512xf32, #tpu.memory_space<vmem>>, vector<9x512xf32>
    %cst_13 = arith.constant 0.000000e+00 : f32
    %32 = vector.broadcast %cst_13 : f32 to vector<64x512xf32>
    %33 = vector.extract_strided_slice %31 {offsets = [0, 0], sizes = [1, 512], strides = [1, 1]} : vector<9x512xf32> to vector<1x512xf32>
    %34 = vector.broadcast %33 : vector<1x512xf32> to vector<64x512xf32>
    %35 = arith.mulf %20, %34 : vector<64x512xf32>
    %36 = vector.extract_strided_slice %31 {offsets = [1, 0], sizes = [1, 512], strides = [1, 1]} : vector<9x512xf32> to vector<1x512xf32>
    %37 = vector.broadcast %36 : vector<1x512xf32> to vector<64x512xf32>
    %38 = arith.mulf %12, %37 : vector<64x512xf32>
    %39 = arith.addf %35, %38 : vector<64x512xf32>
    %40 = vector.extract_strided_slice %31 {offsets = [2, 0], sizes = [1, 512], strides = [1, 1]} : vector<9x512xf32> to vector<1x512xf32>
    %41 = vector.broadcast %40 : vector<1x512xf32> to vector<64x512xf32>
    %42 = arith.mulf %27, %41 : vector<64x512xf32>
    %43 = arith.addf %39, %42 : vector<64x512xf32>
    %c1_i32 = arith.constant 1 : i32
    %44 = tpu.dynamic_rotate %43 by %c1_i32 dim 0 : vector<64x512xf32>, i32 -> vector<64x512xf32>
    %c1_i32_14 = arith.constant 1 : i32
    %45 = vector.broadcast %c1_i32_14 : i32 to vector<64x1xi32>
    %46 = arith.cmpi sge, %30, %45 : vector<64x1xi32>
    %cst_15 = arith.constant 0.000000e+00 : f32
    %47 = vector.shape_cast %46 : vector<64x1xi1> to vector<64x1xi1>
    %48 = vector.broadcast %47 : vector<64x1xi1> to vector<64x512xi1>
    %49 = vector.broadcast %cst_15 : f32 to vector<64x512xf32>
    %50 = arith.select %48, %44, %49 : vector<64x512xi1>, vector<64x512xf32>
    %51 = arith.addf %32, %50 : vector<64x512xf32>
    %52 = vector.extract_strided_slice %31 {offsets = [3, 0], sizes = [1, 512], strides = [1, 1]} : vector<9x512xf32> to vector<1x512xf32>
    %53 = vector.broadcast %52 : vector<1x512xf32> to vector<64x512xf32>
    %54 = arith.mulf %20, %53 : vector<64x512xf32>
    %55 = vector.extract_strided_slice %31 {offsets = [4, 0], sizes = [1, 512], strides = [1, 1]} : vector<9x512xf32> to vector<1x512xf32>
    %56 = vector.broadcast %55 : vector<1x512xf32> to vector<64x512xf32>
    %57 = arith.mulf %12, %56 : vector<64x512xf32>
    %58 = arith.addf %54, %57 : vector<64x512xf32>
    %59 = vector.extract_strided_slice %31 {offsets = [5, 0], sizes = [1, 512], strides = [1, 1]} : vector<9x512xf32> to vector<1x512xf32>
    %60 = vector.broadcast %59 : vector<1x512xf32> to vector<64x512xf32>
    %61 = arith.mulf %27, %60 : vector<64x512xf32>
    %62 = arith.addf %58, %61 : vector<64x512xf32>
    %63 = arith.addf %51, %62 : vector<64x512xf32>
    %64 = vector.extract_strided_slice %31 {offsets = [6, 0], sizes = [1, 512], strides = [1, 1]} : vector<9x512xf32> to vector<1x512xf32>
    %65 = vector.broadcast %64 : vector<1x512xf32> to vector<64x512xf32>
    %66 = arith.mulf %20, %65 : vector<64x512xf32>
    %67 = vector.extract_strided_slice %31 {offsets = [7, 0], sizes = [1, 512], strides = [1, 1]} : vector<9x512xf32> to vector<1x512xf32>
    %68 = vector.broadcast %67 : vector<1x512xf32> to vector<64x512xf32>
    %69 = arith.mulf %12, %68 : vector<64x512xf32>
    %70 = arith.addf %66, %69 : vector<64x512xf32>
    %71 = vector.extract_strided_slice %31 {offsets = [8, 0], sizes = [1, 512], strides = [1, 1]} : vector<9x512xf32> to vector<1x512xf32>
    %72 = vector.broadcast %71 : vector<1x512xf32> to vector<64x512xf32>
    %73 = arith.mulf %27, %72 : vector<64x512xf32>
    %74 = arith.addf %70, %73 : vector<64x512xf32>
    %c63_i32 = arith.constant 63 : i32
    %75 = tpu.dynamic_rotate %74 by %c63_i32 dim 0 : vector<64x512xf32>, i32 -> vector<64x512xf32>
    %c15_i32_16 = arith.constant 15 : i32
    %76 = vector.broadcast %c15_i32_16 : i32 to vector<64x1xi32>
    %77 = arith.cmpi slt, %30, %76 : vector<64x1xi32>
    %cst_17 = arith.constant 0.000000e+00 : f32
    %78 = vector.shape_cast %77 : vector<64x1xi1> to vector<64x1xi1>
    %79 = vector.broadcast %78 : vector<64x1xi1> to vector<64x512xi1>
    %80 = vector.broadcast %cst_17 : f32 to vector<64x512xf32>
    %81 = arith.select %79, %75, %80 : vector<64x512xi1>, vector<64x512xf32>
    %82 = arith.addf %63, %81 : vector<64x512xf32>
    %c0_18 = arith.constant 0 : index
    %c0_19 = arith.constant 0 : index
    %83 = vector.load %arg5[%c0_18, %c0_19] : memref<1x512xf32, #tpu.memory_space<vmem>>, vector<1x512xf32>
    %84 = vector.broadcast %83 : vector<1x512xf32> to vector<64x512xf32>
    %85 = arith.addf %82, %84 : vector<64x512xf32>
    %86 = arith.negf %85 : vector<64x512xf32>
    %87 = math.exp %86 : vector<64x512xf32>
    %cst_20 = arith.constant 1.000000e+00 : f32
    %88 = vector.broadcast %cst_20 : f32 to vector<64x512xf32>
    %89 = arith.addf %88, %87 : vector<64x512xf32>
    %90 = arith.divf %88, %89 : vector<64x512xf32>
    %91 = arith.mulf %85, %90 : vector<64x512xf32>
    %92 = vector.shape_cast %91 : vector<64x512xf32> to vector<4x16x512xf32>
    %cst_21 = arith.constant dense<0.000000e+00> : vector<4x512xf32>
    %93 = vector.multi_reduction <add>, %92, %cst_21 [1] : vector<4x16x512xf32> to vector<4x512xf32>
    %c256_i32 = arith.constant 256 : i32
    %94 = tpu.dynamic_rotate %93 by %c256_i32 dim 1 : vector<4x512xf32>, i32 -> vector<4x512xf32>
    %95 = arith.addf %93, %94 : vector<4x512xf32>
    %c128_i32 = arith.constant 128 : i32
    %96 = tpu.dynamic_rotate %95 by %c128_i32 dim 1 : vector<4x512xf32>, i32 -> vector<4x512xf32>
    %97 = arith.addf %95, %96 : vector<4x512xf32>
    %c64_i32 = arith.constant 64 : i32
    %98 = tpu.dynamic_rotate %97 by %c64_i32 dim 1 : vector<4x512xf32>, i32 -> vector<4x512xf32>
    %99 = arith.addf %97, %98 : vector<4x512xf32>
    %c32_i32_22 = arith.constant 32 : i32
    %100 = tpu.dynamic_rotate %99 by %c32_i32_22 dim 1 : vector<4x512xf32>, i32 -> vector<4x512xf32>
    %101 = arith.addf %99, %100 : vector<4x512xf32>
    %102 = vector.extract_strided_slice %101 {offsets = [0, 0], sizes = [4, 32], strides = [1, 1]} : vector<4x512xf32> to vector<4x32xf32>
    %cst_23 = arith.constant 3.906250e-03 : f32
    %103 = vector.broadcast %cst_23 : f32 to vector<4x32xf32>
    %104 = arith.mulf %102, %103 : vector<4x32xf32>
    %c0_24 = arith.constant 0 : index
    %c0_25 = arith.constant 0 : index
    %105 = vector.load %arg6[%c0_24, %c0_25] : memref<2x32xf32, #tpu.memory_space<vmem>>, vector<2x32xf32>
    %c0_26 = arith.constant 0 : index
    %c0_27 = arith.constant 0 : index
    %106 = vector.load %arg8[%c0_26, %c0_27] : memref<2x512xf32, #tpu.memory_space<vmem>>, vector<2x512xf32>
    %c0_28 = arith.constant 0 : index
    %c0_29 = arith.constant 0 : index
    %107 = vector.load %arg7[%c0_28, %c0_29] : memref<1x2xf32, #tpu.memory_space<vmem>>, vector<1x2xf32>
    %c0_30 = arith.constant 0 : index
    %c0_31 = arith.constant 0 : index
    %108 = vector.load %arg9[%c0_30, %c0_31] : memref<1x512xf32, #tpu.memory_space<vmem>>, vector<1x512xf32>
    %109 = vector.shape_cast %108 : vector<1x512xf32> to vector<1x512xf32>
    %110 = vector.broadcast %109 : vector<1x512xf32> to vector<4x512xf32>
    %111 = vector.extract_strided_slice %105 {offsets = [0, 0], sizes = [1, 32], strides = [1, 1]} : vector<2x32xf32> to vector<1x32xf32>
    %112 = vector.broadcast %111 : vector<1x32xf32> to vector<4x32xf32>
    %113 = arith.mulf %104, %112 : vector<4x32xf32>
    %cst_32 = arith.constant dense<0.000000e+00> : vector<4xf32>
    %114 = vector.multi_reduction <add>, %113, %cst_32 [1] : vector<4x32xf32> to vector<4xf32>
    %115 = vector.shape_cast %114 : vector<4xf32> to vector<4x1xf32>
    %116 = vector.extract_strided_slice %107 {offsets = [0, 0], sizes = [1, 1], strides = [1, 1]} : vector<1x2xf32> to vector<1x1xf32>
    %117 = vector.broadcast %116 : vector<1x1xf32> to vector<4x1xf32>
    %118 = arith.addf %115, %117 : vector<4x1xf32>
    %119 = arith.negf %118 : vector<4x1xf32>
    %120 = math.exp %119 : vector<4x1xf32>
    %cst_33 = arith.constant 1.000000e+00 : f32
    %121 = vector.broadcast %cst_33 : f32 to vector<4x1xf32>
    %122 = arith.addf %121, %120 : vector<4x1xf32>
    %123 = arith.divf %121, %122 : vector<4x1xf32>
    %124 = arith.mulf %118, %123 : vector<4x1xf32>
    %125 = vector.extract_strided_slice %106 {offsets = [0, 0], sizes = [1, 512], strides = [1, 1]} : vector<2x512xf32> to vector<1x512xf32>
    %126 = vector.broadcast %124 : vector<4x1xf32> to vector<4x512xf32>
    %127 = vector.broadcast %125 : vector<1x512xf32> to vector<4x512xf32>
    %128 = arith.mulf %126, %127 : vector<4x512xf32>
    %129 = arith.addf %110, %128 : vector<4x512xf32>
    %130 = vector.extract_strided_slice %105 {offsets = [1, 0], sizes = [1, 32], strides = [1, 1]} : vector<2x32xf32> to vector<1x32xf32>
    %131 = vector.broadcast %130 : vector<1x32xf32> to vector<4x32xf32>
    %132 = arith.mulf %104, %131 : vector<4x32xf32>
    %cst_34 = arith.constant dense<0.000000e+00> : vector<4xf32>
    %133 = vector.multi_reduction <add>, %132, %cst_34 [1] : vector<4x32xf32> to vector<4xf32>
    %134 = vector.shape_cast %133 : vector<4xf32> to vector<4x1xf32>
    %135 = vector.extract_strided_slice %107 {offsets = [0, 1], sizes = [1, 1], strides = [1, 1]} : vector<1x2xf32> to vector<1x1xf32>
    %136 = vector.broadcast %135 : vector<1x1xf32> to vector<4x1xf32>
    %137 = arith.addf %134, %136 : vector<4x1xf32>
    %138 = arith.negf %137 : vector<4x1xf32>
    %139 = math.exp %138 : vector<4x1xf32>
    %cst_35 = arith.constant 1.000000e+00 : f32
    %140 = vector.broadcast %cst_35 : f32 to vector<4x1xf32>
    %141 = arith.addf %140, %139 : vector<4x1xf32>
    %142 = arith.divf %140, %141 : vector<4x1xf32>
    %143 = arith.mulf %137, %142 : vector<4x1xf32>
    %144 = vector.extract_strided_slice %106 {offsets = [1, 0], sizes = [1, 512], strides = [1, 1]} : vector<2x512xf32> to vector<1x512xf32>
    %145 = vector.broadcast %143 : vector<4x1xf32> to vector<4x512xf32>
    %146 = vector.broadcast %144 : vector<1x512xf32> to vector<4x512xf32>
    %147 = arith.mulf %145, %146 : vector<4x512xf32>
    %148 = arith.addf %129, %147 : vector<4x512xf32>
    %149 = arith.negf %148 : vector<4x512xf32>
    %150 = math.exp %149 : vector<4x512xf32>
    %cst_36 = arith.constant 1.000000e+00 : f32
    %151 = vector.broadcast %cst_36 : f32 to vector<4x512xf32>
    %152 = arith.addf %151, %150 : vector<4x512xf32>
    %153 = arith.divf %151, %152 : vector<4x512xf32>
    %154 = vector.shape_cast %153 : vector<4x512xf32> to vector<4x1x512xf32>
    %155 = vector.broadcast %154 : vector<4x1x512xf32> to vector<4x16x512xf32>
    %156 = arith.mulf %92, %155 : vector<4x16x512xf32>
    %157 = vector.shape_cast %156 : vector<4x16x512xf32> to vector<64x512xf32>
    %c0_37 = arith.constant 0 : index
    %c0_38 = arith.constant 0 : index
    %158 = vector.load %arg10[%c0_37, %c0_38] : memref<512x128xf32, #tpu.memory_space<vmem>>, vector<512x128xf32>
    %cst_39 = arith.constant dense<0.000000e+00> : vector<64x128xf32>
    %159 = tpu.matmul %157, %158, %cst_39 {dimension_numbers = #tpu.dot_dimension_numbers<[1], [0], [0], [1], [0, 0, 1, 1], [], []>} : vector<64x512xf32>, vector<512x128xf32>, vector<64x128xf32> -> vector<64x128xf32>
    %c0_40 = arith.constant 0 : index
    %c0_41 = arith.constant 0 : index
    %160 = vector.load %arg11[%c0_40, %c0_41] : memref<1x128xf32, #tpu.memory_space<vmem>>, vector<1x128xf32>
    %161 = vector.broadcast %160 : vector<1x128xf32> to vector<64x128xf32>
    %162 = arith.addf %159, %161 : vector<64x128xf32>
    %163 = arith.addf %162, %1 : vector<64x128xf32>
    %164 = vector.shape_cast %163 : vector<64x128xf32> to vector<4x16x128xf32>
    %c0_42 = arith.constant 0 : index
    %c0_43 = arith.constant 0 : index
    %c0_44 = arith.constant 0 : index
    %165 = vector.load %arg12[%c0_42, %c0_43, %c0_44] : memref<4x16x128xf32, #tpu.memory_space<vmem>>, vector<4x16x128xf32>
    tpu.vector_store %arg12[%c0_42, %c0_43, %c0_44], %164 {strides = array<i32>} : memref<4x16x128xf32, #tpu.memory_space<vmem>>, vector<4x16x128xf32>,
    return
  }
  func.func @transform_0(%arg0: i32) -> (i32, i32, i32) {
    %c0_i32 = arith.constant 0 : i32
    %c0_i32_0 = arith.constant 0 : i32
    %c0_i32_1 = arith.constant 0 : i32
    return %arg0, %c0_i32, %c0_i32_0 : i32, i32, i32
  }
  func.func @transform_1(%arg0: i32) -> (i32, i32) {
    %c0_i32 = arith.constant 0 : i32
    %c0_i32_0 = arith.constant 0 : i32
    %c0_i32_1 = arith.constant 0 : i32
    return %c0_i32, %c0_i32_0 : i32, i32
  }
  func.func @transform_2(%arg0: i32) -> (i32, i32) {
    %c0_i32 = arith.constant 0 : i32
    %c0_i32_0 = arith.constant 0 : i32
    %c0_i32_1 = arith.constant 0 : i32
    return %c0_i32, %c0_i32_0 : i32, i32
  }
  func.func @transform_3(%arg0: i32) -> (i32, i32) {
    %c0_i32 = arith.constant 0 : i32
    %c0_i32_0 = arith.constant 0 : i32
    %c0_i32_1 = arith.constant 0 : i32
    return %c0_i32, %c0_i32_0 : i32, i32
  }
  func.func @transform_4(%arg0: i32) -> (i32, i32) {
    %c0_i32 = arith.constant 0 : i32
    %c0_i32_0 = arith.constant 0 : i32
    %c0_i32_1 = arith.constant 0 : i32
    return %c0_i32, %c0_i32_0 : i32, i32
  }
  func.func @transform_5(%arg0: i32) -> (i32, i32) {
    %c0_i32 = arith.constant 0 : i32
    %c0_i32_0 = arith.constant 0 : i32
    %c0_i32_1 = arith.constant 0 : i32
    return %c0_i32, %c0_i32_0 : i32, i32
  }
  func.func @transform_6(%arg0: i32) -> (i32, i32) {
    %c0_i32 = arith.constant 0 : i32
    %c0_i32_0 = arith.constant 0 : i32
    %c0_i32_1 = arith.constant 0 : i32
    return %c0_i32, %c0_i32_0 : i32, i32
  }
  func.func @transform_7(%arg0: i32) -> (i32, i32) {
    %c0_i32 = arith.constant 0 : i32
    %c0_i32_0 = arith.constant 0 : i32
    %c0_i32_1 = arith.constant 0 : i32
    return %c0_i32, %c0_i32_0 : i32, i32
  }
  func.func @transform_8(%arg0: i32) -> (i32, i32) {
    %c0_i32 = arith.constant 0 : i32
    %c0_i32_0 = arith.constant 0 : i32
    %c0_i32_1 = arith.constant 0 : i32
    return %c0_i32, %c0_i32_0 : i32, i32
  }
  func.func @transform_9(%arg0: i32) -> (i32, i32) {
    %c0_i32 = arith.constant 0 : i32
    %c0_i32_0 = arith.constant 0 : i32
    %c0_i32_1 = arith.constant 0 : i32
    return %c0_i32, %c0_i32_0 : i32, i32
  }
  func.func @transform_10(%arg0: i32) -> (i32, i32) {
    %c0_i32 = arith.constant 0 : i32
    %c0_i32_0 = arith.constant 0 : i32
    %c0_i32_1 = arith.constant 0 : i32
    return %c0_i32, %c0_i32_0 : i32, i32
  }
  func.func @transform_11(%arg0: i32) -> (i32, i32, i32) {
    %c0_i32 = arith.constant 0 : i32
    %c0_i32_0 = arith.constant 0 : i32
    %c0_i32_1 = arith.constant 0 : i32
    return %arg0, %c0_i32, %c0_i32_0 : i32, i32, i32
  }
}

</mosaic_0001>

<bundles_post_ra>
// kernel: tpu_custom_call.1
= control target key start
LH: loop header
LB: loop body
LE: loop exit
PB: predicated region body
PF: predicated region fallthrough
CT: control target
= control target key end

     0   :  { %s7998_s0 = inlined_call_operand.hbm [shape: f32[8,16,128], index: 0, kind: input, shape index: {}]   ;;  %s7999_s1 = inlined_call_operand.hbm [shape: f32[128,512], index: 1, kind: input, shape index: {}]   ;;  %s8000_s2 = inlined_call_operand.vmem [shape: f32[1,512], index: 2, kind: input, shape index: {}]   ;;  %s8001_s3 = inlined_call_operand.hbm [shape: f32[9,512], index: 3, kind: input, shape index: {}]   ;;  %s8002_s4 = inlined_call_operand.hbm [shape: f32[1,512], index: 4, kind: input, shape index: {}]   ;;  %s8003_s5 = inlined_call_operand.vmem [shape: f32[2,32], index: 5, kind: input, shape index: {}]   ;;  %s8004_s6 = inlined_call_operand.vmem [shape: f32[1,2], index: 6, kind: input, shape index: {}]   ;;  %s8005_s7 = inlined_call_operand.vmem [shape: f32[2,512], index: 7, kind: input, shape index: {}]   ;;  %s8006_s8 = inlined_call_operand.vmem [shape: f32[1,512], index: 8, kind: input, shape index: {}]   ;;  %s8007_s9 = inlined_call_operand.hbm [shape: f32[512,128], index: 9, kind: input, shape index: {}]   ;;  %s8008_s10 = inlined_call_operand.vmem [shape: f32[1,128], index: 10, kind: input, shape index: {}]   ;;  %s8009_s11 = inlined_call_operand.hbm [shape: f32[8,16,128], index: 11, kind: output, shape index: {}]  }
   0x1   :  { %8244 = sst [smem:[#allocation133_spill]] %s8006_s8 }
   0x2   :  { %8245 = sst [smem:[#allocation134_spill]] %s8008_s10 }
   0x3   :  { %8246 = sst [smem:[#allocation135_spill]] %s8009_s11 }
   0x4   :  { %16 = vsyncpa [#allocation3], 0 }
   0x5   :  { %18 = vsyncpa [#allocation3 + $0x1], 0 }
   0x6   :  { %19 = vsyncpa [#allocation6], 0 }
   0x7   :  { %20 = vsyncpa [#allocation9], 0 }
   0x8   :  { %21 = vsyncpa [#allocation4], 0 }
   0x9   :  { %23 = vsyncpa [#allocation4 + $0x1], 0  ;;  %s4743_s17 = smov 0   ;;  %s4745_s18 = smov 0  }
   0xa   :  { %s4747_s19 = smov 0   ;;  %s4749_s20 = smov 0  }
   0xb LB: > { %8247 = sst [smem:[#allocation16_spill]] %s4650_s17  ;;  %s4764_s21 = sadd.s32 4294967295, %s4662_s20   ;;  %s4662_s20 = sphi %s4749_s20, %s8875_s20   ;;  %s4658_s19 = sphi %s4747_s19, %s8874_s19   ;;  %s4654_s18 = sphi %s4745_s18, %s8873_s18   ;;  %s4650_s17 = sphi %s4743_s17, %s8872_s17  }
   0xc   : > { %s3707_s22 = sadd.s32 4294967294, %s4662_s20   ;;  %p49_p0 = scmp.ne.s32.totalorder %s4654_s18, %s4650_s17 }
   0xd   : > { %p8011_p1 = scmp.eq.s32.totalorder %s4764_s21, 0  ;;  %p289_p3 = scmp.eq.s32.totalorder %s3707_s22, 1 }
   0xe   : > { %p3708_p5 = scmp.ge.s32.totalorder %s4662_s20, 1  ;;  %p296_p7 = scmp.lt.s32.totalorder %s4662_s20, 3 }
   0xf   : > { %p4773_p4 = por %p8011_p1, %p49_p0  ;;  %p4778_p6 = por %p289_p3, %p49_p0 }
  0x10   : > { %p4783_p8 = pnand %p3708_p5, %p296_p7  ;;  %s4664_s26 = smov [#allocation5]  }
  0x11   : > { %s8248_s23 = scalar_select %p4773_p4, 1, 0 }
  0x12   : > { %s8249_s24 = scalar_select %p4778_p6, 1, 0 }
  0x13   : > { %s8251_s25 = scalar_select %p4783_p8, 1, 0 }
  0x14   : > { %8250 = sst [smem:[#allocation17_spill]] %s8249_s24  ;;  %s308_s27 = sshll.u32 %s4664_s26, 4  ;;  %s4787_s27 = int_to_ptr.vmem [resolvable:$true] %s308_s27 }
  0x15   : > { %p4071_p9 = pneg %p4783_p8  ;;  %s4665_s29 = smov [#allocation8]  }
  0x16   : > { %s338_s30 = sshll.u32 %s4665_s29, 4  ;;  %s4666_s12 = smov [#allocation7]   ;;  %s4798_s30 = int_to_ptr.vmem [resolvable:$true] %s338_s30 }
  0x17   : > { %p4794_p11 = pnand %p4071_p9, %p8011_p1  ;;  %s4800_s13 = sshll.u32 %s4666_s12, 4  ;;  %s325_s13 = int_to_ptr.vmem [resolvable:$true] %s4800_s13 }
  0x18   : > { %s4446_s16 = scalar_lea.hbm %s7999_s1, 8192 }
  0x19   : > { %p4447_p12 = scmp.ne.s32.totalorder %s7999_s1, %s4446_s16  ;;  %p4810_p13 = pneg %p4794_p11 }
  0x1a   : > { %p4453_p5 = scmp.lt.u32.totalorder %s4446_s16, %s7999_s1 }
  0x1b   : > { %p4449_p0 = pnand %p4810_p13, %p4447_p12 }
  0x1d   : > { %p4450_p3 = pneg %p4449_p0 }
  0x1f   : > { %p4455_p7 = pnand %p4453_p5, %p4450_p3 }
  0x21   : > { %4458 = shalt.err (!%p4455_p7)
}
  0x22   : > { %s4459_s14 = scalar_lea.vmem %s4787_s27, 8192  ;;  %p4467_p2 = scmp.lt.s32.totalorder %s4787_s27, %s4787_s27 }
  0x23   : > { %p4460_p9 = scmp.ne.s32.totalorder %s4787_s27, %s4459_s14  ;;  %p4468_p6 = scmp.lt.s32.totalorder %s4459_s14, %s4459_s14 }
  0x25   : > { %p4462_p10 = pnand %p4460_p9, %p4810_p13  ;;  %p4469_p12 = por %p4468_p6, %p4467_p2 }
  0x27   : > { %p4463_p1 = pneg %p4462_p10 }
  0x29   : > { %p4470_p0 = pnand %p4469_p12, %p4463_p1 }
  0x2b   : > { %4473 = shalt.err (!%p4470_p0)
}
  0x2c   : > { %s4667_s15 = smov 512   ;;  %s4668_s16 = smov 32  }
  0x2d   : > { %4074 = dma.hbm_to_vmem [thread:$0]  (!%p4794_p11), %s7999_s1, 8192, %s4787_s27, [#allocation6], %s4667_s15, %s4667_s15, %s4668_s16  }
  0x2e   : > { %s4474_s14 = scalar_lea.hbm %s8002_s4, 64 }
  0x2f   : > { %p4475_p1 = scmp.ne.s32.totalorder %s8002_s4, %s4474_s14  ;;  %p4481_p10 = scmp.lt.u32.totalorder %s4474_s14, %s8002_s4 }
  0x31   : > { %p4477_p2 = pnand %p4475_p1, %p4810_p13 }
  0x33   : > { %p4478_p6 = pneg %p4477_p2 }
  0x35   : > { %p4483_p3 = pnand %p4481_p10, %p4478_p6 }
  0x37   : > { %4486 = shalt.err (!%p4483_p3)
}
  0x38   : > { %s4487_s27 = scalar_lea.vmem %s4798_s30, 64  ;;  %p4495_p12 = scmp.lt.s32.totalorder %s4798_s30, %s4798_s30 }
  0x39   : > { %p4488_p5 = scmp.ne.s32.totalorder %s4798_s30, %s4487_s27  ;;  %p4496_p0 = scmp.lt.s32.totalorder %s4487_s27, %s4487_s27 }
  0x3b   : > { %p4490_p7 = pnand %p4488_p5, %p4810_p13  ;;  %p4497_p1 = por %p4496_p0, %p4495_p12 }
  0x3d   : > { %p4491_p9 = pneg %p4490_p7 }
  0x3f   : > { %p4498_p2 = pnand %p4497_p1, %p4491_p9 }
  0x41   : > { %4501 = shalt.err (!%p4498_p2)
}
  0x42   : > { %4080 = dma.hbm_to_vmem [thread:$0]  (!%p4794_p11), %s8002_s4, 64, %s4798_s30, [#allocation9]  }
  0x43   : > { %s4502_s22 = scalar_lea.hbm %s8001_s3, 1024 }
  0x44   : > { %p4503_p6 = scmp.ne.s32.totalorder %s8001_s3, %s4502_s22  ;;  %p4509_p5 = scmp.lt.u32.totalorder %s4502_s22, %s8001_s3 }
  0x46   : > { %p4505_p10 = pnand %p4503_p6, %p4810_p13 }
  0x48   : > { %p4506_p3 = pneg %p4505_p10 }
  0x4a   : > { %p4511_p7 = pnand %p4509_p5, %p4506_p3 }
  0x4c   : > { %4514 = shalt.err (!%p4511_p7)
}
  0x4d   : > { %s4515_s27 = scalar_lea.vmem %s325_s13, 1024  ;;  %p4523_p1 = scmp.lt.s32.totalorder %s325_s13, %s325_s13 }
  0x4e   : > { %p4516_p9 = scmp.ne.s32.totalorder %s325_s13, %s4515_s27  ;;  %p4524_p2 = scmp.lt.s32.totalorder %s4515_s27, %s4515_s27 }
  0x50   : > { %p4518_p12 = pnand %p4516_p9, %p4810_p13  ;;  %p4525_p4 = por %p4524_p2, %p4523_p1 }
  0x52   : > { %p4519_p0 = pneg %p4518_p12 }
  0x54   : > { %p4526_p8 = pnand %p4525_p4, %p4519_p0 }
  0x56   : > { %4529 = shalt.err (!%p4526_p8)
}
  0x57   : > { %4077 = dma.hbm_to_vmem [thread:$0]  (!%p4794_p11), %s8001_s3, 1024, %s325_s13, [#allocation6], %s4667_s15, %s4667_s15, %s4668_s16  }
  0x58   : > { %s4669_s10 = smov [#allocation10]   ;;  %s4530_s26 = scalar_lea.hbm %s8007_s9, 8192 }
  0x59   : > { %s360_s11 = sshll.u32 %s4669_s10, 4  ;;  %p4531_p4 = scmp.ne.s32.totalorder %s8007_s9, %s4530_s26  ;;  %s361_s11 = int_to_ptr.vmem [resolvable:$true] %s360_s11 }
  0x5a   : > { %p4537_p10 = scmp.lt.u32.totalorder %s4530_s26, %s8007_s9 }
  0x5b   : > { %p4533_p8 = pnand %p4531_p4, %p4810_p13 }
  0x5d   : > { %p4534_p6 = pneg %p4533_p8 }
  0x5f   : > { %p4539_p3 = pnand %p4537_p10, %p4534_p6 }
  0x61   : > { %4542 = shalt.err (!%p4539_p3)
}
  0x62   : > { %s4543_s13 = scalar_lea.vmem %s361_s11, 8192  ;;  %p4551_p12 = scmp.lt.s32.totalorder %s361_s11, %s361_s11 }
  0x63   : > { %p4544_p5 = scmp.ne.s32.totalorder %s361_s11, %s4543_s13  ;;  %p4552_p0 = scmp.lt.s32.totalorder %s4543_s13, %s4543_s13 }
  0x65   : > { %p4546_p7 = pnand %p4544_p5, %p4810_p13  ;;  %p4553_p1 = por %p4552_p0, %p4551_p12 }
  0x67   : > { %p4547_p9 = pneg %p4546_p7 }
  0x69   : > { %p4554_p2 = pnand %p4553_p1, %p4547_p9 }
  0x6b   : > { %4557 = shalt.err (!%p4554_p2)
}
  0x6c   : > { %s4670_s15 = smov 128   ;;  %s4671_s24 = smov 8  }
  0x6d   : > { %4083 = dma.hbm_to_vmem [thread:$0]  (!%p4794_p11), %s8007_s9, 8192, %s361_s11, [#allocation9], %s4670_s15, %s4670_s15, %s4671_s24  }
  0x6e   : > { %s4901_s8 = sadd.s32 1, %s4662_s20   ;;  %s36_s17 = sadd.s32 1, %s4658_s19 }
  0x6f   : > { %s33_s10 = ssub.s32 %s4662_s20, %s4901_s8  ;;  %p43_p4 = scmp.ne.s32.totalorder %s4658_s19, %s4654_s18 }
  0x70   : > { %p34_p13 = scmp.eq.s32.totalorder %s33_s10, 0  ;;  %p44_p8 = scmp.eq.s32.totalorder %s4662_s20, 0 }
  0x71   : > { %p8254_p10 = scmp.eq.s32.totalorder %s4764_s21, 1  ;;  %p4096_p5 = scmp.lt.s32.totalorder %s4662_s20, 2 }
  0x72   : > { %s4910_s22 = scalar_select %p34_p13, %s4658_s19, %s36_s17  }
  0x73   : > { %p45_p6 = por %p44_p8, %p43_p4  ;;  %p4914_p3 = por %p8254_p10, %p43_p4 }
  0x74   : > { %s377_s26 = sand.u32 1, %s4658_s19   ;;  %s3808_s11 = sshll.u32 %s4662_s20, 10 }
  0x75   : > { %s3714_s29 = sshll.u32 %s377_s26, 6  ;;  %s4924_s27 = scalar_lea.hbm %s7998_s0, %s3808_s11 }
  0x76   : > { %s381_s13 = scalar_lea.vmem [#allocation2], %s3714_s29  ;;  %p4928_p11 = pnand %p4096_p5, %p45_p6 }
  0x77   : > { %s389_s16 = sshll.u32 %s381_s13, 4  ;;  %s4932_s10 = scalar_lea.sflag [#allocation3], %s377_s26  ;;  %s4926_s16 = int_to_ptr.vmem [resolvable:$true] %s389_s16 }
  0x78   : > { %s4558_s17 = scalar_lea.hbm %s4924_s27, 1024  ;;  %p4560_p9 = pneg %p4928_p11 }
  0x79   : > { %p4559_p7 = scmp.ne.s32.totalorder %s4924_s27, %s4558_s17  ;;  %s4563_s12 = scalar_lea.hbm %s7998_s0, 2048 }
  0x7a   : > { %p4564_p1 = scmp.lt.u32.totalorder %s4924_s27, %s7998_s0  ;;  %p4565_p2 = scmp.lt.u32.totalorder %s4563_s12, %s4558_s17 }
  0x7b   : > { %p4561_p12 = pnand %p4560_p9, %p4559_p7  ;;  %p4567_p4 = scmp.lt.u32.totalorder %s4558_s17, %s4924_s27 }
  0x7c   : > { %p4566_p13 = por %p4565_p2, %p4564_p1 }
  0x7d   : > { %p4562_p0 = pneg %p4561_p12 }
  0x7e   : > { %p4568_p8 = por %p4567_p4, %p4566_p13 }
  0x80   : > { %p4569_p6 = pnand %p4568_p8, %p4562_p0 }
  0x82   : > { %4572 = shalt.err (!%p4569_p6)
}
  0x83   : > { %s4573_s26 = scalar_lea.vmem %s4926_s16, 1024  ;;  %s4672_s29 = smov [#allocation2]  }
  0x84   : > { %p4574_p10 = scmp.ne.s32.totalorder %s4926_s16, %s4573_s26  ;;  %s4578_s11 = sshll.u32 %s4672_s29, 4  ;;  %s4579_s11 = int_to_ptr.vmem [resolvable:$false] %s4578_s11 }
  0x85   : > { %s4580_s14 = scalar_lea.vmem %s4579_s11, 2048  ;;  %p4581_p12 = scmp.lt.s32.totalorder %s4926_s16, %s4579_s11 }
  0x86   : > { %p4576_p5 = pnand %p4574_p10, %p4560_p9  ;;  %p4582_p1 = scmp.lt.s32.totalorder %s4580_s14, %s4573_s26 }
  0x88   : > { %p4577_p7 = pneg %p4576_p5  ;;  %p4583_p2 = por %p4582_p1, %p4581_p12 }
  0x8a   : > { %p4584_p13 = pnand %p4583_p2, %p4577_p7 }
  0x8c   : > { %4587 = shalt.err (!%p4584_p13)
}
  0x8d   : > { %4087 = dma.hbm_to_vmem [thread:$0]  (!%p4928_p11), %s4924_s27, 1024, %s4926_s16, %s4932_s10, %s4670_s15, %s4670_s15, %s4671_s24  }
  0x8e   : > { %p8257_p9 = scmp.ne.s32.totalorder %s8251_s25, 0 }
  0x90   : > { %401 = sbr.rel (%p8257_p9) target bundleno = 1762 (0x6e2), region = 64 }
  0x97   : > { %s4966_s17 = sand.u32 1, %s4654_s18   ;;  %p8258_p0 = scmp.ne.s32.totalorder %s8248_s23, 0 }
  0x98   : > { %s3719_s12 = sshll.u32 %s4966_s17, 6  ;;  %s404_s13 = scalar_lea.sflag [#allocation3], %s4966_s17 }
  0x99   : > { %s4972_s30 = scalar_lea.vmem [#allocation2], %s3719_s12 }
  0x9a   : > { %4633 = dma.done.wait (%p8258_p0), %s404_s13, 1024  }
  0x9b   : > { %4635 = vsyncadd (%p8258_p0), %s404_s13, 4294966272  ;;  %p8259_p11 = scmp.eq.s32.totalorder %s4764_s21, 0 }
  0x9d   : > { %4637 = dma.done.wait (%p8259_p11), [#allocation6], 9216   ;;  %p8260_p4 = pmov %p8259_p11 }
  0x9f   : > { %4639 = vsyncadd (%p8260_p4), [#allocation6], 4294958080  ;;  %p8261_p8 = pmov %p8260_p4 }
  0xa0   : > { %p8262_p6 = pmov %p8260_p4 }
  0xa1   : > { %4641 = dma.done.wait (%p8261_p8), [#allocation9], 8256  }
  0xa2   : > { %4643 = vsyncadd (%p8262_p6), [#allocation9], 4294959040  ;;  %v4673_v0 = vmov 0.0   ;;  %v473_v1 = vld [vmem:[#allocation5 + $0x8] sm:$0xff]  ;;  %v475_v3 = vld [vmem:[#allocation5 + $0x18] sm:$0xff]  ;;  %s4674_s15 = smov 32  }
  0xa3   : > { %622 = vmatprep.mubr.f32.mxu0 %v4673_v0  ;;  %735 = vmatprep.mubr.f32.mxu1 %v4673_v0  ;;  %v477_v2 = vld [vmem:[#allocation5 + $0x28] sm:$0xff]  ;;  %v479_v5 = vld [vmem:[#allocation5 + $0x38] sm:$0xff]  ;;  %v472_v6 = vld [vmem:[#allocation5] sm:$0xff]  ;;  %s4675_s24 = smov 96   ;;  %vm2688_vm14 = vcmask 1041409   ;;  %vm2690_vm15 = vcmask 1042434  }
  0xa4   : > { %v3923_v4 = vpack.c.bf16 %v477_v2, %v473_v1  ;;  %v476_v7 = vld [vmem:[#allocation5 + $0x20] sm:$0xff]  ;;  %v3955_v8 = vpack.c.bf16 %v479_v5, %v475_v3  ;;  %v474_v10 = vld [vmem:[#allocation5 + $0x10] sm:$0xff]  ;;  %v481_v12 = vld [vmem:[#allocation5 + $0x48] sm:$0xff]  ;;  %s4676_s27 = smov 64   ;;  %s8853_s25 = sld [smem:[#allocation133_spill]] }
  0xa5   : > { %v3925_v9 = vpack.c.bf16 %v476_v7, %v472_v6  ;;  %v478_v11 = vld [vmem:[#allocation5 + $0x30] sm:$0xff]  ;;  %v485_v14 = vld [vmem:[#allocation5 + $0x68] sm:$0xff]  ;;  %v483_v15 = vld [vmem:[#allocation5 + $0x58] sm:$0xff]  ;;  %s7924_s16 = scalar_lea.vmem [#allocation11], %s3719_s12  ;;  %s3810_s12 = sshll.u32 %s4764_s21, 10 }
  0xa6   : > { %3924 = vmatprep.subr.bf16.mxu0 %v3923_v4  ;;  %v3957_v13 = vpack.c.bf16 %v478_v11, %v474_v10  ;;  %v487_v16 = vld [vmem:[#allocation5 + $0x78] sm:$0xff]  ;;  %3956 = vmatprep.subr.bf16.mxu1 %v3955_v8  ;;  %v3927_v17 = vpack.c.bf16 %v485_v14, %v481_v12  ;;  %v480_v19 = vld [vmem:[#allocation5 + $0x40] sm:$0xff]  ;;  %v482_v21 = vld [vmem:[#allocation5 + $0x50] sm:$0xff]  ;;  %s3596_s10 = sshll.u32 %s7924_s16, 4  ;;  %s8867_s11 = sld [smem:[#allocation135_spill]]  ;;  %s7952_s10 = int_to_ptr.vmem [resolvable:$true] %s3596_s10 }
  0xa7   : > { %3926 = vmatpush1.bf16.msra.mxu0 %v3925_v9  ;;  %v3959_v18 = vpack.c.bf16 %v487_v16, %v483_v15  ;;  %v484_v20 = vld [vmem:[#allocation5 + $0x60] sm:$0xff]  ;;  %v486_v23 = vld [vmem:[#allocation5 + $0x70] sm:$0xff]  ;;  %v489_v24 = vld [vmem:[#allocation5 + $0x88] sm:$0xff]  ;;  %s3582_s13 = scalar_lea.sflag [#allocation4], %s4966_s17  ;;  %s4588_s23 = scalar_lea.vmem %s7952_s10, 1024 }
  0xa8   : > { %3958 = vmatpush1.bf16.msra.mxu1 %v3957_v13  ;;  %v3929_v22 = vpack.c.bf16 %v484_v20, %v480_v19  ;;  %v493_v25 = vld [vmem:[#allocation5 + $0xa8] sm:$0xff]  ;;  %3928 = vmatprep.subr.bf16.mxu0 %v3927_v17  ;;  %v3961_v26 = vpack.c.bf16 %v486_v23, %v482_v21  ;;  %v491_v28 = vld [vmem:[#allocation5 + $0x98] sm:$0xff]  ;;  %v488_v30 = vld [vmem:[#allocation5 + $0x80] sm:$0xff]  ;;  %p4589_p10 = scmp.ne.s32.totalorder %s7952_s10, %s4588_s23  ;;  %s4680_s21 = smov [#allocation11]  }
  0xa9   : > { %3960 = vmatprep.subr.bf16.mxu1 %v3959_v18  ;;  %v3931_v27 = vpack.c.bf16 %v493_v25, %v489_v24  ;;  %v495_v29 = vld [vmem:[#allocation5 + $0xb8] sm:$0xff]  ;;  %v492_v32 = vld [vmem:[#allocation5 + $0xa0] sm:$0xff]  ;;  %v490_v33 = vld [vmem:[#allocation5 + $0x90] sm:$0xff] }
  0xaa   : > { %v3963_v31 = vpack.c.bf16 %v495_v29, %v491_v28  ;;  %v494_v34 = vld [vmem:[#allocation5 + $0xb0] sm:$0xff]  ;;  %v3933_v35 = vpack.c.bf16 %v492_v32, %v488_v30  ;;  %v497_v36 = vld [vmem:[#allocation5 + $0xc8] sm:$0xff]  ;;  %v499_v38 = vld [vmem:[#allocation5 + $0xd8] sm:$0xff]  ;;  %p4590_p5 = pnand %p4589_p10, %p4914_p3 }
  0xab   : > { %3930 = vmatpush1.bf16.msra.mxu0 %v3929_v22  ;;  %v501_v37 = vld [vmem:[#allocation5 + $0xe8] sm:$0xff]  ;;  %v3965_v39 = vpack.c.bf16 %v494_v34, %v490_v33  ;;  %v503_v41 = vld [vmem:[#allocation5 + $0xf8] sm:$0xff]  ;;  %v496_v42 = vld [vmem:[#allocation5 + $0xc0] sm:$0xff] }
  0xac   : > { %3962 = vmatpush1.bf16.msra.mxu1 %v3961_v26  ;;  %3932 = vmatprep.subr.bf16.mxu0 %v3931_v27  ;;  %v3935_v40 = vpack.c.bf16 %v501_v37, %v497_v36  ;;  %v500_v43 = vld [vmem:[#allocation5 + $0xe0] sm:$0xff]  ;;  %v3967_v44 = vpack.c.bf16 %v503_v41, %v499_v38  ;;  %v498_v45 = vld [vmem:[#allocation5 + $0xd0] sm:$0xff]  ;;  %v505_v47 = vld [vmem:[#allocation5 + $0x108] sm:$0xff]  ;;  %s7950_s14 = scalar_lea.hbm %s8867_s11, %s3810_s12  ;;  %p4591_p7 = pneg %p4590_p5 }
  0xad   : > { %3964 = vmatprep.subr.bf16.mxu1 %v3963_v31  ;;  %v502_v46 = vld [vmem:[#allocation5 + $0xf0] sm:$0xff]  ;;  %v509_v48 = vld [vmem:[#allocation5 + $0x128] sm:$0xff]  ;;  %v507_v49 = vld [vmem:[#allocation5 + $0x118] sm:$0xff]  ;;  %v3937_v51 = vpack.c.bf16 %v500_v43, %v496_v42  ;;  %v538_v42 = vlaneseq }
  0xae   : > { %v511_v50 = vld [vmem:[#allocation5 + $0x138] sm:$0xff]  ;;  %v3969_v52 = vpack.c.bf16 %v502_v46, %v498_v45  ;;  %v3939_v53 = vpack.c.bf16 %v509_v48, %v505_v47  ;;  %v504_v54 = vld [vmem:[#allocation5 + $0x100] sm:$0xff]  ;;  %v506_v56 = vld [vmem:[#allocation5 + $0x110] sm:$0xff] }
  0xaf   : > { %3934 = vmatpush1.bf16.msra.mxu0 %v3933_v35  ;;  %v508_v55 = vld [vmem:[#allocation5 + $0x120] sm:$0xff]  ;;  %v3971_v57 = vpack.c.bf16 %v511_v50, %v507_v49  ;;  %v510_v58 = vld [vmem:[#allocation5 + $0x130] sm:$0xff]  ;;  %v513_v59 = vld [vmem:[#allocation5 + $0x148] sm:$0xff]  ;;  %v5011_v43 = vshrl.u32 %v538_v42, 7 }
  0xb0   : > { %3966 = vmatpush1.bf16.msra.mxu1 %v3965_v39  ;;  %3936 = vmatprep.subr.bf16.mxu0 %v3935_v40  ;;  %v517_v60 = vld [vmem:[#allocation5 + $0x168] sm:$0xff]  ;;  %v515_v61 = vld [vmem:[#allocation5 + $0x158] sm:$0xff]  ;;  %v3941_v63 = vpack.c.bf16 %v508_v55, %v504_v54  ;;  %v3973_v1 = vpack.c.bf16 %v510_v58, %v506_v56  ;;  %v512_v3 = vld [vmem:[#allocation5 + $0x140] sm:$0xff] }
  0xb1   : > { %3968 = vmatprep.subr.bf16.mxu1 %v3967_v44  ;;  %v519_v62 = vld [vmem:[#allocation5 + $0x178] sm:$0xff]  ;;  %v3943_v2 = vpack.c.bf16 %v517_v60, %v513_v59  ;;  %v516_v4 = vld [vmem:[#allocation5 + $0x160] sm:$0xff]  ;;  %v514_v5 = vld [vmem:[#allocation5 + $0x150] sm:$0xff]  ;;  %v5014_v44 = vsub.s32 0, %v5011_v43  ;;  %v5020_v46 = vsub.s32 2, %v5011_v43  ;;  %v5029_v48 = vsub.s32 3, %v5011_v43 }
  0xb2   : > { %v3975_v6 = vpack.c.bf16 %v519_v62, %v515_v61  ;;  %v518_v7 = vld [vmem:[#allocation5 + $0x170] sm:$0xff]  ;;  %v521_v8 = vld [vmem:[#allocation5 + $0x188] sm:$0xff]  ;;  %v523_v10 = vld [vmem:[#allocation5 + $0x198] sm:$0xff]  ;;  %v3945_v12 = vpack.c.bf16 %v516_v4, %v512_v3  ;;  %vm1560_vm4 = vcmp.lt.s32.totalorder %v5011_v43, 1  ;;  %vm2161_vm5 = vcmp.lt.s32.totalorder %v5011_v43, 7 }
  0xb3   : > { %3938 = vmatpush1.bf16.msra.mxu0 %v3937_v51  ;;  %v525_v9 = vld [vmem:[#allocation5 + $0x1a8] sm:$0xff]  ;;  %v527_v11 = vld [vmem:[#allocation5 + $0x1b8] sm:$0xff]  ;;  %v3977_v13 = vpack.c.bf16 %v518_v7, %v514_v5  ;;  %v520_v15 = vld [vmem:[#allocation5 + $0x180] sm:$0xff]  ;;  %8263 = vst [vmem:[#allocation18_spill] sm:$0xff] %v5014_v44 }
  0xb4   : > { %3970 = vmatpush1.bf16.msra.mxu1 %v3969_v52  ;;  %3940 = vmatprep.subr.bf16.mxu0 %v3939_v53  ;;  %v3947_v14 = vpack.c.bf16 %v525_v9, %v521_v8  ;;  %v524_v16 = vld [vmem:[#allocation5 + $0x1a0] sm:$0xff]  ;;  %v522_v17 = vld [vmem:[#allocation5 + $0x190] sm:$0xff]  ;;  %v3979_v18 = vpack.c.bf16 %v527_v11, %v523_v10  ;;  %v529_v20 = vld [vmem:[#allocation5 + $0x1c8] sm:$0xff]  ;;  %8264 = vst [vmem:[#allocation19_spill] sm:$0xff] %v5020_v46  ;;  %v5035_v52 = vsub.s32 1, %v5011_v43 }
  0xb5   : > { %3972 = vmatprep.subr.bf16.mxu1 %v3971_v57  ;;  %v526_v19 = vld [vmem:[#allocation5 + $0x1b0] sm:$0xff]  ;;  %v533_v21 = vld [vmem:[#allocation5 + $0x1e8] sm:$0xff]  ;;  %v531_v22 = vld [vmem:[#allocation5 + $0x1d8] sm:$0xff]  ;;  %v3949_v24 = vpack.c.bf16 %v524_v16, %v520_v15  ;;  %8265 = vst [vmem:[#allocation20_spill] sm:$0xff] %v5029_v48 }
  0xb6   : > { %v535_v23 = vld [vmem:[#allocation5 + $0x1f8] sm:$0xff]  ;;  %v3981_v25 = vpack.c.bf16 %v526_v19, %v522_v17  ;;  %v3951_v26 = vpack.c.bf16 %v533_v21, %v529_v20  ;;  %v528_v27 = vld [vmem:[#allocation5 + $0x1c0] sm:$0xff]  ;;  %v530_v30 = vld [vmem:[#allocation5 + $0x1d0] sm:$0xff]  ;;  %8266 = vst [vmem:[#allocation21_spill] sm:$0xff] %v5035_v52 }
  0xb7   : > { %3942 = vmatpush1.bf16.msra.mxu0 %v3941_v63  ;;  %v532_v28 = vld [vmem:[#allocation5 + $0x1e0] sm:$0xff]  ;;  %v3983_v29 = vpack.c.bf16 %v535_v23, %v531_v22  ;;  %v534_v31 = vld [vmem:[#allocation5 + $0x1f0] sm:$0xff]  ;;  %v465_v35 = vld [vmem:[%s4972_s30 + $0x8] sm:$0xff] }
  0xb8   : > { %3974 = vmatpush1.bf16.msra.mxu1 %v3973_v1  ;;  %3944 = vmatprep.subr.bf16.mxu0 %v3943_v2  ;;  %v3953_v32 = vpack.c.bf16 %v532_v28, %v528_v27  ;;  %v3985_v33 = vpack.c.bf16 %v534_v31, %v530_v30  ;;  %v464_v34 = vld [vmem:[%s4972_s30] sm:$0xff]  ;;  %v466_v36 = vld [vmem:[%s4972_s30 + $0x10] sm:$0xff]  ;;  %v467_v37 = vld [vmem:[%s4972_s30 + $0x18] sm:$0xff] }
  0xb9   : > { %3976 = vmatprep.subr.bf16.mxu1 %v3975_v6  ;;  %v468_v38 = vld [vmem:[%s4972_s30 + $0x20] sm:$0xff]  ;;  %v469_v39 = vld [vmem:[%s4972_s30 + $0x28] sm:$0xff]  ;;  %v470_v40 = vld [vmem:[%s4972_s30 + $0x30] sm:$0xff] }
  0xba   : > { %v471_v41 = vld [vmem:[%s4972_s30 + $0x38] sm:$0xff]  ;;  %v536_v45 = vld [vmem:[%s8000_s2] sm:$0xf] }
  0xbb   : > { %3946 = vmatpush1.bf16.msra.mxu0 %v3945_v12  ;;  %v5023_v47 = vrot.slane %v536_v45, %v5014_v44  ;;  %v5042_v57 = vrot.slane %v536_v45, %v5029_v48  ;;  %v5046_v60 = vrot.slane %v536_v45, %v5035_v52 }
  0xbc   : > { %3978 = vmatpush1.bf16.msra.mxu1 %v3977_v13  ;;  %3948 = vmatprep.subr.bf16.mxu0 %v3947_v14 }
  0xbd   : > { %3980 = vmatprep.subr.bf16.mxu1 %v3979_v18 }
  0xbf   : > { %3950 = vmatpush1.bf16.msra.mxu0 %v3949_v24 }
  0xc0   : > { %3982 = vmatpush1.bf16.msra.mxu1 %v3981_v25  ;;  %3952 = vmatprep.subr.bf16.mxu0 %v3951_v26 }
  0xc1   : > { %3984 = vmatprep.subr.bf16.mxu1 %v3983_v29 }
  0xc3   : > { %3954 = vmatpush1.bf16.msra.mxu0 %v3953_v32 }
  0xc4   : > { %3986 = vmatpush1.bf16.msra.mxu1 %v3985_v33 }
  0xc6   : > { %623 = vmatmul.mubr.f32.vlgmr.msra.gmra.mrb[0].mxu0 %v464_v34 }
  0xc7   : > { %736 = vmatmul.mubr.f32.vlgmr.msra.gmra.mrb[0].mxu1 %v464_v34  ;;  %628 = vmatprep.mubr.f32.mxu0 %v4673_v0 }
  0xc8   : > { %741 = vmatprep.mubr.f32.mxu1 %v4673_v0 }
  0xca   : > { %629 = vmatmul.mubr.f32.gmra.mrb[2].mxu0 %v465_v35 }
  0xcb   : > { %742 = vmatmul.mubr.f32.gmra.mrb[2].mxu1 %v465_v35  ;;  %634 = vmatprep.mubr.f32.mxu0 %v4673_v0 }
  0xcc   : > { %747 = vmatprep.mubr.f32.mxu1 %v4673_v0 }
  0xce   : > { %635 = vmatmul.mubr.f32.gmra.mrb[4].mxu0 %v466_v36 }
  0xcf   : > { %748 = vmatmul.mubr.f32.gmra.mrb[4].mxu1 %v466_v36  ;;  %640 = vmatprep.mubr.f32.mxu0 %v4673_v0 }
  0xd0   : > { %753 = vmatprep.mubr.f32.mxu1 %v4673_v0 }
  0xd2   : > { %641 = vmatmul.mubr.f32.gmra.mrb[6].mxu0 %v467_v37 }
  0xd3   : > { %754 = vmatmul.mubr.f32.gmra.mrb[6].mxu1 %v467_v37  ;;  %646 = vmatprep.mubr.f32.mxu0 %v4673_v0 }
  0xd4   : > { %759 = vmatprep.mubr.f32.mxu1 %v4673_v0 }
  0xd6   : > { %647 = vmatmul.mubr.f32.gmra.mrb[8].mxu0 %v468_v38 }
  0xd7   : > { %760 = vmatmul.mubr.f32.gmra.mrb[8].mxu1 %v468_v38  ;;  %652 = vmatprep.mubr.f32.mxu0 %v4673_v0 }
  0xd8   : > { %765 = vmatprep.mubr.f32.mxu1 %v4673_v0 }
  0xda   : > { %653 = vmatmul.mubr.f32.gmra.mrb[10].mxu0 %v469_v39 }
  0xdb   : > { %658 = vmatprep.mubr.f32.mxu0 %v4673_v0  ;;  %766 = vmatmul.mubr.f32.gmra.mrb[10].mxu1 %v469_v39 }
  0xdc   : > { %771 = vmatprep.mubr.f32.mxu1 %v4673_v0 }
  0xde   : > { %659 = vmatmul.mubr.f32.gmra.mrb[12].mxu0 %v470_v40 }
  0xdf   : > { %772 = vmatmul.mubr.f32.gmra.mrb[12].mxu1 %v470_v40  ;;  %664 = vmatprep.mubr.f32.mxu0 %v4673_v0 }
  0xe0   : > { %777 = vmatprep.mubr.f32.mxu1 %v4673_v0  ;;  %v5026_v0 = vrot.slane %v536_v45, %v5020_v46 }
  0xe2   : > { %665 = vmatmul.mubr.f32.gmra.mrb[14].mxu0 %v471_v41 }
  0xe3   : > { %778 = vmatmul.mubr.f32.gmra.mrb[14].mxu1 %v471_v41 }
 0x199   : > { %v624_v49 = vpop.f32.mrb[0].mxu0 }
 0x19a   : > { %v5032_v50 = vadd.f32 %v624_v49, %v5023_v47  ;;  %v737_v51 = vpop.f32.mrb[0].mxu1  ;;  %v626_v53 = vpop.f32.mrb[1].mxu0 }
 0x19b   : > { %v5038_v54 = vadd.f32 %v737_v51, %v5026_v0  ;;  %v739_v55 = vpop.f32.mrb[1].mxu1  ;;  %v5063_v8 = vadd.f32 %v626_v53, %v5046_v60 }
 0x19c   : > { %v3725_v56 = vmul.f32 -1.442695, %v5032_v50  ;;  %v5055_v3 = vadd.f32 %v739_v55, %v5042_v57 }
 0x19d   : > { %v3727_v58 = vmul.f32 -1.442695, %v5038_v54  ;;  %v630_v59 = vpop.f32.mrb[2].mxu0  ;;  %v3726_v16 = vmul.f32 -1.442695, %v5063_v8 }
 0x19e   : > { %4154 = vpow2.f32 %v3725_v56  ;;  %v5049_v61 = vadd.f32 %v630_v59, %v5023_v47  ;;  %v743_v62 = vpop.f32.mrb[2].mxu1  ;;  %v632_v63 = vpop.f32.mrb[3].mxu0  ;;  %v3728_v12 = vmul.f32 -1.442695, %v5055_v3 }
 0x19f   : > { %4156 = vpow2.f32 %v3727_v58  ;;  %v5052_v1 = vadd.f32 %v743_v62, %v5026_v0  ;;  %v745_v2 = vpop.f32.mrb[3].mxu1  ;;  %v5071_v13 = vadd.f32 %v632_v63, %v5046_v60 }
 0x1a0   : > { %v3729_v4 = vmul.f32 -1.442695, %v5049_v61  ;;  %v5060_v6 = vadd.f32 %v745_v2, %v5042_v57 }
 0x1a1   : > { %v3731_v5 = vmul.f32 -1.442695, %v5052_v1  ;;  %v636_v7 = vpop.f32.mrb[4].mxu0  ;;  %v3730_v24 = vmul.f32 -1.442695, %v5071_v13 }
 0x1a2   : > { %4158 = vpow2.f32 %v3729_v4  ;;  %v749_v9 = vpop.f32.mrb[4].mxu1  ;;  %v5065_v10 = vpop.f32.mrb[5].mxu0  ;;  %v3732_v14 = vmul.f32 -1.442695, %v5060_v6  ;;  %v5102_v51 = vadd.f32 %v636_v7, %v5023_v47 }
 0x1a3   : > { %4160 = vpow2.f32 %v3731_v5  ;;  %v5067_v11 = vpop.f32.mrb[5].mxu1  ;;  %v5111_v2 = vadd.f32 %v749_v9, %v5026_v0 }
 0x1a4   : > { %4162 = vpow2.f32 %v3728_v12 }
 0x1a5   : > { %v642_v15 = vpop.f32.mrb[6].mxu0  ;;  %4164 = vpow2.f32 %v3732_v14  ;;  %v3733_v14 = vmul.f32 -1.442695, %v5102_v51 }
 0x1a6   : > { %v5076_v17 = vadd.f32 %v642_v15, %v5023_v47  ;;  %v755_v18 = vpop.f32.mrb[6].mxu1  ;;  %v644_v19 = vpop.f32.mrb[7].mxu0  ;;  %4166 = vpow2.f32 %v3726_v16 }
 0x1a7   : > { %v5079_v20 = vadd.f32 %v755_v18, %v5026_v0  ;;  %v5082_v21 = vadd.f32 %v644_v19, %v5046_v60  ;;  %v757_v22 = vpop.f32.mrb[7].mxu1 }
 0x1a8   : > { %v4155_v23 = vpop.eup %4154  ;;  %v5086_v25 = vadd.f32 %v757_v22, %v5042_v57 }
 0x1a9   : > { %v4157_v26 = vpop.eup %4156  ;;  %v880_v27 = vadd.f32 1.0, %v4155_v23  ;;  %v648_v28 = vpop.f32.mrb[8].mxu0 }
 0x1aa   : > { %v882_v29 = vadd.f32 1.0, %v4157_v26  ;;  %v761_v30 = vpop.f32.mrb[8].mxu1  ;;  %v5088_v31 = vpop.f32.mrb[9].mxu0  ;;  %v5124_v19 = vadd.f32 %v648_v28, %v5023_v47 }
 0x1ab   : > { %4168 = vrcp.f32 %v880_v27  ;;  %v5090_v32 = vpop.f32.mrb[9].mxu1 }
 0x1ac   : > { %v4159_v33 = vpop.eup %4158  ;;  %4170 = vpow2.f32 %v3730_v24 }
 0x1ad   : > { %v4161_v34 = vpop.eup %4160  ;;  %4172 = vrcp.f32 %v882_v29  ;;  %v654_v35 = vpop.f32.mrb[10].mxu0  ;;  %v884_v36 = vadd.f32 1.0, %v4159_v33 }
 0x1ae   : > { %v886_v37 = vadd.f32 1.0, %v4161_v34  ;;  %v5093_v38 = vadd.f32 %v654_v35, %v5023_v47  ;;  %v656_v39 = vpop.f32.mrb[11].mxu0  ;;  %v767_v40 = vpop.f32.mrb[10].mxu1  ;;  %v3735_v34 = vmul.f32 -1.442695, %v5111_v2 }
 0x1af   : > { %v5096_v41 = vadd.f32 %v656_v39, %v5046_v60  ;;  %v5099_v45 = vadd.f32 %v767_v40, %v5026_v0  ;;  %v769_v49 = vpop.f32.mrb[11].mxu1  ;;  %v4163_v56 = vpop.eup %4162  ;;  %v5146_v39 = vadd.f32 %v761_v30, %v5026_v0 }
 0x1b0   : > { %4174 = vrcp.f32 %v886_v37  ;;  %v5105_v53 = vadd.f32 %v769_v49, %v5042_v57  ;;  %v4165_v63 = vpop.eup %4164  ;;  %v883_v18 = vadd.f32 1.0, %v4163_v56 }
 0x1b1   : > { %v660_v55 = vpop.f32.mrb[12].mxu0  ;;  %4176 = vrcp.f32 %v884_v36  ;;  %v4167_v12 = vpop.eup %4166  ;;  %v887_v24 = vadd.f32 1.0, %v4165_v63 }
 0x1b2   : > { %v5108_v58 = vadd.f32 %v660_v55, %v5023_v47  ;;  %v662_v59 = vpop.f32.mrb[13].mxu0  ;;  %v773_v62 = vpop.f32.mrb[12].mxu1  ;;  %v881_v37 = vadd.f32 1.0, %v4167_v12  ;;  %4178 = vpow2.f32 %v3733_v14  ;;  %v5180_v14 = vadd.f32 %v5090_v32, %v5042_v57 }
 0x1b3   : > { %v5114_v4 = vadd.f32 %v662_v59, %v5046_v60  ;;  %v5117_v5 = vadd.f32 %v773_v62, %v5026_v0  ;;  %v775_v7 = vpop.f32.mrb[13].mxu1  ;;  %4180 = vrcp.f32 %v883_v18  ;;  %v3743_v62 = vmul.f32 -1.442695, %v5146_v39 }
 0x1b4   : > { %v5121_v15 = vadd.f32 %v775_v7, %v5042_v57  ;;  %4182 = vrcp.f32 %v887_v24  ;;  %v3744_v32 = vmul.f32 -1.442695, %v5180_v14 }
 0x1b5   : > { %v4169_v16 = vpop.eup %4168  ;;  %v666_v9 = vpop.f32.mrb[14].mxu0  ;;  %4184 = vpow2.f32 %v3735_v34  ;;  %v3737_v34 = vmul.f32 -1.442695, %v5076_v17 }
 0x1b6   : > { %v4171_v22 = vpop.eup %4170  ;;  %v5127_v23 = vmul.f32 %v4169_v16, %v5032_v50  ;;  %v5130_v26 = vadd.f32 %v666_v9, %v5023_v47  ;;  %v668_v27 = vpop.f32.mrb[15].mxu0  ;;  %v3741_v50 = vmul.f32 -1.442695, %v5124_v19  ;;  %4186 = vrcp.f32 %v881_v37 }
 0x1b7   : > { %v779_v29 = vpop.f32.mrb[14].mxu1  ;;  %v4173_v33 = vpop.eup %4172  ;;  %v5134_v35 = vadd.f32 %v668_v27, %v5046_v60  ;;  %v885_v55 = vadd.f32 1.0, %v4171_v22 }
 0x1b8   : > { %v5137_v28 = vadd.f32 %v779_v29, %v5026_v0  ;;  %v781_v36 = vpop.f32.mrb[15].mxu1  ;;  %1013 = vrot.lane.b32.xlu0 %v5127_v23, %s4674_s15  ;;  %v5149_v49 = vmul.f32 %v4173_v33, %v5038_v54  ;;  %4188 = vpow2.f32 %v3741_v50  ;;  %v5164_v54 = vadd.f32 %v5067_v11, %v5042_v57 }
 0x1b9   : > { %v5142_v47 = vadd.f32 %v781_v36, %v5042_v57  ;;  %4190 = vrcp.f32 %v885_v55  ;;  %v5194_v57 = vadd.f32 %v5088_v31, %v5046_v60 }
 0x1ba   : > { %v4175_v40 = vpop.eup %4174  ;;  %4192 = vpow2.f32 %v3743_v62  ;;  %v3736_v7 = vmul.f32 -1.442695, %v5164_v54 }
 0x1bb   : > { %v5152_v56 = vmul.f32 %v4175_v40, %v5052_v1  ;;  %v4177_v59 = vpop.eup %4176  ;;  %v5170_v1 = vadd.f32 %v5065_v10, %v5046_v60  ;;  %v3742_v60 = vmul.f32 -1.442695, %v5194_v57 }
 0x1bc   : > { %1045 = vrot.lane.b32.xlu0 %v5149_v49, %s4674_s15  ;;  %v5160_v0 = vmul.f32 %v4177_v59, %v5049_v61  ;;  %v4179_v30 = vpop.eup %4178  ;;  %4194 = vpow2.f32 %v3736_v7 }
 0x1bd   : > { %1047 = vrot.lane.b32.xlu1 %v5152_v56, %s4674_s15  ;;  %v4181_v63 = vpop.eup %4180  ;;  %v3734_v12 = vmul.f32 -1.442695, %v5170_v1  ;;  %v888_v18 = vadd.f32 1.0, %v4179_v30  ;;  %v3739_v30 = vmul.f32 -1.442695, %v5079_v20 }
 0x1be   : > { %v4183_v61 = vpop.eup %4182  ;;  %v5185_v16 = vmul.f32 %v4181_v63, %v5055_v3  ;;  %v3749_v63 = vmul.f32 -1.442695, %v5108_v58 }
 0x1bf   : > { %v4185_v11 = vpop.eup %4184  ;;  %v5188_v22 = vmul.f32 %v4183_v61, %v5060_v6  ;;  %4196 = vpow2.f32 %v3734_v12 }
 0x1c0   : > { %1154 = vrot.lane.b32.xlu0 %v5127_v23, %s4675_s24  ;;  %v4187_v10 = vpop.eup %4186  ;;  %v890_v27 = vadd.f32 1.0, %v4185_v11  ;;  %4198 = vrcp.f32 %v888_v18 }
 0x1c1   : > { %1156 = vrot.lane.b32.xlu1 %v5160_v0, %s4675_s24  ;;  %v5200_v3 = vmul.f32 %v4187_v10, %v5063_v8  ;;  %v3751_v10 = vmul.f32 -1.442695, %v5117_v5 }
 0x1c2   : > { %v4189_v9 = vpop.eup %4188  ;;  %4200 = vrcp.f32 %v890_v27 }
 0x1c3   : > { %v4191_v24 = vpop.eup %4190  ;;  %v896_v6 = vadd.f32 1.0, %v4189_v9  ;;  %4202 = vpow2.f32 %v3744_v32 }
 0x1c4   : > { %1186 = vrot.lane.b32.xlu0 %v5149_v49, %s4675_s24  ;;  %v4193_v29 = vpop.eup %4192  ;;  %v5203_v33 = vmul.f32 %v4191_v24, %v5071_v13  ;;  %v3740_v24 = vmul.f32 -1.442695, %v5086_v25 }
 0x1c5   : > { %1188 = vrot.lane.b32.xlu1 %v5152_v56, %s4675_s24  ;;  %4204 = vrcp.f32 %v896_v6  ;;  %v898_v31 = vadd.f32 1.0, %v4193_v29 }
 0x1c6   : > { %4206 = vpow2.f32 %v3742_v60  ;;  %v4195_v8 = vpop.eup %4194 }
 0x1c7   : > { %4208 = vrcp.f32 %v898_v31  ;;  %v891_v37 = vadd.f32 1.0, %v4195_v8  ;;  %v3738_v31 = vmul.f32 -1.442695, %v5082_v21 }
 0x1c8   : > { %1061 = vrot.lane.b32.xlu0 %v5185_v16, %s4674_s15  ;;  %4210 = vpow2.f32 %v3737_v34 }
 0x1c9   : > { %1063 = vrot.lane.b32.xlu1 %v5188_v22, %s4674_s15  ;;  %v4197_v13 = vpop.eup %4196  ;;  %4212 = vrcp.f32 %v891_v37 }
 0x1ca   : > { %v4199_v36 = vpop.eup %4198  ;;  %v889_v59 = vadd.f32 1.0, %v4197_v13  ;;  %v3750_v13 = vmul.f32 -1.442695, %v5114_v4 }
 0x1cb   : > { %v5220_v55 = vmul.f32 %v4199_v36, %v5102_v51 }
 0x1cc   : > { %1029 = vrot.lane.b32.xlu0 %v5200_v3, %s4674_s15  ;;  %v4201_v50 = vpop.eup %4200  ;;  %4214 = vrcp.f32 %v889_v59 }
 0x1cd   : > { %1031 = vrot.lane.b32.xlu1 %v5203_v33, %s4674_s15  ;;  %v4203_v40 = vpop.eup %4202  ;;  %v5229_v61 = vmul.f32 %v4201_v50, %v5111_v2  ;;  %4216 = vpow2.f32 %v3739_v30 }
 0x1ce   : > { %v899_v7 = vadd.f32 1.0, %v4203_v40  ;;  %4218 = vpow2.f32 %v3749_v63  ;;  %v3745_v63 = vmul.f32 -1.442695, %v5093_v38 }
 0x1cf   : > { %v4205_v62 = vpop.eup %4204 }
 0x1d0   : > { %1202 = vrot.lane.b32.xlu0 %v5185_v16, %s4675_s24  ;;  %v4207_v51 = vpop.eup %4206  ;;  %v5232_v11 = vmul.f32 %v4205_v62, %v5124_v19  ;;  %4220 = vrcp.f32 %v899_v7 }
 0x1d1   : > { %1204 = vrot.lane.b32.xlu1 %v5188_v22, %s4675_s24  ;;  %v4209_v12 = vpop.eup %4208  ;;  %v897_v18 = vadd.f32 1.0, %v4207_v51  ;;  %4222 = vpow2.f32 %v3751_v10 }
 0x1d2   : > { %v5240_v2 = vmul.f32 %v4209_v12, %v5146_v39  ;;  %v4211_v19 = vpop.eup %4210  ;;  %v3752_v39 = vmul.f32 -1.442695, %v5121_v15 }
 0x1d3   : > { %4224 = vrcp.f32 %v897_v18  ;;  %v4213_v9 = vpop.eup %4212  ;;  %v892_v27 = vadd.f32 1.0, %v4211_v19 }
 0x1d4   : > { %1170 = vrot.lane.b32.xlu0 %v5200_v3, %s4675_s24  ;;  %v5253_v29 = vmul.f32 %v4213_v9, %v5164_v54  ;;  %4226 = vpow2.f32 %v3740_v24  ;;  %v3747_v9 = vmul.f32 -1.442695, %v5099_v45 }
 0x1d5   : > { %1172 = vrot.lane.b32.xlu1 %v5203_v33, %s4675_s24  ;;  %4228 = vrcp.f32 %v892_v27 }
 0x1d6   : > { %v4215_v32 = vpop.eup %4214  ;;  %4230 = vpow2.f32 %v3752_v39 }
 0x1d7   : > { %v4217_v6 = vpop.eup %4216  ;;  %v5262_v36 = vmul.f32 %v4215_v32, %v5170_v1  ;;  %4232 = vpow2.f32 %v3738_v31  ;;  %v3755_v32 = vmul.f32 -1.442695, %v5137_v28 }
 0x1d8   : > { %1015 = vrot.lane.b32.xlu0 %v5160_v0, %s4674_s15  ;;  %v4219_v60 = vpop.eup %4218  ;;  %v894_v34 = vadd.f32 1.0, %v4217_v6  ;;  %4234 = vpow2.f32 %v3750_v13 }
 0x1d9   : > { %1017 = vrot.lane.b32.xlu1 %v5220_v55, %s4674_s15  ;;  %v904_v54 = vadd.f32 1.0, %v4219_v60 }
 0x1da   : > { %v4221_v8 = vpop.eup %4220  ;;  %4236 = vrcp.f32 %v894_v34  ;;  %v3746_v34 = vmul.f32 -1.442695, %v5096_v41 }
 0x1db   : > { %v4223_v37 = vpop.eup %4222  ;;  %v5265_v50 = vmul.f32 %v4221_v8, %v5180_v14  ;;  %4238 = vrcp.f32 %v904_v54 }
 0x1dc   : > { %1049 = vrot.lane.b32.xlu0 %v5229_v61, %s4674_s15  ;;  %v906_v59 = vadd.f32 1.0, %v4223_v37 }
 0x1dd   : > { %1021 = vrot.lane.b32.xlu1 %v5232_v11, %s4674_s15  ;;  %v4225_v40 = vpop.eup %4224 }
 0x1de   : > { %v5272_v1 = vmul.f32 %v4225_v40, %v5194_v57  ;;  %v4227_v62 = vpop.eup %4226  ;;  %4240 = vrcp.f32 %v906_v59  ;;  %v3753_v57 = vmul.f32 -1.442695, %v5130_v26  ;;  %v3756_v40 = vmul.f32 -1.442695, %v5142_v47 }
 0x1df   : > { %v4229_v14 = vpop.eup %4228  ;;  %v895_v7 = vadd.f32 1.0, %v4227_v62  ;;  %4242 = vpow2.f32 %v3745_v63 }
 0x1e0   : > { %1158 = vrot.lane.b32.xlu0 %v5220_v55, %s4675_s24  ;;  %v4231_v30 = vpop.eup %4230  ;;  %v5285_v10 = vmul.f32 %v4229_v14, %v5076_v17 }
 0x1e1   : > { %1053 = vrot.lane.b32.xlu1 %v5240_v2, %s4674_s15  ;;  %v4233_v51 = vpop.eup %4232  ;;  %v907_v18 = vadd.f32 1.0, %v4231_v30  ;;  %4244 = vrcp.f32 %v895_v7 }
 0x1e2   : > { %v4235_v12 = vpop.eup %4234  ;;  %8267 = vst [vmem:[#allocation22_spill] sm:$0xff] %v5285_v10  ;;  %v893_v27 = vadd.f32 1.0, %v4233_v51  ;;  %4246 = vpow2.f32 %v3753_v57  ;;  %v3754_v57 = vmul.f32 -1.442695, %v5134_v35 }
 0x1e3   : > { %v905_v39 = vadd.f32 1.0, %v4235_v12  ;;  %4248 = vrcp.f32 %v907_v18 }
 0x1e4   : > { %1190 = vrot.lane.b32.xlu0 %v5229_v61, %s4675_s24  ;;  %v4237_v19 = vpop.eup %4236  ;;  %4250 = vpow2.f32 %v3747_v9 }
 0x1e5   : > { %1162 = vrot.lane.b32.xlu1 %v5232_v11, %s4675_s24  ;;  %v4239_v24 = vpop.eup %4238  ;;  %v5294_v17 = vmul.f32 %v4237_v19, %v5079_v20  ;;  %4252 = vrcp.f32 %v893_v27  ;;  %v3748_v20 = vmul.f32 -1.442695, %v5105_v53 }
 0x1e6   : > { %v5297_v6 = vmul.f32 %v4239_v24, %v5108_v58  ;;  %4254 = vpow2.f32 %v3755_v32 }
 0x1e7   : > { %8268 = vst [vmem:[#allocation23_spill] sm:$0xff] %v5294_v17  ;;  %4256 = vrcp.f32 %v905_v39 }
 0x1e8   : > { %1065 = vrot.lane.b32.xlu0 %v5253_v29, %s4674_s15  ;;  %8269 = vst [vmem:[#allocation24_spill] sm:$0xff] %v5297_v6  ;;  %v4241_v60 = vpop.eup %4240  ;;  %4258 = vpow2.f32 %v3748_v20 }
 0x1e9   : > { %1194 = vrot.lane.b32.xlu1 %v5240_v2, %s4675_s24  ;;  %v5304_v31 = vmul.f32 %v4241_v60, %v5117_v5  ;;  %v4243_v58 = vpop.eup %4242  ;;  %4260 = vpow2.f32 %v3746_v34 }
 0x1ea   : > { %v900_v37 = vadd.f32 1.0, %v4243_v58 }
 0x1eb   : > { %8270 = vst [vmem:[#allocation25_spill] sm:$0xff] %v5304_v31  ;;  %v4245_v8 = vpop.eup %4244 }
 0x1ec   : > { %1033 = vrot.lane.b32.xlu0 %v5262_v36, %s4674_s15  ;;  %v4247_v13 = vpop.eup %4246  ;;  %v5318_v62 = vmul.f32 %v4245_v8, %v5086_v25  ;;  %4262 = vrcp.f32 %v900_v37  ;;  %v5378_v37 = vld [vmem:[#allocation7 + $0x18] sm:$0xff] }
 0x1ed   : > { %1069 = vrot.lane.b32.xlu1 %v5265_v50, %s4674_s15  ;;  %v4249_v54 = vpop.eup %4248  ;;  %v908_v14 = vadd.f32 1.0, %v4247_v13  ;;  %4264 = vpow2.f32 %v3756_v40 }
 0x1ee   : > { %v4251_v5 = vpop.eup %4250  ;;  %8271 = vst [vmem:[#allocation26_spill] sm:$0xff] %v5318_v62  ;;  %v5321_v63 = vmul.f32 %v4249_v54, %v5121_v15  ;;  %v5373_v54 = vld [vmem:[#allocation7] sm:$0xff] }
 0x1ef   : > { %v4253_v59 = vpop.eup %4252  ;;  %v902_v51 = vadd.f32 1.0, %v4251_v5  ;;  %4266 = vrcp.f32 %v908_v14  ;;  %v5381_v5 = vsub.s32 7, %v5011_v43 }
 0x1f0   : > { %1206 = vrot.lane.b32.xlu0 %v5253_v29, %s4675_s24  ;;  %v4255_v30 = vpop.eup %4254  ;;  %8272 = vst [vmem:[#allocation27_spill] sm:$0xff] %v5321_v63  ;;  %v5329_v25 = vmul.f32 %v4253_v59, %v5082_v21  ;;  %v5383_v59 = vld [vmem:[#allocation7 + $0x10] sm:$0xff] }
 0x1f1   : > { %1037 = vrot.lane.b32.xlu1 %v5272_v1, %s4674_s15  ;;  %v4257_v7 = vpop.eup %4256  ;;  %v910_v12 = vadd.f32 1.0, %v4255_v30  ;;  %4268 = vrcp.f32 %v902_v51  ;;  %8281 = vst [vmem:[#allocation36_spill] sm:$0xff] %v5381_v5  ;;  %v5389_v30 = vrot.slane %v5373_v54, %v5035_v52 }
 0x1f2   : > { %8273 = vst [vmem:[#allocation28_spill] sm:$0xff] %v5329_v25  ;;  %v5332_v15 = vmul.f32 %v4257_v7, %v5114_v4  ;;  %4270 = vpow2.f32 %v3754_v57  ;;  %v4259_v18 = vpop.eup %4258  ;;  %v5391_v7 = vld [vmem:[#allocation7 + $0x8] sm:$0xff]  ;;  %v5404_v57 = vsub.s32 6, %v5011_v43 }
 0x1f3   : > { %4272 = vrcp.f32 %v910_v12  ;;  %v4261_v21 = vpop.eup %4260  ;;  %v903_v19 = vadd.f32 1.0, %v4259_v18  ;;  %8282 = vst [vmem:[#allocation37_spill] sm:$0xff] %v5389_v30 }
 0x1f4   : > { %1174 = vrot.lane.b32.xlu0 %v5262_v36, %s4675_s24  ;;  %8274 = vst [vmem:[#allocation29_spill] sm:$0xff] %v5332_v15  ;;  %v901_v27 = vadd.f32 1.0, %v4261_v21  ;;  %8285 = vst [vmem:[#allocation40_spill] sm:$0xff] %v5404_v57  ;;  %v5415_v21 = vrot.slane %v5378_v37, %v5381_v5 }
 0x1f5   : > { %1210 = vrot.lane.b32.xlu1 %v5265_v50, %s4675_s24  ;;  %4274 = vrcp.f32 %v903_v19  ;;  %v5419_v19 = vrot.slane %v5373_v54, %v5381_v5 }
 0x1f6   : > { %v4263_v4 = vpop.eup %4262  ;;  %4276 = vrcp.f32 %v901_v27  ;;  %8288 = vst [vmem:[#allocation43_spill] sm:$0xff] %v5415_v21  ;;  %v5438_v27 = vrot.slane %v5391_v7, %v5035_v52 }
 0x1f7   : > { %v4265_v9 = vpop.eup %4264  ;;  %v5347_v39 = vmul.f32 %v4263_v4, %v5093_v38  ;;  %8289 = vst [vmem:[#allocation44_spill] sm:$0xff] %v5419_v19  ;;  %v5423_v4 = vrot.slane %v5383_v59, %v5035_v52 }
 0x1f8   : > { %1019 = vrot.lane.b32.xlu0 %v5285_v10, %s4674_s15  ;;  %v911_v60 = vadd.f32 1.0, %v4265_v9  ;;  %8294 = vst [vmem:[#allocation49_spill] sm:$0xff] %v5438_v27 }
 0x1f9   : > { %1178 = vrot.lane.b32.xlu1 %v5272_v1, %s4675_s24  ;;  %v4267_v24 = vpop.eup %4266  ;;  %8275 = vst [vmem:[#allocation30_spill] sm:$0xff] %v5347_v39  ;;  %8290 = vst [vmem:[#allocation45_spill] sm:$0xff] %v5423_v4 }
 0x1fa   : > { %v5350_v58 = vmul.f32 %v4267_v24, %v5130_v26  ;;  %4278 = vrcp.f32 %v911_v60  ;;  %v5443_v60 = vand.u32 127, %v538_v42  ;;  %v5465_v42 = vrot.slane %v5378_v37, %v5404_v57 }
 0x1fb   : > { %v4269_v32 = vpop.eup %4268 }
 0x1fc   : > { %1051 = vrot.lane.b32.xlu0 %v5294_v17, %s4674_s15  ;;  %v4271_v20 = vpop.eup %4270  ;;  %8276 = vst [vmem:[#allocation31_spill] sm:$0xff] %v5350_v58  ;;  %v5357_v13 = vmul.f32 %v4269_v32, %v5099_v45  ;;  %v5371_v45 = vsub.s32 4, %v5011_v43  ;;  %8295 = vst [vmem:[#allocation50_spill] sm:$0xff] %v5443_v60  ;;  %vm1077_vm0 = vcmp.lt.s32.totalorder %v5443_v60, 32  ;;  %vm1110_vm1 = vcmp.ge.s32.totalorder %v5443_v60, 32 }
 0x1fd   : > { %1025 = vrot.lane.b32.xlu1 %v5297_v6, %s4674_s15  ;;  %v4273_v8 = vpop.eup %4272  ;;  %v909_v34 = vadd.f32 1.0, %v4271_v20  ;;  %8300 = vst [vmem:[#allocation55_spill] sm:$0xff] %v5465_v42  ;;  %vm1218_vm2 = vcmp.lt.s32.totalorder %v5443_v60, 96 }
 0x1fe   : > { %8277 = vst [vmem:[#allocation32_spill] sm:$0xff] %v5357_v13  ;;  %v5360_v38 = vmul.f32 %v4273_v8, %v5137_v28  ;;  %8279 = vst [vmem:[#allocation34_spill] sm:$0xff] %v5371_v45  ;;  %v5401_v51 = vrot.slane %v5378_v37, %v5371_v45  ;;  %v5408_v12 = vrot.slane %v5373_v54, %v5371_v45 }
 0x1ff   : > { %4280 = vrcp.f32 %v909_v34  ;;  %v4275_v26 = vpop.eup %4274  ;;  %v5430_v24 = vrot.slane %v5383_v59, %v5371_v45  ;;  %v5451_v20 = vrot.slane %v5391_v7, %v5371_v45  ;;  %v5455_v8 = vrot.slane %v5391_v7, %v5381_v5 }
 0x200   : > { %1160 = vrot.lane.b32.xlu0 %v5285_v10, %s4675_s24  ;;  %8278 = vst [vmem:[#allocation33_spill] sm:$0xff] %v5360_v38  ;;  %v5376_v28 = vmul.f32 %v4275_v26, %v5105_v53  ;;  %v4277_v40 = vpop.eup %4276  ;;  %v5397_v53 = vrot.slane %v5378_v37, %v5035_v52  ;;  %8284 = vst [vmem:[#allocation39_spill] sm:$0xff] %v5401_v51  ;;  %v5461_v34 = vrot.slane %v5378_v37, %v5029_v48 }
 0x201   : > { %1057 = vrot.lane.b32.xlu1 %v5304_v31, %s4674_s15  ;;  %8286 = vst [vmem:[#allocation41_spill] sm:$0xff] %v5408_v12  ;;  %v5411_v18 = vmul.f32 %v4277_v40, %v5096_v41  ;;  %8292 = vst [vmem:[#allocation47_spill] sm:$0xff] %v5430_v24  ;;  %v5434_v41 = vrot.slane %v5383_v59, %v5381_v5  ;;  %v5473_v40 = vmul.f32 %v5401_v51, %v5185_v16 }
 0x202   : > { %8280 = vst [vmem:[#allocation35_spill] sm:$0xff] %v5376_v28  ;;  %8283 = vst [vmem:[#allocation38_spill] sm:$0xff] %v5397_v53  ;;  %v5469_v26 = vmul.f32 %v5397_v53, %v5185_v16  ;;  %v5479_v5 = vmul.f32 %v5397_v53, %v5188_v22  ;;  %v5483_v45 = vmul.f32 %v5401_v51, %v5188_v22 }
 0x203   : > { %8287 = vst [vmem:[#allocation42_spill] sm:$0xff] %v5411_v18  ;;  %8293 = vst [vmem:[#allocation48_spill] sm:$0xff] %v5434_v41  ;;  %v5498_v52 = vrot.slane %v5373_v54, %v5014_v44  ;;  %v5547_v10 = vrot.slane %v5383_v59, %v5404_v57 }
 0x204   : > { %1192 = vrot.lane.b32.xlu0 %v5294_v17, %s4675_s24  ;;  %v4279_v14 = vpop.eup %4278  ;;  %8297 = vst [vmem:[#allocation52_spill] sm:$0xff] %v5451_v20  ;;  %8298 = vst [vmem:[#allocation53_spill] sm:$0xff] %v5455_v8  ;;  %v5506_v17 = vrot.slane %v5373_v54, %v5404_v57 }
 0x205   : > { %1166 = vrot.lane.b32.xlu1 %v5297_v6, %s4675_s24  ;;  %v5426_v9 = vmul.f32 %v4279_v14, %v5142_v47  ;;  %v5447_v47 = vrot.slane %v5378_v37, %v5014_v44  ;;  %8299 = vst [vmem:[#allocation54_spill] sm:$0xff] %v5461_v34  ;;  %8303 = vst [vmem:[#allocation58_spill] sm:$0xff] %v5498_v52  ;;  %v5551_v6 = vmul.f32 %v5434_v41, %v5152_v56 }
 0x206   : > { %8305 = vst [vmem:[#allocation60_spill] sm:$0xff] %v5506_v17  ;;  %8311 = vst [vmem:[#allocation66_spill] sm:$0xff] %v5547_v10  ;;  %v5569_v10 = vrot.slane %v5391_v7, %v5029_v48 }
 0x207   : > { %8291 = vst [vmem:[#allocation46_spill] sm:$0xff] %v5426_v9  ;;  %8296 = vst [vmem:[#allocation51_spill] sm:$0xff] %v5447_v47 }
 0x208   : > { %1067 = vrot.lane.b32.xlu0 %v5318_v62, %s4674_s15  ;;  %8314 = vst [vmem:[#allocation69_spill] sm:$0xff] %v5569_v10  ;;  %v5595_v10 = vadd.s32 384, %v5443_v60 }
 0x209   : > { %1073 = vrot.lane.b32.xlu1 %v5321_v63, %s4674_s15  ;;  %v4281_v32 = vpop.eup %4280 }
 0x20a   : > { %8318 = vst [vmem:[#allocation73_spill] sm:$0xff] %v5595_v10  ;;  %vm1254_vm3 = vcmp.lt.s32.totalorder %v5595_v10, 480 }
 0x20c   : > { %1035 = vrot.lane.b32.xlu0 %v5329_v25, %s4674_s15 }
 0x20d   : > { %1041 = vrot.lane.b32.xlu1 %v5332_v15, %s4674_s15 }
 0x210   : > { %1208 = vrot.lane.b32.xlu0 %v5318_v62, %s4675_s24 }
 0x211   : > { %1214 = vrot.lane.b32.xlu1 %v5321_v63, %s4675_s24  ;;  %v5494_v63 = vmul.f32 %v4281_v32, %v5134_v35  ;;  %v5516_v35 = vmul.f32 %v5408_v12, %v5127_v23  ;;  %v5524_v32 = vrot.slane %v5383_v59, %v5014_v44 }
 0x213   : > { %8302 = vst [vmem:[#allocation57_spill] sm:$0xff] %v5494_v63  ;;  %8306 = vst [vmem:[#allocation61_spill] sm:$0xff] %v5524_v32 }
 0x214   : > { %1176 = vrot.lane.b32.xlu0 %v5329_v25, %s4675_s24  ;;  %v5534_v25 = vrot.slane %v5383_v59, %v5029_v48 }
 0x215   : > { %1182 = vrot.lane.b32.xlu1 %v5332_v15, %s4675_s24  ;;  %v5538_v15 = vmul.f32 %v5430_v24, %v5152_v56 }
 0x216   : > { %8308 = vst [vmem:[#allocation63_spill] sm:$0xff] %v5534_v25  ;;  %v5565_v25 = vmul.f32 %v5423_v4, %v5149_v49 }
 0x217   : > { %8309 = vst [vmem:[#allocation64_spill] sm:$0xff] %v5538_v15  ;;  %v5559_v15 = vmul.f32 %v5438_v27, %v5200_v3 }
 0x218   : > { %1023 = vrot.lane.b32.xlu0 %v5347_v39, %s4674_s15 }
 0x219   : > { %1027 = vrot.lane.b32.xlu1 %v5350_v58, %s4674_s15  ;;  %8313 = vst [vmem:[#allocation68_spill] sm:$0xff] %v5559_v15  ;;  %v5584_v15 = vrot.slane %v5391_v7, %v5404_v57  ;;  %v5602_v57 = vrot.slane %v5383_v59, %v5020_v46 }
 0x21b   : > { %8316 = vst [vmem:[#allocation71_spill] sm:$0xff] %v5584_v15  ;;  %8319 = vst [vmem:[#allocation74_spill] sm:$0xff] %v5602_v57  ;;  %v5624_v57 = vmul.f32 %v5438_v27, %v5203_v33 }
 0x21c   : > { %1055 = vrot.lane.b32.xlu0 %v5357_v13, %s4674_s15 }
 0x21d   : > { %1059 = vrot.lane.b32.xlu1 %v5360_v38, %s4674_s15  ;;  %8324 = vst [vmem:[#allocation79_spill] sm:$0xff] %v5624_v57 }
 0x220   : > { %1164 = vrot.lane.b32.xlu0 %v5347_v39, %s4675_s24  ;;  %v5502_v39 = vrot.slane %v5373_v54, %v5029_v48  ;;  %v5588_v48 = vmul.f32 %v5455_v8, %v5200_v3 }
 0x221   : > { %1168 = vrot.lane.b32.xlu1 %v5350_v58, %s4675_s24  ;;  %v5491_v58 = vmul.f32 %v5415_v21, %v5185_v16  ;;  %v5512_v16 = vmul.f32 %v5389_v30, %v5127_v23 }
 0x222   : > { %8304 = vst [vmem:[#allocation59_spill] sm:$0xff] %v5502_v39 }
 0x223   : > { %8301 = vst [vmem:[#allocation56_spill] sm:$0xff] %v5491_v58 }
 0x224   : > { %1071 = vrot.lane.b32.xlu0 %v5376_v28, %s4674_s15 }
 0x225   : > { %1200 = vrot.lane.b32.xlu1 %v5360_v38, %s4675_s24  ;;  %v5487_v38 = vmul.f32 %v5415_v21, %v5188_v22  ;;  %v5520_v22 = vmul.f32 %v5419_v19, %v5127_v23  ;;  %v5541_v23 = vsub.s32 5, %v5011_v43 }
 0x227   : > { %8310 = vst [vmem:[#allocation65_spill] sm:$0xff] %v5541_v23  ;;  %v5646_v57 = vrot.slane %v5373_v54, %v5541_v23 }
 0x228   : > { %1039 = vrot.lane.b32.xlu0 %v5411_v18, %s4674_s15 }
 0x229   : > { %1075 = vrot.lane.b32.xlu1 %v5426_v9, %s4674_s15  ;;  %8329 = vst [vmem:[#allocation84_spill] sm:$0xff] %v5646_v57 }
 0x22a   : > { %v5475_v14 = vpop.permute.xlu0 %1013 }
 0x22c   : > { %1212 = vrot.lane.b32.xlu0 %v5376_v28, %s4675_s24  ;;  %v5530_v28 = vmul.f32 %v5423_v4, %v5152_v56  ;;  %v5573_v56 = vmul.f32 %v5451_v20, %v5200_v3  ;;  %v5606_v3 = vrot.slane %v5378_v37, %v5020_v46 }
 0x22d   : > { %1043 = vrot.lane.b32.xlu1 %v5494_v63, %s4674_s15 }
 0x22e   : > { %8307 = vst [vmem:[#allocation62_spill] sm:$0xff] %v5530_v28  ;;  %v5543_v62 = vpop.permute.xlu0 %1045  ;;  %v5555_v28 = vrot.slane %v5391_v7, %v5014_v44  ;;  %8315 = vst [vmem:[#allocation70_spill] sm:$0xff] %v5573_v56  ;;  %v5577_v44 = vmul.f32 %v5430_v24, %v5149_v49  ;;  %v5592_v56 = vmul.f32 %v5434_v41, %v5149_v49 }
 0x22f   : > { %v5561_v58 = vpop.permute.xlu1 %1047  ;;  %8320 = vst [vmem:[#allocation75_spill] sm:$0xff] %v5606_v3  ;;  %v5610_v49 = vrot.slane %v5383_v59, %v5541_v23  ;;  %v5628_v3 = vmul.f32 %v5408_v12, %v5160_v0  ;;  %v5632_v59 = vmul.f32 %v5451_v20, %v5203_v33 }
 0x230   : > { %8312 = vst [vmem:[#allocation67_spill] sm:$0xff] %v5555_v28  ;;  %1180 = vrot.lane.b32.xlu0 %v5411_v18, %s4675_s24  ;;  %8317 = vst [vmem:[#allocation72_spill] sm:$0xff] %v5592_v56  ;;  %v5614_v18 = vrot.slane %v5378_v37, %v5541_v23 }
 0x231   : > { %1216 = vrot.lane.b32.xlu1 %v5426_v9, %s4675_s24  ;;  %8321 = vst [vmem:[#allocation76_spill] sm:$0xff] %v5610_v49  ;;  %v5620_v9 = vmul.f32 %v5389_v30, %v5160_v0  ;;  %8325 = vst [vmem:[#allocation80_spill] sm:$0xff] %v5628_v3  ;;  %v5650_v3 = vmul.f32 %v5419_v19, %v5160_v0  ;;  %v5674_v0 = vmul.f32 %v5408_v12, %v5220_v55 }
 0x232   : > { %v5616_v56 = vpop.permute.xlu0 %1154  ;;  %8326 = vst [vmem:[#allocation81_spill] sm:$0xff] %v5632_v59  ;;  %v5656_v59 = vrot.slane %v5391_v7, %v5541_v23  ;;  %v5686_v23 = vmul.f32 %v5415_v21, %v5253_v29 }
 0x233   : > { %8322 = vst [vmem:[#allocation77_spill] sm:$0xff] %v5616_v56  ;;  %8323 = vst [vmem:[#allocation78_spill] sm:$0xff] %v5620_v9  ;;  %v5634_v37 = vpop.permute.xlu1 %1156  ;;  %v5638_v56 = vrot.slane %v5373_v54, %v5020_v46  ;;  %v5642_v9 = vrot.slane %v5391_v7, %v5020_v46  ;;  %v5664_v46 = vmul.f32 %v5389_v30, %v5220_v55 }
 0x234   : > { %1196 = vrot.lane.b32.xlu0 %v5357_v13, %s4675_s24  ;;  %8330 = vst [vmem:[#allocation85_spill] sm:$0xff] %v5656_v59  ;;  %v5668_v54 = vmul.f32 %v5397_v53, %v5253_v29  ;;  %8333 = vst [vmem:[#allocation88_spill] sm:$0xff] %v5674_v0  ;;  %v5678_v7 = vmul.f32 %v5401_v51, %v5253_v29  ;;  %v5696_v0 = vmul.f32 %v5397_v53, %v5265_v50 }
 0x235   : > { %8327 = vst [vmem:[#allocation82_spill] sm:$0xff] %v5638_v56  ;;  %8328 = vst [vmem:[#allocation83_spill] sm:$0xff] %v5642_v9  ;;  %v5660_v56 = vmul.f32 %v5455_v8, %v5203_v33  ;;  %1184 = vrot.lane.b32.xlu1 %v5494_v63, %s4675_s24  ;;  %v5682_v33 = vmul.f32 %v5419_v19, %v5220_v55  ;;  %v5692_v63 = vmul.f32 %v5389_v30, %v5232_v11 }
 0x236   : > { %8331 = vst [vmem:[#allocation86_spill] sm:$0xff] %v5664_v46  ;;  %8332 = vst [vmem:[#allocation87_spill] sm:$0xff] %v5668_v54  ;;  %v5688_v13 = vpop.permute.xlu0 %1186  ;;  %v5704_v55 = vmul.f32 %v5401_v51, %v5265_v50  ;;  %v5714_v30 = vmul.f32 %v5415_v21, %v5265_v50  ;;  %v5717_v53 = vadd.s32 8, %v5011_v43  ;;  %v5724_v51 = vmul.f32 %v5438_v27, %v5262_v36 }
 0x237   : > { %8334 = vst [vmem:[#allocation89_spill] sm:$0xff] %v5678_v7  ;;  %8335 = vst [vmem:[#allocation90_spill] sm:$0xff] %v5682_v33  ;;  %v5700_v7 = vmul.f32 %v5408_v12, %v5232_v11  ;;  %v5706_v29 = vpop.permute.xlu1 %1188  ;;  %v5720_v12 = vadd.s32 16, %v5011_v43  ;;  %v5736_v50 = vmul.f32 %v5430_v24, %v5229_v61  ;;  %v5742_v21 = vmul.f32 %v5455_v8, %v5262_v36 }
 0x238   : > { %8336 = vst [vmem:[#allocation91_spill] sm:$0xff] %v5686_v23  ;;  %8337 = vst [vmem:[#allocation92_spill] sm:$0xff] %v5692_v63  ;;  %v5710_v23 = vmul.f32 %v5419_v19, %v5232_v11  ;;  %v5732_v11 = vmul.f32 %v5451_v20, %v5262_v36  ;;  %v5746_v19 = vmul.f32 %v5434_v41, %v5229_v61 }
 0x239   : > { %8338 = vst [vmem:[#allocation93_spill] sm:$0xff] %v5696_v0  ;;  %8339 = vst [vmem:[#allocation94_spill] sm:$0xff] %v5700_v7  ;;  %v5728_v7 = vmul.f32 %v5423_v4, %v5229_v61  ;;  %1198 = vrot.lane.b32.xlu1 %v5304_v31, %s4675_s24  ;;  %v5759_v31 = vmul.f32 %v5451_v20, %v5272_v1  ;;  %v5763_v36 = vmul.f32 %v5430_v24, %v5240_v2 }
 0x23a   : > { %8340 = vst [vmem:[#allocation95_spill] sm:$0xff] %v5704_v55  ;;  %8341 = vst [vmem:[#allocation96_spill] sm:$0xff] %v5710_v23  ;;  %v5767_v61 = vmul.f32 %v5455_v8, %v5272_v1 }
 0x23b   : > { %8342 = vst [vmem:[#allocation97_spill] sm:$0xff] %v5714_v30  ;;  %8343 = vst [vmem:[#allocation98_spill] sm:$0xff] %v5717_v53 }
 0x23c   : > { %8344 = vst [vmem:[#allocation99_spill] sm:$0xff] %v5720_v12  ;;  %8345 = vst [vmem:[#allocation100_spill] sm:$0xff] %v5724_v51  ;;  %v5750_v51 = vmul.f32 %v5438_v27, %v5272_v1  ;;  %v5771_v27 = vmul.f32 %v5434_v41, %v5240_v2 }
 0x23d   : > { %8346 = vst [vmem:[#allocation101_spill] sm:$0xff] %v5728_v7  ;;  %8347 = vst [vmem:[#allocation102_spill] sm:$0xff] %v5732_v11  ;;  %v5754_v11 = vmul.f32 %v5423_v4, %v5240_v2  ;;  %v5773_v4 = vpop.permute.xlu1 %1063 }
 0x23e   : > { %8348 = vst [vmem:[#allocation103_spill] sm:$0xff] %v5736_v50  ;;  %8349 = vst [vmem:[#allocation104_spill] sm:$0xff] %v5742_v21  ;;  %v1062_v50 = vpop.permute.xlu0 %1061  ;;  %v1079_v2 = vsel %vm1077_vm0, %v5561_v58, %v5773_v4 }
 0x23f   : > { %8350 = vst [vmem:[#allocation105_spill] sm:$0xff] %v5746_v19  ;;  %8351 = vst [vmem:[#allocation106_spill] sm:$0xff] %v5750_v51  ;;  %v1078_v51 = vsel %vm1077_vm0, %v5543_v62, %v1062_v50  ;;  %v1102_v20 = vsel %vm1077_vm0, %v1062_v50, %v5475_v14  ;;  %v1343_v50 = vmul.f32 %v5447_v47, %v1079_v2 }
 0x240   : > { %8352 = vst [vmem:[#allocation107_spill] sm:$0xff] %v5754_v11  ;;  %8353 = vst [vmem:[#allocation108_spill] sm:$0xff] %v5759_v31  ;;  %v1122_v41 = vsel %vm1110_vm1, %v1102_v20, 0.0  ;;  %v1339_v8 = vmul.f32 %v5447_v47, %v1078_v51  ;;  %v1944_v24 = vmul.f32 %v5465_v42, %v1079_v2 }
 0x241   : > { %8354 = vst [vmem:[#allocation109_spill] sm:$0xff] %v5763_v36  ;;  %8355 = vst [vmem:[#allocation110_spill] sm:$0xff] %v5767_v61  ;;  %v1704_v61 = vmul.f32 %v5461_v34, %v1079_v2  ;;  %v1336_v1 = vmul.f32 %v5498_v52, %v1122_v41  ;;  %v1697_v31 = vmul.f32 %v5502_v39, %v1122_v41  ;;  %v5810_v7 = vpop.permute.xlu1 %1031 }
 0x242   : > { %8356 = vst [vmem:[#allocation111_spill] sm:$0xff] %v5771_v27  ;;  %v1700_v27 = vmul.f32 %v5461_v34, %v1078_v51  ;;  %v5797_v36 = vadd.f32 %v5469_v26, %v1339_v8  ;;  %v1937_v20 = vmul.f32 %v5506_v17, %v1122_v41  ;;  %v1030_v53 = vpop.permute.xlu0 %1029  ;;  %v1423_v19 = vadd.f32 %v5479_v5, %v1343_v50  ;;  %v8357_v5 = vld [vmem:[#allocation63_spill] sm:$0xff]  ;;  %v8358_v41 = vld [vmem:[#allocation66_spill] sm:$0xff] }
 0x243   : > { %v1784_v12 = vadd.f32 %v5483_v45, %v1704_v61  ;;  %v2024_v21 = vadd.f32 %v5487_v38, %v1944_v24  ;;  %v5808_v2 = vadd.f32 %v5512_v16, %v1336_v1  ;;  %v5813_v8 = vadd.f32 %v5516_v35, %v1697_v31  ;;  %v8359_v16 = vld [vmem:[#allocation56_spill] sm:$0xff]  ;;  %v8360_v1 = vld [vmem:[#allocation62_spill] sm:$0xff] }
 0x244   : > { %v5801_v11 = vadd.f32 %v5473_v40, %v1700_v27  ;;  %v1940_v27 = vmul.f32 %v5465_v42, %v1078_v51  ;;  %v5817_v26 = vadd.f32 %v5520_v22, %v1937_v20  ;;  %v1087_v45 = vsel %vm1077_vm0, %v5810_v7, %v5561_v58  ;;  %v8361_v20 = vld [vmem:[#allocation64_spill] sm:$0xff]  ;;  %v8370_v42 = vld [vmem:[#allocation77_spill] sm:$0xff] }
 0x245   : > { %v1342_v38 = vmul.f32 %v5524_v32, %v1087_v45  ;;  %v1703_v24 = vmul.f32 %v8357_v5, %v1087_v45  ;;  %v1943_v40 = vmul.f32 %v8358_v41, %v1087_v45  ;;  %v1086_v31 = vsel %vm1077_vm0, %v1030_v53, %v5543_v62  ;;  %v1205_v63 = vpop.permute.xlu1 %1204 }
 0x246   : > { %v5830_v51 = vadd.f32 %v8359_v16, %v1940_v27  ;;  %v1094_v35 = vsel %vm1077_vm0, %v5475_v14, %v1030_v53  ;;  %v1338_v22 = vmul.f32 %v5524_v32, %v1086_v31  ;;  %v1699_v58 = vmul.f32 %v8357_v5, %v1086_v31  ;;  %v1203_v61 = vpop.permute.xlu0 %1202  ;;  %v8362_v16 = vld [vmem:[#allocation69_spill] sm:$0xff]  ;;  %v8363_v32 = vld [vmem:[#allocation68_spill] sm:$0xff] }
 0x247   : > { %v1422_v50 = vadd.f32 %v8360_v1, %v1342_v38  ;;  %v1783_v45 = vadd.f32 %v8361_v20, %v1703_v24  ;;  %v2023_v23 = vadd.f32 %v5551_v6, %v1943_v40  ;;  %v1337_v62 = vmul.f32 %v5555_v28, %v1094_v35  ;;  %v5849_v1 = vld [vmem:[#allocation7 + $0x30] ss:$0 sm:$0xff]  ;;  %v5851_v24 = vld [vmem:[#allocation7 + $0x38] ss:$0 sm:$0xff] }
 0x248   : > { %v1418_v27 = vadd.f32 %v5565_v25, %v1338_v22  ;;  %v1698_v30 = vmul.f32 %v8362_v16, %v1094_v35  ;;  %v1779_v53 = vadd.f32 %v5577_v44, %v1699_v58  ;;  %v1938_v14 = vmul.f32 %v5584_v15, %v1094_v35  ;;  %8364 = vst [vmem:[#allocation56_spill] sm:$0xff] %v5851_v24  ;;  %v8365_v44 = vld [vmem:[#allocation70_spill] sm:$0xff]  ;;  %v8367_v20 = vld [vmem:[#allocation72_spill] sm:$0xff] }
 0x249   : > { %v5846_v5 = vadd.f32 %v8363_v32, %v1337_v62  ;;  %v1939_v38 = vmul.f32 %v8358_v41, %v1086_v31  ;;  %v1220_v6 = vsel %vm1218_vm2, %v5706_v29, %v1205_v63  ;;  %v1244_v25 = vsel %vm1218_vm2, %v1205_v63, %v5634_v37  ;;  %v8366_v35 = vld [vmem:[#allocation74_spill] sm:$0xff]  ;;  %v8368_v41 = vld [vmem:[#allocation75_spill] sm:$0xff] }
 0x24a   : > { %v5860_v40 = vadd.f32 %v8365_v44, %v1698_v30  ;;  %v5863_v32 = vadd.f32 %v5588_v48, %v1938_v14  ;;  %v1270_v31 = vsel %vm1254_vm3, %v1244_v25, 0.0  ;;  %v1470_v22 = vmul.f32 %v8366_v35, %v1220_v6  ;;  %v1171_v58 = vpop.permute.xlu0 %1170  ;;  %v1173_v48 = vpop.permute.xlu1 %1172 }
 0x24b   : > { %v2019_v62 = vadd.f32 %v8367_v20, %v1939_v38  ;;  %v1471_v55 = vmul.f32 %v8368_v41, %v1270_v31  ;;  %v1831_v63 = vmul.f32 %v5610_v49, %v1220_v6  ;;  %v1832_v30 = vmul.f32 %v5614_v18, %v1270_v31 }
 0x24c   : > { %v5874_v14 = vadd.f32 %v1470_v22, %v1422_v50  ;;  %v2071_v25 = vmul.f32 %v5849_v1, %v1220_v6  ;;  %v2072_v44 = vmul.f32 %v5851_v24, %v1270_v31  ;;  %v1219_v0 = vsel %vm1218_vm2, %v5688_v13, %v1203_v61 }
 0x24d   : > { %v5881_v38 = vadd.f32 %v1471_v55, %v1423_v19  ;;  %v1863_v20 = vadd.f32 %v1831_v63, %v1783_v45  ;;  %v1864_v33 = vadd.f32 %v1832_v30, %v1784_v12  ;;  %v1243_v46 = vsel %vm1218_vm2, %v1203_v61, %v8370_v42  ;;  %v5916_v61 = vld [vmem:[#allocation7 + $0x20] ss:$0 sm:$0xff] }
 0x24e   : > { %8369 = vst [vmem:[#allocation62_spill] sm:$0xff] %v5874_v14  ;;  %v5887_v50 = vadd.f32 %v2071_v25, %v2023_v23  ;;  %v5889_v22 = vadd.f32 %v2072_v44, %v2024_v21  ;;  %v1266_v6 = vsel %vm1254_vm3, %v1243_v46, 0.0  ;;  %v1016_v31 = vpop.permute.xlu0 %1015  ;;  %v1466_v19 = vmul.f32 %v8366_v35, %v1219_v0  ;;  %v5897_v45 = vpop.permute.xlu1 %1017  ;;  %8376 = vst [vmem:[#allocation77_spill] sm:$0xff] %v5916_v61 }
 0x24f   : > { %v1467_v12 = vmul.f32 %v8368_v41, %v1266_v6  ;;  %v1827_v55 = vmul.f32 %v5610_v49, %v1219_v0  ;;  %v1828_v21 = vmul.f32 %v5614_v18, %v1266_v6  ;;  %v2067_v63 = vmul.f32 %v5849_v1, %v1219_v0 }
 0x250   : > { %v5903_v46 = vadd.f32 %v1466_v19, %v1418_v27  ;;  %v2068_v44 = vmul.f32 %v5851_v24, %v1266_v6  ;;  %v1228_v0 = vsel %vm1218_vm2, %v1173_v48, %v5706_v29  ;;  %v8379_v19 = vld [vmem:[#allocation82_spill] sm:$0xff] }
 0x251   : > { %v5906_v30 = vadd.f32 %v1467_v12, %v5797_v36  ;;  %v5908_v25 = vadd.f32 %v1827_v55, %v1779_v53  ;;  %v5912_v54 = vadd.f32 %v1828_v21, %v5801_v11  ;;  %v5914_v34 = vadd.f32 %v2067_v63, %v2019_v62  ;;  %v5931_v62 = vld [vmem:[#allocation7 + $0x28] ss:$0 sm:$0xff] }
 0x252   : > { %8371 = vst [vmem:[#allocation64_spill] sm:$0xff] %v5903_v46  ;;  %v1236_v36 = vsel %vm1218_vm2, %v5634_v37, %v1173_v48  ;;  %v5924_v27 = vpop.permute.xlu0 %1049  ;;  %v8105_v53 = vrot.slane %v5903_v46, 7  ;;  %v5929_v11 = vadd.f32 %v2068_v44, %v5830_v51  ;;  %8378 = vst [vmem:[#allocation113_spill] sm:$0xff] %v5931_v62  ;;  %v5934_v55 = vpop.permute.xlu1 %1021  ;;  %v1469_v21 = vmul.f32 %v5642_v9, %v1228_v0 }
 0x253   : > { %8372 = vst [vmem:[#allocation68_spill] sm:$0xff] %v5906_v30  ;;  %8373 = vst [vmem:[#allocation70_spill] sm:$0xff] %v5908_v25  ;;  %v8108_v6 = vrot.slane %v5906_v30, 7  ;;  %v1468_v12 = vmul.f32 %v8379_v19, %v1236_v36  ;;  %v1829_v37 = vmul.f32 %v5646_v57, %v1236_v36  ;;  %v1830_v48 = vmul.f32 %v5656_v59, %v1228_v0 }
 0x254   : > { %8374 = vst [vmem:[#allocation72_spill] sm:$0xff] %v5912_v54  ;;  %8375 = vst [vmem:[#allocation75_spill] sm:$0xff] %v5914_v34  ;;  %v8380_v63 = vrot.slane %v5874_v14, 7  ;;  %v8381_v44 = vrot.slane %v5881_v38, 7  ;;  %v8107_v29 = vrot.slane %v5929_v11, 1  ;;  %v2069_v54 = vmul.f32 %v5916_v61, %v1236_v36 }
 0x255   : > { %8377 = vst [vmem:[#allocation112_spill] sm:$0xff] %v5929_v11  ;;  %v8382_v46 = vrot.slane %v5887_v50, 1  ;;  %v8383_v14 = vrot.slane %v5914_v34, 1 }
 0x256   : > { %v1587_v51 = vsel %vm1560_vm4, %v8105_v53, %v8380_v63  ;;  %v1588_v23 = vsel %vm1560_vm4, %v8108_v6, %v8381_v44  ;;  %v2070_v53 = vmul.f32 %v5931_v62, %v1228_v0  ;;  %v5967_v30 = vpop.permute.xlu0 %1158  ;;  %v8385_v44 = vrot.slane %v5889_v22, 1 }
 0x257   : > { %v5954_v25 = vadd.f32 %v1863_v20, %v1587_v51  ;;  %v5956_v24 = vadd.f32 %v1864_v33, %v1588_v23  ;;  %v5964_v63 = vsel %vm2161_vm5, %v8383_v14, %v8382_v46  ;;  %v1227_v20 = vsel %vm1218_vm2, %v1171_v58, %v5688_v13  ;;  %v5986_v46 = vpop.permute.xlu1 %1053 }
 0x258   : > { %8384 = vst [vmem:[#allocation114_spill] sm:$0xff] %v5964_v63  ;;  %v5975_v33 = vsel %vm2161_vm5, %v8107_v29, %v8385_v44  ;;  %v1235_v14 = vsel %vm1218_vm2, %v8370_v42, %v1171_v58  ;;  %v1095_v23 = vsel %vm1077_vm0, %v1016_v31, %v5810_v7  ;;  %v1465_v36 = vmul.f32 %v5642_v9, %v1227_v20 }
 0x259   : > { %8386 = vst [vmem:[#allocation115_spill] sm:$0xff] %v5975_v33  ;;  %v1464_v0 = vmul.f32 %v8379_v19, %v1235_v14  ;;  %v1825_v51 = vmul.f32 %v5646_v57, %v1235_v14  ;;  %v1826_v44 = vmul.f32 %v5656_v59, %v1227_v20  ;;  %v2065_v13 = vmul.f32 %v5916_v61, %v1235_v14  ;;  %v8396_v33 = vld [vmem:[#allocation81_spill] sm:$0xff] }
 0x25a   : > { %v2066_v29 = vmul.f32 %v5931_v62, %v1227_v20  ;;  %v1103_v42 = vsel %vm1077_vm0, %v5773_v4, %v1016_v31  ;;  %v1341_v7 = vmul.f32 %v5555_v28, %v1095_v23  ;;  %v6002_v6 = vadd.f32 %v1465_v36, %v5846_v5  ;;  %v6010_v14 = vpop.permute.xlu0 %1190  ;;  %v8393_v31 = vld [vmem:[#allocation79_spill] sm:$0xff] }
 0x25b   : > { %v5999_v58 = vadd.f32 %v1464_v0, %v5808_v2  ;;  %v6005_v11 = vadd.f32 %v1825_v51, %v5813_v8  ;;  %v6008_v34 = vadd.f32 %v1826_v44, %v5860_v40  ;;  %v6013_v20 = vadd.f32 %v2065_v13, %v5817_v26  ;;  %v6021_v0 = vpop.permute.xlu1 %1162  ;;  %v8394_v13 = vld [vmem:[#allocation78_spill] sm:$0xff] }
 0x25c   : > { %8388 = vst [vmem:[#allocation117_spill] sm:$0xff] %v6002_v6  ;;  %v6016_v4 = vadd.f32 %v2066_v29, %v5863_v32  ;;  %v1126_v2 = vsel %vm1110_vm1, %v1103_v42, 0.0  ;;  %v1421_v5 = vadd.f32 %v8393_v31, %v1341_v7  ;;  %v1702_v44 = vmul.f32 %v8362_v16, %v1095_v23  ;;  %v8395_v7 = vld [vmem:[#allocation80_spill] sm:$0xff] }
 0x25d   : > { %8387 = vst [vmem:[#allocation116_spill] sm:$0xff] %v5999_v58  ;;  %8389 = vst [vmem:[#allocation118_spill] sm:$0xff] %v6005_v11  ;;  %v1340_v36 = vmul.f32 %v5498_v52, %v1126_v2  ;;  %v1701_v51 = vmul.f32 %v5502_v39, %v1126_v2  ;;  %v1941_v8 = vmul.f32 %v5506_v17, %v1126_v2 }
 0x25e   : > { %8390 = vst [vmem:[#allocation119_spill] sm:$0xff] %v6008_v34  ;;  %8391 = vst [vmem:[#allocation120_spill] sm:$0xff] %v6013_v20  ;;  %v6029_v29 = vadd.f32 %v1469_v21, %v1421_v5  ;;  %v1942_v40 = vmul.f32 %v5584_v15, %v1095_v23  ;;  %v1066_v34 = vpop.permute.xlu0 %1065  ;;  %v1782_v63 = vadd.f32 %v8396_v33, %v1702_v44  ;;  %v8397_v33 = vrot.slane %v6002_v6, 7 }
 0x25f   : > { %8392 = vst [vmem:[#allocation121_spill] sm:$0xff] %v6016_v4  ;;  %v1420_v42 = vadd.f32 %v8394_v13, %v1340_v36  ;;  %v1781_v31 = vadd.f32 %v8395_v7, %v1701_v51  ;;  %v6038_v26 = vpop.permute.xlu1 %1194  ;;  %v1080_v21 = vsel %vm1077_vm0, %v5924_v27, %v1066_v34  ;;  %v1104_v5 = vsel %vm1077_vm0, %v1066_v34, %v5897_v45 }
 0x260   : > { %v8111_v11 = vrot.slane %v6029_v29, 7  ;;  %v2021_v23 = vadd.f32 %v5650_v3, %v1941_v8  ;;  %v2022_v51 = vadd.f32 %v5660_v56, %v1942_v40  ;;  %v1862_v13 = vadd.f32 %v1830_v48, %v1782_v63  ;;  %v8401_v40 = vld [vmem:[#allocation87_spill] sm:$0xff]  ;;  %v8402_v63 = vld [vmem:[#allocation54_spill] sm:$0xff] }
 0x261   : > { %v6046_v36 = vadd.f32 %v1468_v12, %v1420_v42  ;;  %v1861_v2 = vadd.f32 %v1829_v37, %v1781_v31  ;;  %v1130_v7 = vsel %vm1110_vm1, %v1104_v5, 0.0  ;;  %v1347_v34 = vmul.f32 %v5447_v47, %v1080_v21 }
 0x262   : > { %v1586_v44 = vsel %vm1560_vm4, %v8397_v33, %v8111_v11  ;;  %v6060_v37 = vadd.f32 %v2069_v54, %v2021_v23  ;;  %v6062_v3 = vadd.f32 %v2070_v53, %v2022_v51  ;;  %v1344_v56 = vmul.f32 %v5498_v52, %v1130_v7  ;;  %v8404_v51 = vld [vmem:[#allocation86_spill] sm:$0xff]  ;;  %v8407_v11 = vld [vmem:[#allocation89_spill] sm:$0xff] }
 0x263   : > { %v8114_v12 = vrot.slane %v6046_v36, 7  ;;  %v6065_v8 = vadd.f32 %v1862_v13, %v1586_v44  ;;  %v6068_v42 = vadd.f32 %v8401_v40, %v1347_v34  ;;  %v1705_v48 = vmul.f32 %v5502_v39, %v1130_v7  ;;  %v1070_v5 = vpop.permute.xlu1 %1069  ;;  %v8406_v34 = vld [vmem:[#allocation88_spill] sm:$0xff] }
 0x264   : > { %8398 = vst [vmem:[#allocation79_spill] sm:$0xff] %v6060_v37  ;;  %8399 = vst [vmem:[#allocation78_spill] sm:$0xff] %v6062_v3  ;;  %v1708_v31 = vmul.f32 %v8402_v63, %v1080_v21  ;;  %v8403_v33 = vrot.slane %v5999_v58, 7  ;;  %v8115_v53 = vrot.slane %v6060_v37, 1  ;;  %v8116_v23 = vrot.slane %v6062_v3, 1  ;;  %v1034_v58 = vpop.permute.xlu0 %1033 }
 0x265   : > { %8400 = vst [vmem:[#allocation80_spill] sm:$0xff] %v6065_v8  ;;  %v6081_v44 = vadd.f32 %v8404_v51, %v1344_v56  ;;  %v6086_v40 = vadd.f32 %v8406_v34, %v1705_v48  ;;  %v1945_v6 = vmul.f32 %v5506_v17, %v1130_v7  ;;  %v1082_v7 = vsel %vm1077_vm0, %v5986_v46, %v1070_v5 }
 0x266   : > { %v1585_v54 = vsel %vm1560_vm4, %v8403_v33, %v8114_v12  ;;  %v6089_v32 = vadd.f32 %v8407_v11, %v1708_v31  ;;  %v8408_v33 = vrot.slane %v6013_v20, 1  ;;  %v8412_v11 = vld [vmem:[#allocation55_spill] sm:$0xff]  ;;  %v8413_v31 = vld [vmem:[#allocation90_spill] sm:$0xff]  ;;  %v1106_v51 = vsel %vm1077_vm0, %v1070_v5, %v5934_v55 }
 0x267   : > { %v6083_v13 = vadd.f32 %v1861_v2, %v1585_v54  ;;  %v8410_v2 = vrot.slane %v6016_v4, 1  ;;  %v1948_v48 = vmul.f32 %v8412_v11, %v1080_v21  ;;  %v6113_v54 = vadd.f32 %v8413_v31, %v1945_v6  ;;  %v8415_v4 = vld [vmem:[#allocation93_spill] sm:$0xff] }
 0x268   : > { %v6098_v12 = vsel %vm2161_vm5, %v8408_v33, %v8115_v53  ;;  %v1355_v34 = vmul.f32 %v5447_v47, %v1082_v7  ;;  %v1716_v33 = vmul.f32 %v8402_v63, %v1082_v7  ;;  %v8414_v53 = vld [vmem:[#allocation91_spill] sm:$0xff]  ;;  %v1138_v21 = vsel %vm1110_vm1, %v1106_v51, 0.0 }
 0x269   : > { %8405 = vst [vmem:[#allocation81_spill] sm:$0xff] %v6083_v13  ;;  %8409 = vst [vmem:[#allocation87_spill] sm:$0xff] %v6098_v12  ;;  %v6106_v56 = vsel %vm2161_vm5, %v8410_v2, %v8116_v23  ;;  %v6121_v2 = vadd.f32 %v8414_v53, %v1948_v48  ;;  %v1956_v23 = vmul.f32 %v8412_v11, %v1082_v7  ;;  %v8416_v12 = vld [vmem:[#allocation95_spill] sm:$0xff]  ;;  %v8417_v48 = vld [vmem:[#allocation97_spill] sm:$0xff] }
 0x26a   : > { %8411 = vst [vmem:[#allocation86_spill] sm:$0xff] %v6106_v56  ;;  %v1088_v6 = vsel %vm1077_vm0, %v1034_v58, %v5924_v27  ;;  %v1352_v31 = vmul.f32 %v5498_v52, %v1138_v21  ;;  %v6131_v5 = vadd.f32 %v8415_v4, %v1355_v34  ;;  %v1713_v56 = vmul.f32 %v5502_v39, %v1138_v21  ;;  %v8418_v27 = vld [vmem:[#allocation61_spill] sm:$0xff]  ;;  %v1038_v52 = vpop.permute.xlu1 %1037  ;;  %v8419_v11 = vld [vmem:[#allocation92_spill] sm:$0xff]  ;;  %v8420_v34 = vld [vmem:[#allocation94_spill] sm:$0xff] }
 0x26b   : > { %v6135_v20 = vadd.f32 %v8416_v12, %v1716_v33  ;;  %v1953_v53 = vmul.f32 %v5506_v17, %v1138_v21  ;;  %v6139_v51 = vadd.f32 %v8417_v48, %v1956_v23  ;;  %v1096_v7 = vsel %vm1077_vm0, %v5897_v45, %v1034_v58  ;;  %v1207_v21 = vpop.permute.xlu0 %1206  ;;  %v8422_v23 = vld [vmem:[#allocation96_spill] sm:$0xff]  ;;  %v8424_v17 = vld [vmem:[#allocation101_spill] sm:$0xff]  ;;  %v8425_v45 = vld [vmem:[#allocation63_spill] sm:$0xff] }
 0x26c   : > { %v1346_v63 = vmul.f32 %v8418_v27, %v1088_v6  ;;  %v6146_v4 = vadd.f32 %v8419_v11, %v1352_v31  ;;  %v6149_v39 = vadd.f32 %v8420_v34, %v1713_v56  ;;  %v1345_v12 = vmul.f32 %v5555_v28, %v1096_v7  ;;  %v8426_v13 = vld [vmem:[#allocation100_spill] sm:$0xff]  ;;  %v8427_v31 = vld [vmem:[#allocation102_spill] sm:$0xff] }
 0x26d   : > { %v1706_v33 = vmul.f32 %v8362_v16, %v1096_v7  ;;  %v6154_v48 = vadd.f32 %v8422_v23, %v1953_v53  ;;  %v1707_v58 = vmul.f32 %v8425_v45, %v1088_v6  ;;  %v1946_v8 = vmul.f32 %v5584_v15, %v1096_v7  ;;  %v8428_v34 = vld [vmem:[#allocation66_spill] sm:$0xff]  ;;  %v8429_v53 = vld [vmem:[#allocation103_spill] sm:$0xff] }
 0x26e   : > { %8421 = vst [vmem:[#allocation88_spill] sm:$0xff] %v6149_v39  ;;  %v1426_v47 = vadd.f32 %v8424_v17, %v1346_v63  ;;  %v6160_v11 = vadd.f32 %v8426_v13, %v1345_v12  ;;  %v1947_v3 = vmul.f32 %v8428_v34, %v1088_v6  ;;  %v1090_v39 = vsel %vm1077_vm0, %v1038_v52, %v5986_v46  ;;  %v8431_v7 = vld [vmem:[#allocation99_spill] sm:$0xff]  ;;  %v8435_v6 = vld [vmem:[#allocation105_spill] sm:$0xff] }
 0x26f   : > { %8423 = vst [vmem:[#allocation89_spill] sm:$0xff] %v6154_v48  ;;  %v6163_v56 = vadd.f32 %v8427_v31, %v1706_v33  ;;  %v1787_v23 = vadd.f32 %v8429_v53, %v1707_v58  ;;  %v8430_v48 = vld [vmem:[#allocation104_spill] sm:$0xff]  ;;  %v1098_v63 = vsel %vm1077_vm0, %v5934_v55, %v1038_v52  ;;  %v1354_v13 = vmul.f32 %v8418_v27, %v1090_v39  ;;  %v8440_v55 = vld [vmem:[#allocation107_spill] sm:$0xff] }
 0x270   : > { %v6171_v17 = vadd.f32 %v8430_v48, %v1946_v8  ;;  %v8432_v12 = vand.u32 15, %v8431_v7  ;;  %v2027_v31 = vadd.f32 %v8435_v6, %v1947_v3  ;;  %v1353_v46 = vmul.f32 %v5555_v28, %v1098_v63  ;;  %v8436_v48 = vld [vmem:[#allocation98_spill] sm:$0xff]  ;;  %v8443_v28 = vld [vmem:[#allocation108_spill] sm:$0xff] }
 0x271   : > { %v1714_v58 = vmul.f32 %v8362_v16, %v1098_v63  ;;  %v1715_v8 = vmul.f32 %v8425_v45, %v1090_v39  ;;  %v8437_v53 = vand.u32 15, %v8436_v48  ;;  %v1434_v7 = vadd.f32 %v8440_v55, %v1354_v13  ;;  %v8441_v6 = vld [vmem:[#allocation106_spill] sm:$0xff]  ;;  %v8445_v48 = vld [vmem:[#allocation109_spill] sm:$0xff]  ;;  %v1211_v55 = vpop.permute.xlu1 %1210 }
 0x272   : > { %vm6179_vm6 = vcmp.ge.s32.totalorder %v8432_v12, 1  ;;  %v1954_v12 = vmul.f32 %v5584_v15, %v1098_v63  ;;  %v1955_v27 = vmul.f32 %v8428_v34, %v1090_v39  ;;  %v1221_v3 = vsel %vm1218_vm2, %v6010_v14, %v1207_v21  ;;  %v1175_v63 = vpop.permute.xlu0 %1174  ;;  %v8446_v15 = vld [vmem:[#allocation110_spill] sm:$0xff]  ;;  %v8448_v34 = vld [vmem:[#allocation111_spill] sm:$0xff] }
 0x273   : > { %vm6189_vm7 = vcmp.lt.s32.totalorder %v8437_v53, 15  ;;  %v6200_v16 = vadd.f32 %v8441_v6, %v1353_v46  ;;  %v6203_v45 = vadd.f32 %v8443_v28, %v1714_v58  ;;  %v1795_v53 = vadd.f32 %v8445_v48, %v1715_v8 }
 0x274   : > { %v1245_v13 = vsel %vm1218_vm2, %v1207_v21, %v5967_v30  ;;  %v6210_v39 = vadd.f32 %v8446_v15, %v1954_v12  ;;  %v2035_v37 = vadd.f32 %v8448_v34, %v1955_v27  ;;  %v1474_v6 = vmul.f32 %v8366_v35, %v1221_v3 }
 0x275   : > { %8442 = vst [vmem:[#allocation90_spill] sm:$0xff] %v6200_v16  ;;  %8444 = vst [vmem:[#allocation91_spill] sm:$0xff] %v6203_v45  ;;  %v1274_v46 = vsel %vm1254_vm3, %v1245_v13, 0.0  ;;  %v1835_v58 = vmul.f32 %v5610_v49, %v1221_v3  ;;  %v2075_v21 = vmul.f32 %v5849_v1, %v1221_v3  ;;  %v8450_v45 = vld [vmem:[#allocation56_spill] sm:$0xff]  ;;  %v1223_v27 = vsel %vm1218_vm2, %v6038_v26, %v1211_v55 }
 0x276   : > { %8447 = vst [vmem:[#allocation93_spill] sm:$0xff] %v6210_v39  ;;  %v1475_v28 = vmul.f32 %v8368_v41, %v1274_v46  ;;  %v1836_v8 = vmul.f32 %v5614_v18, %v1274_v46  ;;  %v6220_v48 = vadd.f32 %v1474_v6, %v1426_v47  ;;  %v2076_v15 = vmul.f32 %v8450_v45, %v1274_v46 }
 0x277   : > { %v1247_v34 = vsel %vm1218_vm2, %v1211_v55, %v6021_v0  ;;  %v1867_v13 = vadd.f32 %v1835_v58, %v1787_v23  ;;  %v6233_v16 = vadd.f32 %v2075_v21, %v2027_v31  ;;  %v1482_v6 = vmul.f32 %v8366_v35, %v1223_v27  ;;  %v6246_v31 = vpop.permute.xlu0 %1019 }
 0x278   : > { %8449 = vst [vmem:[#allocation95_spill] sm:$0xff] %v6220_v48  ;;  %v6230_v12 = vadd.f32 %v1475_v28, %v6068_v42  ;;  %v1868_v39 = vadd.f32 %v1836_v8, %v6089_v32  ;;  %v8140_v47 = vrot.slane %v6220_v48, 7  ;;  %v6237_v3 = vadd.f32 %v2076_v15, %v6121_v2  ;;  %v8451_v28 = vld [vmem:[#allocation62_spill] sm:$0xff] }
 0x279   : > { %v1282_v46 = vsel %vm1254_vm3, %v1247_v34, 0.0  ;;  %v1843_v32 = vmul.f32 %v5610_v49, %v1223_v27  ;;  %v8452_v2 = vrot.slane %v8451_v28, 7  ;;  %v6255_v21 = vadd.f32 %v1482_v6, %v1434_v7 }
 0x27a   : > { %v8141_v55 = vrot.slane %v6230_v12, 7  ;;  %v1483_v23 = vmul.f32 %v8368_v41, %v1282_v46  ;;  %v8146_v8 = vrot.slane %v6237_v3, 1  ;;  %v1844_v15 = vmul.f32 %v5614_v18, %v1282_v46 }
 0x27b   : > { %v1583_v58 = vsel %vm1560_vm4, %v8452_v2, %v8140_v47  ;;  %8453 = vst [vmem:[#allocation97_spill] sm:$0xff] %v6255_v21  ;;  %v8454_v34 = vrot.slane %v5881_v38, 7  ;;  %v8455_v28 = vrot.slane %v6233_v16, 1  ;;  %v8456_v2 = vrot.slane %v5887_v50, 1 }
 0x27c   : > { %v1627_v48 = vsel %vm6179_vm6, %v1583_v58, 0.0  ;;  %v6273_v6 = vadd.f32 %v1483_v23, %v6131_v5 }
 0x27d   : > { %v1584_v42 = vsel %vm1560_vm4, %v8454_v34, %v8141_v55  ;;  %v2184_v7 = vsel %vm2161_vm5, %v8456_v2, %v8455_v28  ;;  %v6277_v38 = vadd.f32 %v1867_v13, %v1627_v48  ;;  %v8458_v34 = vrot.slane %v5889_v22, 1 }
 0x27e   : > { %8457 = vst [vmem:[#allocation92_spill] sm:$0xff] %v6273_v6  ;;  %v1628_v47 = vsel %vm6179_vm6, %v1584_v42, 0.0  ;;  %v2224_v50 = vsel %vm6189_vm7, %v2184_v7, 0.0  ;;  %v6295_v13 = vadd.f32 %v1843_v32, %v1795_v53  ;;  %v6298_v22 = vadd.f32 %v1844_v15, %v6135_v20  ;;  %v6312_v20 = vld [vmem:[#allocation8] sm:$0xf]  ;;  %v8463_v7 = vld [vmem:[#allocation20_spill] sm:$0xff] }
 0x27f   : > { %v2185_v58 = vsel %vm2161_vm5, %v8458_v34, %v8146_v8  ;;  %v6287_v55 = vadd.f32 %v1868_v39, %v1628_v47  ;;  %v6292_v23 = vadd.f32 %v2224_v50, %v5954_v25  ;;  %v2083_v42 = vmul.f32 %v5849_v1, %v1223_v27  ;;  %v6305_v47 = vpop.permute.xlu0 %1051  ;;  %v8489_v8 = vld [vmem:[#allocation37_spill] sm:$0xff] }
 0x280   : > { %v2225_v5 = vsel %vm6189_vm7, %v2185_v58, 0.0  ;;  %v2084_v28 = vmul.f32 %v8450_v45, %v1282_v46  ;;  %v1229_v39 = vsel %vm1218_vm2, %v1175_v63, %v6010_v14  ;;  %v1237_v25 = vsel %vm1218_vm2, %v5967_v30, %v1175_v63  ;;  %v1179_v63 = vpop.permute.xlu1 %1178 }
 0x281   : > { %v2257_v48 = vadd.f32 %v2225_v5, %v5956_v24  ;;  %v1473_v24 = vmul.f32 %v5642_v9, %v1229_v39  ;;  %v1834_v53 = vmul.f32 %v5656_v59, %v1229_v39  ;;  %v6314_v32 = vadd.f32 %v2083_v42, %v2035_v37 }
 0x282   : > { %v6317_v27 = vadd.f32 %v2084_v28, %v6139_v51  ;;  %v1472_v46 = vmul.f32 %v8379_v19, %v1237_v25  ;;  %v1833_v15 = vmul.f32 %v5646_v57, %v1237_v25  ;;  %v6330_v37 = vrot.slane %v6312_v20, %v8463_v7 }
 0x283   : > { %8459 = vst [vmem:[#allocation94_spill] sm:$0xff] %v6314_v32  ;;  %v6321_v14 = vadd.f32 %v1473_v24, %v6160_v11  ;;  %v1866_v30 = vadd.f32 %v1834_v53, %v6163_v56  ;;  %v2073_v58 = vmul.f32 %v5916_v61, %v1237_v25  ;;  %v2074_v50 = vmul.f32 %v5931_v62, %v1229_v39  ;;  %v6343_v5 = vpop.permute.xlu0 %1160 }
 0x284   : > { %8460 = vst [vmem:[#allocation96_spill] sm:$0xff] %v6317_v27  ;;  %v6326_v2 = vadd.f32 %v1472_v46, %v6081_v44  ;;  %8464 = vst [vmem:[#allocation102_spill] sm:$0xff] %v6330_v37  ;;  %v1865_v34 = vadd.f32 %v1833_v15, %v6086_v40  ;;  %v1231_v56 = vsel %vm1218_vm2, %v1179_v63, %v6038_v26  ;;  %v8465_v40 = vrot.slane %v6029_v29, 7 }
 0x285   : > { %8461 = vst [vmem:[#allocation101_spill] sm:$0xff] %v6321_v14  ;;  %v8142_v51 = vrot.slane %v6321_v14, 7  ;;  %v1239_v44 = vsel %vm1218_vm2, %v6021_v0, %v1179_v63  ;;  %v6352_v28 = vadd.f32 %v2073_v58, %v6113_v54  ;;  %v1481_v26 = vmul.f32 %v5642_v9, %v1231_v56  ;;  %v6376_v63 = vpop.permute.xlu1 %1025 }
 0x286   : > { %8462 = vst [vmem:[#allocation100_spill] sm:$0xff] %v6326_v2  ;;  %v8144_v11 = vrot.slane %v6326_v2, 7  ;;  %v1480_v39 = vmul.f32 %v8379_v19, %v1239_v44  ;;  %v8467_v0 = vrot.slane %v6046_v36, 7  ;;  %v6365_v24 = vadd.f32 %v2074_v50, %v6171_v17  ;;  %8471 = vst [vmem:[#allocation98_spill] sm:$0xff] %v6376_v63  ;;  %v8473_v17 = vld [vmem:[#allocation90_spill] sm:$0xff]  ;;  %v8513_v2 = vld [vmem:[#allocation19_spill] sm:$0xff] }
 0x287   : > { %v1582_v42 = vsel %vm1560_vm4, %v8465_v40, %v8142_v51  ;;  %8466 = vst [vmem:[#allocation103_spill] sm:$0xff] %v6352_v28  ;;  %v1841_v54 = vmul.f32 %v5646_v57, %v1239_v44  ;;  %v8143_v15 = vrot.slane %v6352_v28, 1  ;;  %v6382_v50 = vadd.f32 %v1481_v26, %v8473_v17  ;;  %v8480_v26 = vld [vmem:[#allocation78_spill] sm:$0xff]  ;;  %v8482_v17 = vld [vmem:[#allocation91_spill] sm:$0xff]  ;;  %v6409_v51 = vpop.permute.xlu0 %1192  ;;  %v8509_v28 = vld [vmem:[#allocation52_spill] sm:$0xff] }
 0x288   : > { %v1581_v25 = vsel %vm1560_vm4, %v8467_v0, %v8144_v11  ;;  %v1626_v29 = vsel %vm6179_vm6, %v1582_v42, 0.0  ;;  %8468 = vst [vmem:[#allocation104_spill] sm:$0xff] %v6365_v24  ;;  %v6374_v36 = vadd.f32 %v1480_v39, %v6146_v4  ;;  %v8145_v40 = vrot.slane %v6365_v24, 1  ;;  %v8478_v39 = vld [vmem:[#allocation88_spill] sm:$0xff] }
 0x289   : > { %v1625_v53 = vsel %vm6179_vm6, %v1581_v25, 0.0  ;;  %v6370_v46 = vadd.f32 %v1866_v30, %v1626_v29  ;;  %8474 = vst [vmem:[#allocation106_spill] sm:$0xff] %v6382_v50  ;;  %v1842_v42 = vmul.f32 %v5656_v59, %v1231_v56  ;;  %v6386_v33 = vadd.f32 %v6330_v37, %v2257_v48  ;;  %v8476_v30 = vld [vmem:[#allocation79_spill] sm:$0xff]  ;;  %v8487_v11 = vld [vmem:[#allocation80_spill] sm:$0xff] }
 0x28a   : > { %8470 = vst [vmem:[#allocation105_spill] sm:$0xff] %v6374_v36  ;;  %v6378_v58 = vadd.f32 %v1865_v34, %v1625_v53  ;;  %v8477_v0 = vrot.slane %v8476_v30, 1  ;;  %v6395_v34 = vadd.f32 %v1841_v54, %v8478_v39  ;;  %v2081_v25 = vmul.f32 %v5916_v61, %v1239_v44  ;;  %v8517_v61 = vld [vmem:[#allocation23_spill] sm:$0xff]  ;;  %v8522_v57 = vld [vmem:[#allocation48_spill] sm:$0xff] }
 0x28b   : > { %8469 = vst [vmem:[#allocation99_spill] sm:$0xff] %v6370_v46  ;;  %8475 = vst [vmem:[#allocation108_spill] sm:$0xff] %v6386_v33  ;;  %v8481_v29 = vrot.slane %v8480_v26, 1  ;;  %v6407_v30 = vadd.f32 %v1842_v42, %v8482_v17  ;;  %v2082_v39 = vmul.f32 %v5931_v62, %v1231_v56  ;;  %v8491_v42 = vld [vmem:[#allocation41_spill] sm:$0xff]  ;;  %v3768_v52 = vmul.f32 -1.442695, %v6386_v33  ;;  %v6477_v62 = vpop.permute.xlu0 %1067 }
 0x28c   : > { %8472 = vst [vmem:[#allocation107_spill] sm:$0xff] %v6378_v58  ;;  %v2182_v4 = vsel %vm2161_vm5, %v8477_v0, %v8143_v15  ;;  %8479 = vst [vmem:[#allocation109_spill] sm:$0xff] %v6395_v34  ;;  %v8484_v0 = vld [vmem:[#allocation81_spill] sm:$0xff]  ;;  %v8496_v56 = vld [vmem:[#allocation44_spill] sm:$0xff]  ;;  %v6501_v9 = vmul.f32 %v8522_v57, %v8517_v61 }
 0x28d   : > { %v2183_v48 = vsel %vm2161_vm5, %v8481_v29, %v8145_v40  ;;  %v2222_v53 = vsel %vm6189_vm7, %v2182_v4, 0.0  ;;  %8483 = vst [vmem:[#allocation110_spill] sm:$0xff] %v6407_v30  ;;  %v8485_v15 = vld [vmem:[#allocation89_spill] sm:$0xff]  ;;  %v8488_v40 = vld [vmem:[#allocation24_spill] sm:$0xff]  ;;  %4282 = vpow2.f32 %v3768_v52 }
 0x28e   : > { %v2223_v54 = vsel %vm6189_vm7, %v2183_v48, 0.0  ;;  %v2254_v44 = vadd.f32 %v2222_v53, %v8484_v0  ;;  %v6416_v26 = vadd.f32 %v2081_v25, %v8485_v15  ;;  %v6421_v4 = vmul.f32 %v8489_v8, %v8488_v40  ;;  %v8493_v48 = vld [vmem:[#allocation93_spill] sm:$0xff]  ;;  %v6431_v53 = vpop.permute.xlu1 %1057  ;;  %v8501_v0 = vld [vmem:[#allocation38_spill] sm:$0xff] }
 0x28f   : > { %v2255_v29 = vadd.f32 %v2223_v54, %v8487_v11  ;;  %v6425_v17 = vmul.f32 %v8491_v42, %v8488_v40  ;;  %v6429_v7 = vadd.f32 %v2082_v39, %v8493_v48  ;;  %8495 = vst [vmem:[#allocation79_spill] sm:$0xff] %v6431_v53  ;;  %v6435_v15 = vmul.f32 %v8496_v56, %v8488_v40  ;;  %v8498_v11 = vld [vmem:[#allocation22_spill] sm:$0xff]  ;;  %v8503_v39 = vld [vmem:[#allocation39_spill] sm:$0xff]  ;;  %v8506_v46 = vld [vmem:[#allocation29_spill] sm:$0xff] }
 0x290   : > { %8486 = vst [vmem:[#allocation111_spill] sm:$0xff] %v6416_v26  ;;  %8490 = vst [vmem:[#allocation56_spill] sm:$0xff] %v6421_v4  ;;  %v6439_v25 = vmul.f32 %v8489_v8, %v8498_v11  ;;  %v8500_v54 = vld [vmem:[#allocation26_spill] sm:$0xff]  ;;  %v6447_v33 = vmul.f32 %v8491_v42, %v8498_v11  ;;  %v6455_v40 = vmul.f32 %v8496_v56, %v8498_v11  ;;  %v8507_v58 = vld [vmem:[#allocation49_spill] sm:$0xff] }
 0x291   : > { %8492 = vst [vmem:[#allocation62_spill] sm:$0xff] %v6425_v17  ;;  %8494 = vst [vmem:[#allocation90_spill] sm:$0xff] %v6429_v7  ;;  %v6443_v4 = vmul.f32 %v8501_v0, %v8500_v54  ;;  %v6451_v48 = vmul.f32 %v8503_v39, %v8500_v54  ;;  %v6463_v24 = vmul.f32 %v8507_v58, %v8506_v46  ;;  %v8511_v34 = vld [vmem:[#allocation53_spill] sm:$0xff] }
 0x292   : > { %8497 = vst [vmem:[#allocation88_spill] sm:$0xff] %v6435_v15  ;;  %8499 = vst [vmem:[#allocation78_spill] sm:$0xff] %v6439_v25  ;;  %v8505_v15 = vld [vmem:[#allocation43_spill] sm:$0xff]  ;;  %v6467_v30 = vmul.f32 %v8509_v28, %v8506_v46  ;;  %v6471_v14 = vmul.f32 %v8511_v34, %v8506_v46  ;;  %v6475_v11 = vrot.slane %v6312_v20, %v8513_v2  ;;  %v8534_v25 = vld [vmem:[#allocation32_spill] sm:$0xff] }
 0x293   : > { %8502 = vst [vmem:[#allocation91_spill] sm:$0xff] %v6447_v33  ;;  %8504 = vst [vmem:[#allocation81_spill] sm:$0xff] %v6455_v40  ;;  %v6459_v17 = vmul.f32 %v8505_v15, %v8500_v54  ;;  %v8515_v54 = vld [vmem:[#allocation28_spill] sm:$0xff]  ;;  %v8520_v46 = vld [vmem:[#allocation47_spill] sm:$0xff] }
 0x294   : > { %8508 = vst [vmem:[#allocation89_spill] sm:$0xff] %v6463_v24  ;;  %8510 = vst [vmem:[#allocation80_spill] sm:$0xff] %v6467_v30  ;;  %v6481_v37 = vmul.f32 %v8507_v58, %v8515_v54  ;;  %v8518_v24 = vld [vmem:[#allocation45_spill] sm:$0xff]  ;;  %v6489_v30 = vmul.f32 %v8509_v28, %v8515_v54  ;;  %v6497_v2 = vmul.f32 %v8511_v34, %v8515_v54  ;;  %v8525_v40 = vld [vmem:[#allocation35_spill] sm:$0xff] }
 0x295   : > { %8512 = vst [vmem:[#allocation24_spill] sm:$0xff] %v6471_v14  ;;  %8514 = vst [vmem:[#allocation37_spill] sm:$0xff] %v6475_v11  ;;  %v6485_v59 = vmul.f32 %v8518_v24, %v8517_v61  ;;  %v6493_v14 = vmul.f32 %v8520_v46, %v8517_v61  ;;  %v6517_v54 = vmul.f32 %v8503_v39, %v8525_v40  ;;  %v8532_v33 = vld [vmem:[#allocation42_spill] sm:$0xff] }
 0x296   : > { %8516 = vst [vmem:[#allocation41_spill] sm:$0xff] %v6481_v37  ;;  %8519 = vst [vmem:[#allocation93_spill] sm:$0xff] %v6489_v30  ;;  %v8523_v37 = vld [vmem:[#allocation30_spill] sm:$0xff]  ;;  %v6509_v30 = vmul.f32 %v8501_v0, %v8525_v40 }
 0x297   : > { %8521 = vst [vmem:[#allocation44_spill] sm:$0xff] %v6497_v2  ;;  %v6505_v19 = vmul.f32 %v8489_v8, %v8523_v37  ;;  %v6513_v52 = vmul.f32 %v8491_v42, %v8523_v37  ;;  %8528 = vst [vmem:[#allocation39_spill] sm:$0xff] %v6517_v54  ;;  %v6519_v2 = vpop.permute.xlu1 %1166  ;;  %v6523_v61 = vmul.f32 %v8496_v56, %v8523_v37 }
 0x298   : > { %8526 = vst [vmem:[#allocation26_spill] sm:$0xff] %v6509_v30  ;;  %8529 = vst [vmem:[#allocation43_spill] sm:$0xff] %v6519_v2  ;;  %v6531_v30 = vmul.f32 %v8507_v58, %v8532_v33  ;;  %v6539_v54 = vadd.f32 %v6475_v11, %v6292_v23  ;;  %v1300_v2 = vadd.s32 32, %v5011_v43  ;;  %v6544_v37 = vmul.f32 %v8509_v28, %v8532_v33 }
 0x299   : > { %8524 = vst [vmem:[#allocation22_spill] sm:$0xff] %v6505_v19  ;;  %8527 = vst [vmem:[#allocation38_spill] sm:$0xff] %v6513_v52  ;;  %v6527_v19 = vmul.f32 %v8505_v15, %v8525_v40  ;;  %v6535_v52 = vmul.f32 %v8518_v24, %v8534_v25  ;;  %v6548_v40 = vmul.f32 %v8520_v46, %v8534_v25 }
 0x29a   : > { %8530 = vst [vmem:[#allocation29_spill] sm:$0xff] %v6523_v61  ;;  %8533 = vst [vmem:[#allocation52_spill] sm:$0xff] %v6531_v30  ;;  %v8541_v61 = vld [vmem:[#allocation25_spill] sm:$0xff]  ;;  %v6560_v23 = vmul.f32 %v8511_v34, %v8532_v33  ;;  %v6564_v11 = vmul.f32 %v8522_v57, %v8534_v25 }
 0x29b   : > { %8531 = vst [vmem:[#allocation49_spill] sm:$0xff] %v6527_v19  ;;  %8535 = vst [vmem:[#allocation53_spill] sm:$0xff] %v6535_v52  ;;  %v8539_v19 = vld [vmem:[#allocation18_spill] sm:$0xff]  ;;  %v6556_v52 = vmul.f32 %v8518_v24, %v8541_v61  ;;  %v6576_v53 = vmul.f32 %v8520_v46, %v8541_v61  ;;  %v6580_v33 = vmul.f32 %v8522_v57, %v8541_v61  ;;  %v1308_v61 = vand.u32 15, %v1300_v2 }
 0x29c   : > { %8536 = vst [vmem:[#allocation28_spill] sm:$0xff] %v6539_v54  ;;  %8537 = vst [vmem:[#allocation23_spill] sm:$0xff] %v6544_v37  ;;  %v6552_v30 = vrot.slane %v6312_v20, %v8539_v19  ;;  %v8545_v37 = vld [vmem:[#allocation21_spill] sm:$0xff] }
 0x29d   : > { %8538 = vst [vmem:[#allocation45_spill] sm:$0xff] %v6548_v40  ;;  %8542 = vst [vmem:[#allocation30_spill] sm:$0xff] %v6556_v52  ;;  %v6568_v7 = vrot.slane %v6312_v20, %v8545_v37  ;;  %v8547_v40 = vld [vmem:[#allocation27_spill] sm:$0xff]  ;;  %v1299_v37 = vadd.s32 24, %v5011_v43  ;;  %vm6650_vm8 = vcmp.ge.s32.totalorder %v1308_v61, 1 }
 0x29e   : > { %8540 = vst [vmem:[#allocation47_spill] sm:$0xff] %v6552_v30  ;;  %8543 = vst [vmem:[#allocation35_spill] sm:$0xff] %v6560_v23  ;;  %v6572_v19 = vmul.f32 %v8501_v0, %v8547_v40  ;;  %v6582_v23 = vpop.permute.xlu0 %1035  ;;  %v6586_v25 = vmul.f32 %v8503_v39, %v8547_v40  ;;  %v6590_v20 = vmul.f32 %v8505_v15, %v8547_v40 }
 0x29f   : > { %8544 = vst [vmem:[#allocation42_spill] sm:$0xff] %v6564_v11  ;;  %8546 = vst [vmem:[#allocation32_spill] sm:$0xff] %v6568_v7  ;;  %v8553_v11 = vld [vmem:[#allocation31_spill] sm:$0xff]  ;;  %v6607_v40 = vadd.f32 %v6552_v30, %v2254_v44 }
 0x2a0   : > { %8548 = vst [vmem:[#allocation25_spill] sm:$0xff] %v6572_v19  ;;  %8549 = vst [vmem:[#allocation27_spill] sm:$0xff] %v6576_v53  ;;  %v6595_v52 = vmul.f32 %v8489_v8, %v8553_v11  ;;  %v3767_v53 = vmul.f32 -1.442695, %v6539_v54  ;;  %v1089_v8 = vsel %vm1077_vm0, %v6582_v23, %v6305_v47  ;;  %v8558_v54 = vld [vmem:[#allocation46_spill] sm:$0xff]  ;;  %v8636_v19 = vld [vmem:[#allocation43_spill] sm:$0xff] }
 0x2a1   : > { %8550 = vst [vmem:[#allocation122_spill] sm:$0xff] %v6580_v33  ;;  %8551 = vst [vmem:[#allocation123_spill] sm:$0xff] %v6586_v25  ;;  %v6600_v33 = vmul.f32 %v8491_v42, %v8553_v11  ;;  %v6604_v25 = vmul.f32 %v8496_v56, %v8553_v11  ;;  %v6617_v2 = vmul.f32 %v8501_v0, %v8558_v54  ;;  %v8560_v42 = vld [vmem:[#allocation57_spill] sm:$0xff]  ;;  %v4283_v0 = vpop.eup %4282 }
 0x2a2   : > { %8552 = vst [vmem:[#allocation124_spill] sm:$0xff] %v6590_v20  ;;  %8554 = vst [vmem:[#allocation31_spill] sm:$0xff] %v6595_v52  ;;  %v6609_v20 = vpop.permute.xlu1 %1073  ;;  %v6624_v56 = vadd.f32 %v6568_v7, %v2255_v29  ;;  %v6628_v44 = vmul.f32 %v8503_v39, %v8558_v54  ;;  %v6632_v11 = vmul.f32 %v8505_v15, %v8558_v54  ;;  %v1307_v29 = vand.u32 15, %v1299_v37  ;;  %v8571_v54 = vld [vmem:[#allocation51_spill] sm:$0xff] }
 0x2a3   : > { %8555 = vst [vmem:[#allocation125_spill] sm:$0xff] %v6600_v33  ;;  %8556 = vst [vmem:[#allocation126_spill] sm:$0xff] %v6604_v25  ;;  %v6621_v33 = vmul.f32 %v8507_v58, %v8560_v42  ;;  %v8565_v25 = vld [vmem:[#allocation33_spill] sm:$0xff]  ;;  %v1081_v58 = vsel %vm1077_vm0, %v6305_v47, %v6477_v62  ;;  %v6645_v39 = vmul.f32 %v8509_v28, %v8560_v42  ;;  %4284 = vpow2.f32 %v3767_v53  ;;  %v8575_v7 = vld [vmem:[#allocation55_spill] sm:$0xff] }
 0x2a4   : > { %8557 = vst [vmem:[#allocation127_spill] sm:$0xff] %v6607_v40  ;;  %8559 = vst [vmem:[#allocation46_spill] sm:$0xff] %v6617_v2  ;;  %v6636_v52 = vmul.f32 %v8518_v24, %v8565_v25  ;;  %v8568_v24 = vld [vmem:[#allocation61_spill] sm:$0xff]  ;;  %v1209_v2 = vpop.permute.xlu0 %1208  ;;  %v3765_v47 = vmul.f32 -1.442695, %v6607_v40  ;;  %v6658_v53 = vadd.f32 1.0, %v4283_v0  ;;  %v6667_v61 = vsel %vm1077_vm0, %v6609_v20, %v6376_v63 }
 0x2a5   : > { %8561 = vst [vmem:[#allocation57_spill] sm:$0xff] %v6621_v33  ;;  %8562 = vst [vmem:[#allocation128_spill] sm:$0xff] %v6624_v56  ;;  %v1350_v33 = vmul.f32 %v8568_v24, %v1089_v8  ;;  %v6661_v15 = vmul.f32 -1.442695, %v6624_v56  ;;  %v1105_v37 = vsel %vm1077_vm0, %v6477_v62, %v6246_v31  ;;  %v8573_v0 = vld [vmem:[#allocation63_spill] sm:$0xff]  ;;  %v1222_v40 = vsel %vm1218_vm2, %v6409_v51, %v1209_v2 }
 0x2a6   : > { %8563 = vst [vmem:[#allocation129_spill] sm:$0xff] %v6628_v44  ;;  %8564 = vst [vmem:[#allocation130_spill] sm:$0xff] %v6632_v11  ;;  %v6674_v44 = vpop.permute.xlu1 %1041  ;;  %v1711_v28 = vmul.f32 %v8573_v0, %v1089_v8  ;;  %v1952_v30 = vmul.f32 %v8575_v7, %v1081_v58  ;;  %vm6683_vm9 = vcmp.lt.s32.totalorder %v1307_v29, 15  ;;  %v1246_v62 = vsel %vm1218_vm2, %v1209_v2, %v6343_v5  ;;  %v8629_v11 = vld [vmem:[#allocation103_spill] sm:$0xff] }
 0x2a7   : > { %8566 = vst [vmem:[#allocation33_spill] sm:$0xff] %v6636_v52  ;;  %8567 = vst [vmem:[#allocation131_spill] sm:$0xff] %v6645_v39  ;;  %v1351_v39 = vmul.f32 %v8571_v54, %v1081_v58  ;;  %v8574_v52 = vld [vmem:[#allocation66_spill] sm:$0xff]  ;;  %v1430_v24 = vadd.f32 %v6485_v59, %v1350_v33  ;;  %v1478_v0 = vmul.f32 %v8366_v35, %v1222_v40  ;;  %4286 = vpow2.f32 %v3765_v47 }
 0x2a8   : > { %8572 = vst [vmem:[#allocation51_spill] sm:$0xff] %v6674_v44  ;;  %v1951_v56 = vmul.f32 %v8574_v52, %v1089_v8  ;;  %v8578_v8 = vld [vmem:[#allocation54_spill] sm:$0xff]  ;;  %v1278_v63 = vsel %vm1254_vm3, %v1246_v62, 0.0  ;;  %v1839_v7 = vmul.f32 %v5610_v49, %v1222_v40  ;;  %v1134_v59 = vsel %vm1110_vm1, %v1105_v37, 0.0 }
 0x2a9   : > { %v1712_v52 = vmul.f32 %v8578_v8, %v1081_v58  ;;  %v1431_v33 = vadd.f32 %v6443_v4, %v1351_v39  ;;  %v1479_v29 = vmul.f32 %v8368_v41, %v1278_v63  ;;  %v1510_v44 = vadd.f32 %v1478_v0, %v1430_v24  ;;  %v8579_v37 = vld [vmem:[#allocation58_spill] sm:$0xff] }
 0x2aa   : > { %v1791_v2 = vadd.f32 %v6493_v14, %v1711_v28  ;;  %v2031_v35 = vadd.f32 %v6501_v9, %v1951_v56  ;;  %v1840_v47 = vmul.f32 %v5614_v18, %v1278_v63  ;;  %v2079_v58 = vmul.f32 %v5849_v1, %v1222_v40  ;;  %v6707_v39 = vpop.permute.xlu1 %1214 }
 0x2ab   : > { %v2032_v62 = vadd.f32 %v6459_v17, %v1952_v30  ;;  %v1511_v10 = vadd.f32 %v1479_v29, %v1431_v33  ;;  %v1542_v49 = vrot.slane %v1510_v44, 7  ;;  %v2080_v8 = vmul.f32 %v8450_v45, %v1278_v63  ;;  %8580 = vst [vmem:[#allocation58_spill] sm:$0xff] %v6707_v39  ;;  %v8582_v30 = vld [vmem:[#allocation95_spill] sm:$0xff] }
 0x2ac   : > { %v1348_v57 = vmul.f32 %v8579_v37, %v1134_v59  ;;  %v1792_v4 = vadd.f32 %v6451_v48, %v1712_v52  ;;  %v1871_v24 = vadd.f32 %v1839_v7, %v1791_v2  ;;  %v2111_v14 = vadd.f32 %v2079_v58, %v2031_v35 }
 0x2ad   : > { %v6709_v28 = vpop.eup %4284  ;;  %v1543_v9 = vrot.slane %v1511_v10, 7  ;;  %v8581_v56 = vrot.slane %v6255_v21, 7  ;;  %v8583_v17 = vrot.slane %v8582_v30, 7  ;;  %v2112_v63 = vadd.f32 %v2080_v8, %v2032_v62  ;;  %v8587_v8 = vld [vmem:[#allocation59_spill] sm:$0xff]  ;;  %v8609_v21 = vld [vmem:[#allocation93_spill] sm:$0xff] }
 0x2ae   : > { %v1872_v52 = vadd.f32 %v1840_v47, %v1792_v4  ;;  %v2143_v35 = vrot.slane %v2111_v14, 1  ;;  %v8584_v40 = vrot.slane %v6273_v6, 7  ;;  %v8585_v44 = vrot.slane %v6230_v12, 7 }
 0x2af   : > { %v1575_v1 = vsel %vm1560_vm4, %v1542_v49, %v8581_v56  ;;  %v1579_v45 = vsel %vm1560_vm4, %v8583_v17, %v1542_v49  ;;  %v2144_v49 = vrot.slane %v2112_v63, 1  ;;  %v1709_v29 = vmul.f32 %v8587_v8, %v1134_v59  ;;  %v6763_v17 = vpop.permute.xlu1 %1182 }
 0x2b0   : > { %v1635_v48 = vsel %vm6650_vm8, %v1575_v1, 0.0  ;;  %v1903_v7 = vadd.f32 %v1871_v24, %v1579_v45  ;;  %v1576_v10 = vsel %vm1560_vm4, %v1543_v9, %v8584_v40  ;;  %v1580_v0 = vsel %vm1560_vm4, %v8585_v44, %v1543_v9  ;;  %8593 = vst [vmem:[#allocation132_spill] sm:$0xff] %v6763_v17  ;;  %v8594_v45 = vld [vmem:[#allocation60_spill] sm:$0xff]  ;;  %v8595_v40 = vld [vmem:[#allocation79_spill] sm:$0xff] }
 0x2b1   : > { %v6730_v33 = vadd.f32 %v6295_v13, %v1635_v48  ;;  %v1636_v2 = vsel %vm6650_vm8, %v1576_v10, 0.0  ;;  %v1904_v47 = vadd.f32 %v1872_v52, %v1580_v0  ;;  %v8588_v58 = vrot.slane %v6314_v32, 1  ;;  %v4287_v56 = vpop.eup %4286  ;;  %v8596_v44 = vld [vmem:[#allocation67_spill] sm:$0xff] }
 0x2b2   : > { %v1097_v12 = vsel %vm1077_vm0, %v6246_v31, %v6582_v23  ;;  %v6744_v13 = vadd.f32 %v6298_v22, %v1636_v2  ;;  %v8590_v4 = vrot.slane %v6317_v27, 1  ;;  %v8591_v14 = vrot.slane %v6233_v16, 1  ;;  %v1177_v16 = vpop.permute.xlu0 %1176 }
 0x2b3   : > { %8586 = vst [vmem:[#allocation95_spill] sm:$0xff] %v6730_v33  ;;  %v2176_v62 = vsel %vm2161_vm5, %v2143_v35, %v8588_v58  ;;  %v8592_v1 = vrot.slane %v6237_v3, 1  ;;  %v1949_v63 = vmul.f32 %v8594_v45, %v1134_v59  ;;  %v6772_v10 = vsel %vm1077_vm0, %v8595_v40, %v6609_v20  ;;  %v8599_v20 = vld [vmem:[#allocation78_spill] sm:$0xff]  ;;  %v8600_v58 = vld [vmem:[#allocation71_spill] sm:$0xff]  ;;  %v8612_v33 = vld [vmem:[#allocation44_spill] sm:$0xff] }
 0x2b4   : > { %8589 = vst [vmem:[#allocation59_spill] sm:$0xff] %v6744_v13  ;;  %v2177_v24 = vsel %vm2161_vm5, %v2144_v49, %v8590_v4  ;;  %v2180_v9 = vsel %vm2161_vm5, %v8591_v14, %v2143_v35  ;;  %v2232_v31 = vsel %vm6683_vm9, %v2176_v62, 0.0  ;;  %v1349_v0 = vmul.f32 %v8596_v44, %v1097_v12  ;;  %v8602_v14 = vld [vmem:[#allocation81_spill] sm:$0xff]  ;;  %v6801_v35 = vpop.permute.xlu1 %1027 }
 0x2b5   : > { %v2181_v30 = vsel %vm2161_vm5, %v8592_v1, %v2144_v49  ;;  %v2233_v22 = vsel %vm6683_vm9, %v2177_v24, 0.0  ;;  %v2260_v23 = vadd.f32 %v2180_v9, %v6277_v38  ;;  %v2264_v52 = vadd.f32 %v2232_v31, %v1903_v7  ;;  %v8598_v7 = vld [vmem:[#allocation69_spill] sm:$0xff]  ;;  %v8603_v1 = vld [vmem:[#allocation82_spill] sm:$0xff] }
 0x2b6   : > { %v2261_v48 = vadd.f32 %v2181_v30, %v6287_v55  ;;  %v2265_v3 = vadd.f32 %v2233_v22, %v1904_v47  ;;  %v6777_v38 = vsel %vm1110_vm1, %v6667_v61, 0.0  ;;  %4288 = vrcp.f32 %v6658_v53  ;;  %v8597_v55 = vld [vmem:[#allocation90_spill] sm:$0xff]  ;;  %v8601_v53 = vld [vmem:[#allocation91_spill] sm:$0xff]  ;;  %v8604_v31 = vld [vmem:[#allocation41_spill] sm:$0xff] }
 0x2b7   : > { %v1710_v49 = vmul.f32 %v8598_v7, %v1097_v12  ;;  %v1230_v2 = vsel %vm1218_vm2, %v1177_v16, %v6409_v51  ;;  %4290 = vpow2.f32 %v6661_v15  ;;  %v1428_v47 = vadd.f32 %v8599_v20, %v1348_v57  ;;  %v8605_v51 = vld [vmem:[#allocation37_spill] sm:$0xff]  ;;  %v8607_v15 = vld [vmem:[#allocation83_spill] sm:$0xff]  ;;  %v8608_v20 = vld [vmem:[#allocation84_spill] sm:$0xff] }
 0x2b8   : > { %v1950_v62 = vmul.f32 %v8600_v58, %v1097_v12  ;;  %v1238_v61 = vsel %vm1218_vm2, %v6343_v5, %v1177_v16  ;;  %v2436_v4 = vadd.f32 1.0, %v4287_v56  ;;  %v1789_v24 = vadd.f32 %v8601_v53, %v1709_v29  ;;  %v8610_v16 = vld [vmem:[#allocation85_spill] sm:$0xff] }
 0x2b9   : > { %v2029_v9 = vadd.f32 %v8602_v14, %v1949_v63  ;;  %v1476_v30 = vmul.f32 %v8603_v1, %v1238_v61  ;;  %v1429_v22 = vadd.f32 %v8604_v31, %v1349_v0  ;;  %v6797_v59 = vadd.f32 %v8605_v51, %v2260_v23  ;;  %v8611_v53 = vld [vmem:[#allocation77_spill] sm:$0xff]  ;;  %v6806_v14 = vpop.permute.xlu0 %1023  ;;  %v8613_v31 = vld [vmem:[#allocation102_spill] sm:$0xff] }
 0x2ba   : > { %v1477_v57 = vmul.f32 %v8607_v15, %v1230_v2  ;;  %v1837_v12 = vmul.f32 %v8608_v20, %v1238_v61  ;;  %v1790_v5 = vadd.f32 %v8609_v21, %v1710_v49  ;;  %v1838_v29 = vmul.f32 %v8610_v16, %v1230_v2  ;;  %v8615_v15 = vld [vmem:[#allocation113_spill] sm:$0xff] }
 0x2bb   : > { %8606 = vst [vmem:[#allocation60_spill] sm:$0xff] %v6797_v59  ;;  %v1508_v56 = vadd.f32 %v1476_v30, %v1428_v47  ;;  %v2077_v63 = vmul.f32 %v8611_v53, %v1238_v61  ;;  %v2030_v0 = vadd.f32 %v8612_v33, %v1950_v62  ;;  %v6810_v23 = vadd.f32 %v8613_v31, %v2261_v48  ;;  %v8619_v62 = vld [vmem:[#allocation100_spill] sm:$0xff] }
 0x2bc   : > { %v1509_v32 = vadd.f32 %v1477_v57, %v1429_v22  ;;  %v2078_v13 = vmul.f32 %v8615_v15, %v1230_v2  ;;  %v6814_v27 = vadd.f32 %v8605_v51, %v2264_v52  ;;  %v6817_v21 = vadd.f32 %v8613_v31, %v2265_v3 }
 0x2bd   : > { %8614 = vst [vmem:[#allocation79_spill] sm:$0xff] %v6810_v23  ;;  %v1540_v49 = vrot.slane %v1508_v56, 7  ;;  %v2109_v47 = vadd.f32 %v2077_v63, %v2029_v9  ;;  %v3771_v61 = vmul.f32 -1.442695, %v6797_v59  ;;  %v1869_v16 = vadd.f32 %v1837_v12, %v1789_v24  ;;  %v6838_v56 = vpop.permute.xlu1 %1059 }
 0x2be   : > { %8616 = vst [vmem:[#allocation78_spill] sm:$0xff] %v6814_v27  ;;  %8617 = vst [vmem:[#allocation91_spill] sm:$0xff] %v6817_v21  ;;  %v1541_v30 = vrot.slane %v1509_v32, 7  ;;  %v2110_v6 = vadd.f32 %v2078_v13, %v2030_v0  ;;  %v8618_v33 = vrot.slane %v6374_v36, 7  ;;  %v8620_v2 = vrot.slane %v8619_v62, 7  ;;  %v8622_v32 = vld [vmem:[#allocation101_spill] sm:$0xff] }
 0x2bf   : > { %v1870_v22 = vadd.f32 %v1838_v29, %v1790_v5  ;;  %v2141_v3 = vrot.slane %v2109_v47, 1  ;;  %v8621_v15 = vrot.slane %v6382_v50, 7  ;;  %v8623_v24 = vrot.slane %v8622_v32, 7  ;;  %v8624_v0 = vld [vmem:[#allocation109_spill] sm:$0xff]  ;;  %v8632_v32 = vld [vmem:[#allocation104_spill] sm:$0xff] }
 0x2c0   : > { %v1573_v48 = vsel %vm1560_vm4, %v1540_v49, %v8618_v33  ;;  %v1577_v52 = vsel %vm1560_vm4, %v8620_v2, %v1540_v49  ;;  %v6840_v63 = vpop.eup %4288  ;;  %v2142_v47 = vrot.slane %v2110_v6, 1  ;;  %v6847_v33 = vpop.permute.xlu0 %1055  ;;  %v8626_v2 = vld [vmem:[#allocation110_spill] sm:$0xff]  ;;  %v8631_v6 = vrot.slane %v8597_v55, 1  ;;  %v8645_v50 = vld [vmem:[#allocation56_spill] sm:$0xff] }
 0x2c1   : > { %v1574_v9 = vsel %vm1560_vm4, %v1541_v30, %v8621_v15  ;;  %v1578_v13 = vsel %vm1560_vm4, %v8623_v24, %v1541_v30  ;;  %v1633_v57 = vsel %vm6650_vm8, %v1573_v48, 0.0  ;;  %v1901_v12 = vadd.f32 %v1869_v16, %v1577_v52  ;;  %v4291_v62 = vpop.eup %4290 }
 0x2c2   : > { %v1634_v5 = vsel %vm6650_vm8, %v1574_v9, 0.0  ;;  %v1902_v29 = vadd.f32 %v1870_v22, %v1578_v13  ;;  %v6845_v49 = vadd.f32 %v8624_v0, %v1633_v57  ;;  %v3772_v30 = vmul.f32 -1.442695, %v6810_v23 }
 0x2c3   : > { %v6851_v48 = vadd.f32 %v8626_v2, %v1634_v5  ;;  %v8628_v16 = vrot.slane %v6416_v26, 1  ;;  %v8630_v15 = vrot.slane %v8629_v11, 1  ;;  %v2175_v9 = vsel %vm2161_vm5, %v2142_v47, %v8631_v6  ;;  %v8634_v5 = vld [vmem:[#allocation107_spill] sm:$0xff] }
 0x2c4   : > { %8625 = vst [vmem:[#allocation81_spill] sm:$0xff] %v6845_v49  ;;  %v8633_v24 = vrot.slane %v8632_v32, 1  ;;  %v3775_v2 = vmul.f32 -1.442695, %v6814_v27  ;;  %v2438_v6 = vadd.f32 1.0, %v6709_v28  ;;  %4292 = vrcp.f32 %v2436_v4  ;;  %v6896_v28 = vpop.permute.xlu0 %1164 }
 0x2c5   : > { %8627 = vst [vmem:[#allocation82_spill] sm:$0xff] %v6851_v48  ;;  %v2174_v52 = vsel %vm2161_vm5, %v2141_v3, %v8628_v16  ;;  %v2178_v22 = vsel %vm2161_vm5, %v8630_v15, %v2141_v3  ;;  %v2231_v3 = vsel %vm6683_vm9, %v2175_v9, 0.0  ;;  %v8635_v16 = vld [vmem:[#allocation99_spill] sm:$0xff]  ;;  %v1249_v9 = vsel %vm1218_vm2, %v6707_v39, %v8636_v19 }
 0x2c6   : > { %v2179_v13 = vsel %vm2161_vm5, %v8633_v24, %v2142_v47  ;;  %v2230_v57 = vsel %vm6683_vm9, %v2174_v52, 0.0  ;;  %v6872_v0 = vadd.f32 %v2178_v22, %v8634_v5  ;;  %v3776_v47 = vmul.f32 -1.442695, %v6817_v21  ;;  %v8639_v24 = vld [vmem:[#allocation48_spill] sm:$0xff]  ;;  %v8641_v5 = vld [vmem:[#allocation98_spill] sm:$0xff] }
 0x2c7   : > { %v6878_v11 = vadd.f32 %v2179_v13, %v8635_v16  ;;  %v6880_v15 = vadd.f32 %v2230_v57, %v1901_v12  ;;  %v6884_v32 = vadd.f32 %v2231_v3, %v1902_v29  ;;  %v1360_v52 = vmul.f32 %v8579_v37, %v6777_v38  ;;  %v6894_v12 = vpop.permute.xlu1 %1168  ;;  %v8640_v57 = vld [vmem:[#allocation51_spill] sm:$0xff]  ;;  %v8691_v16 = vld [vmem:[#allocation92_spill] sm:$0xff] }
 0x2c8   : > { %v1363_v22 = vmul.f32 %v8571_v54, %v6772_v10  ;;  %4294 = vpow2.f32 %v3771_v61  ;;  %v6900_v4 = vmul.f32 %v8520_v46, %v8565_v25  ;;  %v6904_v29 = vmul.f32 %v8511_v34, %v8560_v42  ;;  %v8642_v34 = vld [vmem:[#allocation54_spill] sm:$0xff]  ;;  %v1072_v49 = vpop.permute.xlu0 %1071 }
 0x2c9   : > { %4296 = vpow2.f32 %v3772_v30  ;;  %v6908_v13 = vmul.f32 %v8639_v24, %v8565_v25  ;;  %v1721_v61 = vmul.f32 %v8587_v8, %v6777_v38  ;;  %v1092_v30 = vsel %vm1077_vm0, %v8640_v57, %v8595_v40  ;;  %v8643_v25 = vld [vmem:[#allocation55_spill] sm:$0xff]  ;;  %v8646_v40 = vld [vmem:[#allocation25_spill] sm:$0xff] }
 0x2ca   : > { %8637 = vst [vmem:[#allocation41_spill] sm:$0xff] %v6900_v4  ;;  %8638 = vst [vmem:[#allocation84_spill] sm:$0xff] %v6904_v29  ;;  %v1100_v46 = vsel %vm1077_vm0, %v8641_v5, %v8640_v57  ;;  %4298 = vpow2.f32 %v3775_v2  ;;  %v1724_v42 = vmul.f32 %v8642_v34, %v6772_v10  ;;  %v1964_v3 = vmul.f32 %v8643_v25, %v6772_v10  ;;  %v8647_v10 = vld [vmem:[#allocation61_spill] sm:$0xff]  ;;  %v8649_v29 = vld [vmem:[#allocation63_spill] sm:$0xff] }
 0x2cb   : > { %v1290_v24 = vsel %vm1254_vm3, %v1249_v9, 0.0  ;;  %4300 = vpow2.f32 %v3776_v47  ;;  %v1440_v48 = vadd.f32 %v8645_v50, %v1360_v52  ;;  %v1443_v55 = vadd.f32 %v8646_v40, %v1363_v22  ;;  %v8648_v47 = vld [vmem:[#allocation62_spill] sm:$0xff]  ;;  %v6940_v22 = vld [vmem:[#allocation7 + $0x38] ss:$0 sm:$0xff] }
 0x2cc   : > { %4302 = vrcp.f32 %v2438_v6  ;;  %v1241_v2 = vsel %vm1218_vm2, %v8636_v19, %v6763_v17  ;;  %v1961_v57 = vmul.f32 %v8594_v45, %v6777_v38  ;;  %v1361_v5 = vmul.f32 %v8596_v44, %v1100_v46  ;;  %v6943_v19 = vpop.permute.xlu1 %1200  ;;  %v8650_v17 = vld [vmem:[#allocation123_spill] sm:$0xff]  ;;  %v8651_v4 = vld [vmem:[#allocation124_spill] sm:$0xff] }
 0x2cd   : > { %v1362_v39 = vmul.f32 %v8647_v10, %v1092_v30  ;;  %v1722_v9 = vmul.f32 %v8598_v7, %v1100_v46  ;;  %v1801_v6 = vadd.f32 %v8648_v47, %v1721_v61  ;;  %v1723_v50 = vmul.f32 %v8649_v29, %v1092_v30  ;;  %v8652_v47 = vld [vmem:[#allocation66_spill] sm:$0xff]  ;;  %v8653_v29 = vld [vmem:[#allocation88_spill] sm:$0xff]  ;;  %v8654_v7 = vld [vmem:[#allocation89_spill] sm:$0xff] }
 0x2ce   : > { %v1491_v52 = vmul.f32 %v8368_v41, %v1290_v24  ;;  %v2092_v40 = vmul.f32 %v6940_v22, %v1290_v24  ;;  %v1804_v38 = vadd.f32 %v8650_v17, %v1724_v42  ;;  %v2044_v27 = vadd.f32 %v8651_v4, %v1964_v3  ;;  %v4293_v59 = vpop.eup %4292  ;;  %v8656_v17 = vld [vmem:[#allocation30_spill] sm:$0xff] }
 0x2cf   : > { %v1962_v21 = vmul.f32 %v8600_v58, %v1100_v46  ;;  %v1488_v51 = vmul.f32 %v8603_v1, %v1241_v2  ;;  %v2437_v61 = vadd.f32 1.0, %v4291_v62  ;;  %v1963_v26 = vmul.f32 %v8652_v47, %v1092_v30  ;;  %v8658_v46 = vld [vmem:[#allocation80_spill] sm:$0xff]  ;;  %v8660_v62 = vld [vmem:[#allocation27_spill] sm:$0xff] }
 0x2d0   : > { %v1852_v36 = vmul.f32 %v5614_v18, %v1290_v24  ;;  %v2089_v23 = vmul.f32 %v8611_v53, %v1241_v2  ;;  %v2041_v31 = vadd.f32 %v8653_v29, %v1961_v57  ;;  %v6954_v44 = vadd.f32 %v8654_v7, %v1361_v5  ;;  %v8662_v29 = vld [vmem:[#allocation108_spill] sm:$0xff] }
 0x2d1   : > { %v6957_v4 = vadd.f32 %v8656_v17, %v1362_v39  ;;  %v6960_v42 = vadd.f32 %v8658_v46, %v1722_v9  ;;  %v6963_v58 = vadd.f32 %v8660_v62, %v1723_v50  ;;  %v6965_v30 = vadd.f32 %v1491_v52, %v1443_v55  ;;  %v8664_v57 = vld [vmem:[#allocation24_spill] sm:$0xff]  ;;  %v1076_v46 = vpop.permute.xlu1 %1075 }
 0x2d2   : > { %8655 = vst [vmem:[#allocation93_spill] sm:$0xff] %v6954_v44  ;;  %v4295_v3 = vpop.eup %4294  ;;  %v6967_v24 = vadd.f32 %v2092_v40, %v2044_v27  ;;  %v1107_v53 = vsel %vm1077_vm0, %v1072_v49, %v6806_v14  ;;  %v6974_v39 = vmul.f32 %v6840_v63, %v8662_v29  ;;  %v6977_v5 = vadd.f32 %v8664_v57, %v1962_v21  ;;  %v8666_v27 = vld [vmem:[#allocation122_spill] sm:$0xff]  ;;  %v8668_v29 = vld [vmem:[#allocation47_spill] sm:$0xff] }
 0x2d3   : > { %8657 = vst [vmem:[#allocation77_spill] sm:$0xff] %v6957_v4  ;;  %8659 = vst [vmem:[#allocation44_spill] sm:$0xff] %v6960_v42  ;;  %v4297_v7 = vpop.eup %4296  ;;  %v6979_v9 = vadd.f32 %v1488_v51, %v1440_v48  ;;  %v1849_v50 = vmul.f32 %v8608_v20, %v1241_v2  ;;  %4304 = vrcp.f32 %v2437_v61  ;;  %v6983_v52 = vadd.f32 %v8666_v27, %v1963_v26  ;;  %v6998_v26 = vpop.permute.xlu0 %1039  ;;  %v8673_v61 = vld [vmem:[#allocation127_spill] sm:$0xff]  ;;  %v8678_v57 = vld [vmem:[#allocation22_spill] sm:$0xff] }
 0x2d4   : > { %8661 = vst [vmem:[#allocation113_spill] sm:$0xff] %v6963_v58  ;;  %8663 = vst [vmem:[#allocation100_spill] sm:$0xff] %v6974_v39  ;;  %v4299_v55 = vpop.eup %4298  ;;  %v6985_v40 = vadd.f32 %v1852_v36, %v1804_v38  ;;  %v6987_v17 = vadd.f32 %v2089_v23, %v2041_v31  ;;  %v2442_v63 = vadd.f32 1.0, %v4295_v3  ;;  %v6991_v21 = vadd.f32 %v8668_v29, %v6872_v0  ;;  %v8671_v38 = vld [vmem:[#allocation32_spill] sm:$0xff] }
 0x2d5   : > { %8665 = vst [vmem:[#allocation101_spill] sm:$0xff] %v6977_v5  ;;  %8667 = vst [vmem:[#allocation109_spill] sm:$0xff] %v6983_v52  ;;  %v4301_v62 = vpop.eup %4300  ;;  %v1083_v51 = vsel %vm1077_vm0, %v6847_v33, %v1072_v49  ;;  %v1142_v48 = vsel %vm1110_vm1, %v1107_v53, 0.0  ;;  %v2443_v2 = vadd.f32 1.0, %v4297_v7  ;;  %v7006_v0 = vadd.f32 %v8671_v38, %v6878_v11  ;;  %v8681_v52 = vld [vmem:[#allocation38_spill] sm:$0xff]  ;;  %v8682_v5 = vld [vmem:[#allocation39_spill] sm:$0xff] }
 0x2d6   : > { %8669 = vst [vmem:[#allocation110_spill] sm:$0xff] %v6991_v21  ;;  %v7000_v36 = vpop.eup %4302  ;;  %v7009_v3 = vmul.f32 %v4293_v59, %v8673_v61  ;;  %v2446_v49 = vadd.f32 1.0, %v4299_v55  ;;  %v7012_v53 = vadd.f32 %v1849_v50, %v1801_v6  ;;  %v2447_v27 = vadd.f32 1.0, %v4301_v62  ;;  %v7029_v62 = vpop.permute.xlu1 %1043 }
 0x2d7   : > { %8670 = vst [vmem:[#allocation103_spill] sm:$0xff] %v7000_v36  ;;  %8672 = vst [vmem:[#allocation104_spill] sm:$0xff] %v7006_v0  ;;  %v7016_v36 = vadd.f32 %v8668_v29, %v6880_v15  ;;  %v1356_v31 = vmul.f32 %v8579_v37, %v1142_v48  ;;  %v1359_v7 = vmul.f32 %v8571_v54, %v1083_v51  ;;  %4306 = vrcp.f32 %v2442_v63  ;;  %v7036_v11 = vpop.permute.xlu0 %1212 }
 0x2d8   : > { %8674 = vst [vmem:[#allocation107_spill] sm:$0xff] %v7009_v3  ;;  %v7023_v59 = vadd.f32 %v8671_v38, %v6884_v32  ;;  %v3769_v55 = vmul.f32 -1.442695, %v6991_v21  ;;  %4308 = vrcp.f32 %v2443_v2  ;;  %v3770_v6 = vmul.f32 -1.442695, %v7006_v0  ;;  %8677 = vst [vmem:[#allocation48_spill] sm:$0xff] %v7036_v11 }
 0x2d9   : > { %8675 = vst [vmem:[#allocation99_spill] sm:$0xff] %v7016_v36  ;;  %v1717_v50 = vmul.f32 %v8587_v8, %v1142_v48  ;;  %v1720_v15 = vmul.f32 %v8642_v34, %v1083_v51  ;;  %4310 = vrcp.f32 %v2446_v49  ;;  %v1957_v63 = vmul.f32 %v8594_v45, %v1142_v48  ;;  %v8679_v3 = vld [vmem:[#allocation26_spill] sm:$0xff] }
 0x2da   : > { %8676 = vst [vmem:[#allocation43_spill] sm:$0xff] %v7023_v59  ;;  %v1960_v61 = vmul.f32 %v8643_v25, %v1083_v51  ;;  %v1109_v32 = vsel %vm1077_vm0, %v1076_v46, %v6801_v35  ;;  %4312 = vrcp.f32 %v2447_v27  ;;  %v3773_v2 = vmul.f32 -1.442695, %v7016_v36  ;;  %v8695_v36 = vld [vmem:[#allocation96_spill] sm:$0xff] }
 0x2db   : > { %v7040_v23 = vadd.f32 %v8678_v57, %v1356_v31  ;;  %v1439_v58 = vadd.f32 %v8679_v3, %v1359_v7  ;;  %4314 = vpow2.f32 %v3769_v55  ;;  %v3774_v49 = vmul.f32 -1.442695, %v7023_v59  ;;  %v8683_v57 = vld [vmem:[#allocation29_spill] sm:$0xff] }
 0x2dc   : > { %v1085_v51 = vsel %vm1077_vm0, %v6838_v56, %v1076_v46  ;;  %v1301_v48 = vadd.s32 40, %v5011_v43  ;;  %v7051_v27 = vadd.f32 %v8681_v52, %v1717_v50  ;;  %v1800_v39 = vadd.f32 %v8682_v5, %v1720_v15  ;;  %v8684_v7 = vld [vmem:[#allocation49_spill] sm:$0xff] }
 0x2dd   : > { %v7048_v42 = vpop.eup %4304  ;;  %v1150_v31 = vsel %vm1110_vm1, %v1109_v32, 0.0  ;;  %v1248_v3 = vsel %vm1218_vm2, %v7036_v11, %v6896_v28  ;;  %4316 = vpow2.f32 %v3770_v6  ;;  %v7061_v46 = vadd.f32 %v8683_v57, %v1957_v63  ;;  %v1217_v6 = vpop.permute.xlu1 %1216  ;;  %v8690_v11 = vld [vmem:[#allocation46_spill] sm:$0xff] }
 0x2de   : > { %8680 = vst [vmem:[#allocation51_spill] sm:$0xff] %v7048_v42  ;;  %v2040_v55 = vadd.f32 %v8684_v7, %v1960_v61  ;;  %v1286_v52 = vsel %vm1254_vm3, %v1248_v3, 0.0  ;;  %4318 = vpow2.f32 %v3773_v2  ;;  %v7070_v5 = vsel %vm1077_vm0, %v7029_v62, %v6838_v56 }
 0x2df   : > { %v1487_v50 = vmul.f32 %v8368_v41, %v1286_v52  ;;  %v2088_v15 = vmul.f32 %v6940_v22, %v1286_v52  ;;  %v1364_v63 = vmul.f32 %v8579_v37, %v1150_v31  ;;  %v1367_v32 = vmul.f32 %v8571_v54, %v1085_v51 }
 0x2e0   : > { %v1309_v61 = vand.u32 15, %v1301_v48  ;;  %v1848_v57 = vmul.f32 %v5614_v18, %v1286_v52  ;;  %4320 = vpow2.f32 %v3774_v49  ;;  %v1725_v2 = vmul.f32 %v8587_v8, %v1150_v31 }
 0x2e1   : > { %v1519_v3 = vadd.f32 %v1487_v50, %v1439_v58  ;;  %v2120_v7 = vadd.f32 %v2088_v15, %v2040_v55  ;;  %v7078_v42 = vpop.eup %4306  ;;  %v1728_v56 = vmul.f32 %v8642_v34, %v1085_v51  ;;  %v1366_v4 = vmul.f32 %v8647_v10, %v7070_v5  ;;  %v8689_v15 = vld [vmem:[#allocation74_spill] sm:$0xff] }
 0x2e2   : > { %v7086_v37 = vsel %vm1218_vm2, %v6943_v19, %v1217_v6  ;;  %v1250_v54 = vsel %vm1218_vm2, %v1217_v6, %v6894_v12  ;;  %v7091_v49 = vpop.eup %4308  ;;  %v1302_v8 = vadd.s32 48, %v5011_v43  ;;  %vm7098_vm10 = vcmp.lt.s32.totalorder %v1309_v61, 15 }
 0x2e3   : > { %8685 = vst [vmem:[#allocation98_spill] sm:$0xff] %v7086_v37  ;;  %v1551_v58 = vrot.slane %v1519_v3, 7  ;;  %v2152_v48 = vrot.slane %v2120_v7, 1  ;;  %v1294_v34 = vsel %vm1254_vm3, %v1250_v54, 0.0  ;;  %v7096_v55 = vpop.eup %4310  ;;  %v1880_v50 = vadd.f32 %v1848_v57, %v1800_v39 }
 0x2e4   : > { %8686 = vst [vmem:[#allocation54_spill] sm:$0xff] %v7096_v55  ;;  %v1494_v44 = vmul.f32 %v8689_v15, %v7086_v37  ;;  %v1495_v6 = vmul.f32 %v8368_v41, %v1294_v34  ;;  %v7105_v0 = vpop.eup %4312  ;;  %v1447_v3 = vadd.f32 %v8690_v11, %v1367_v32  ;;  %v1965_v7 = vmul.f32 %v8594_v45, %v1150_v31  ;;  %v8694_v15 = vld [vmem:[#allocation33_spill] sm:$0xff]  ;;  %v8698_v55 = vld [vmem:[#allocation31_spill] sm:$0xff] }
 0x2e5   : > { %v8692_v54 = vrot.slane %v8691_v16, 7  ;;  %v8693_v21 = vrot.slane %v6967_v24, 1  ;;  %v7117_v57 = vpop.eup %4314  ;;  %v1446_v41 = vadd.f32 %v8694_v15, %v1366_v4  ;;  %v8696_v38 = vrot.slane %v8695_v36, 1 }
 0x2e6   : > { %v1304_v11 = vand.u32 15, %v5011_v43  ;;  %v1968_v31 = vmul.f32 %v8643_v25, %v1085_v51  ;;  %v1310_v32 = vand.u32 15, %v1302_v8  ;;  %v7132_v4 = vadd.f32 %v8698_v55, %v1364_v63 }
 0x2e7   : > { %v1572_v61 = vsel %vm1560_vm4, %v8692_v54, %v1551_v58  ;;  %v2169_v39 = vsel %vm2161_vm5, %v2152_v48, %v8693_v21  ;;  %v2173_v45 = vsel %vm2161_vm5, %v8696_v38, %v2152_v48  ;;  %v8697_v54 = vld [vmem:[#allocation59_spill] sm:$0xff]  ;;  %v7129_v29 = vpop.eup %4316  ;;  %v7134_v36 = vadd.f32 %v1494_v44, %v1446_v41  ;;  %v8700_v48 = vld [vmem:[#allocation125_spill] sm:$0xff]  ;;  %v8705_v41 = vld [vmem:[#allocation130_spill] sm:$0xff] }
 0x2e8   : > { %v1912_v59 = vadd.f32 %v1880_v50, %v1572_v61  ;;  %v2241_v16 = vsel %vm7098_vm10, %v2169_v39, 0.0  ;;  %v2269_v21 = vadd.f32 %v2173_v45, %v8697_v54  ;;  %v1527_v15 = vadd.f32 %v1495_v6, %v1447_v3  ;;  %v7136_v38 = vpop.eup %4318  ;;  %v8703_v6 = vld [vmem:[#allocation129_spill] sm:$0xff]  ;;  %v8704_v39 = vld [vmem:[#allocation126_spill] sm:$0xff] }
 0x2e9   : > { %8699 = vst [vmem:[#allocation55_spill] sm:$0xff] %v7134_v36  ;;  %v7139_v61 = vadd.f32 %v8700_v48, %v1725_v2  ;;  %v1091_v25 = vsel %vm1077_vm0, %v6998_v26, %v6847_v33  ;;  %v1967_v51 = vmul.f32 %v8652_v47, %v7070_v5  ;;  %v1856_v63 = vmul.f32 %v5614_v18, %v1294_v34 }
 0x2ea   : > { %v2273_v50 = vadd.f32 %v2241_v16, %v1912_v59  ;;  %v1303_v59 = vadd.s32 56, %v5011_v43  ;;  %vm7149_vm11 = vcmp.ge.s32.totalorder %v1304_v11, 1  ;;  %v8212_v8 = vrot.slane %v7134_v36, 7  ;;  %v7154_v55 = vpop.eup %4320  ;;  %v8715_v36 = vld [vmem:[#allocation70_spill] sm:$0xff] }
 0x2eb   : > { %v1559_v2 = vrot.slane %v1527_v15, 7  ;;  %v1808_v3 = vadd.f32 %v8703_v6, %v1728_v56  ;;  %v7158_v33 = vadd.f32 %v8704_v39, %v1965_v7  ;;  %v2048_v45 = vadd.f32 %v8705_v41, %v1968_v31  ;;  %v8710_v56 = vld [vmem:[#allocation64_spill] sm:$0xff]  ;;  %v7179_v31 = vld [vmem:[#allocation7 + $0x30] ss:$0 sm:$0xff] }
 0x2ec   : > { %vm7161_vm12 = vcmp.ge.s32.totalorder %v1310_v32, 1  ;;  %v8708_v11 = vrot.slane %v6965_v30, 7  ;;  %v8711_v48 = vrot.slane %v8710_v56, 7  ;;  %8712 = vst [vmem:[#allocation73_spill] sm:$0xff] %v7179_v31  ;;  %v2095_v32 = vmul.f32 %v7179_v31, %v7086_v37  ;;  %v8719_v37 = vld [vmem:[#allocation114_spill] sm:$0xff] }
 0x2ed   : > { %v1099_v30 = vsel %vm1077_vm0, %v6806_v14, %v6998_v26  ;;  %v2047_v56 = vadd.f32 %v6908_v13, %v1967_v51  ;;  %v8716_v26 = vld [vmem:[#allocation72_spill] sm:$0xff]  ;;  %v7214_v51 = vmul.f32 %v8647_v10, %v1091_v25  ;;  %vm2692_vm1 = vcmask 1043459  }
 0x2ee   : > { %v1568_v16 = vsel %vm1560_vm4, %v1551_v58, %v8708_v11  ;;  %v8709_v54 = vmov %v8708_v11  ;;  %v1591_v7 = vsel %vm1560_vm4, %v8212_v8, %v8711_v48  ;;  %v8713_v58 = vld [vmem:[#allocation68_spill] sm:$0xff]  ;;  %v1888_v11 = vadd.f32 %v1856_v63, %v1808_v3 }
 0x2ef   : > { %v1564_v15 = vsel %vm1560_vm4, %v8709_v54, %v1559_v2  ;;  %v8714_v6 = vrot.slane %v8713_v58, 7  ;;  %v1619_v41 = vsel %vm7149_vm11, %v1591_v7, 0.0  ;;  %v7193_v54 = vpop.permute.xlu0 %1180  ;;  %v1311_v48 = vand.u32 15, %v1303_v59  ;;  %v8717_v7 = vld [vmem:[#allocation67_spill] sm:$0xff]  ;;  %v8810_v10 = vld [vmem:[#allocation100_spill] sm:$0xff] }
 0x2f0   : > { %v1891_v31 = vadd.f32 %v8715_v36, %v1619_v41  ;;  %v1644_v14 = vsel %vm7161_vm12, %v1568_v16, 0.0  ;;  %v1357_v63 = vmul.f32 %v8717_v7, %v1099_v30  ;;  %v7204_v3 = vadd.f32 %v2095_v32, %v2047_v56  ;;  %v8723_v41 = vld [vmem:[#allocation63_spill] sm:$0xff]  ;;  %v8726_v56 = vld [vmem:[#allocation60_spill] sm:$0xff] }
 0x2f1   : > { %v1592_v39 = vsel %vm1560_vm4, %v1559_v2, %v8714_v6  ;;  %v1920_v2 = vadd.f32 %v1888_v11, %v1564_v15  ;;  %v2096_v6 = vmul.f32 %v6940_v22, %v1294_v34  ;;  %v1240_v36 = vsel %vm1218_vm2, %v6896_v28, %v7193_v54  ;;  %v8721_v34 = vld [vmem:[#allocation69_spill] sm:$0xff] }
 0x2f2   : > { %v1620_v8 = vsel %vm7149_vm11, %v1592_v39, 0.0  ;;  %8718 = vst [vmem:[#allocation56_spill] sm:$0xff] %v7204_v3  ;;  %v7207_v13 = vadd.f32 %v8719_v37, %v1891_v31  ;;  %v1484_v22 = vmul.f32 %v8603_v1, %v1240_v36  ;;  %v7219_v15 = vmul.f32 %v8721_v34, %v1099_v30  ;;  %v8722_v37 = vld [vmem:[#allocation102_spill] sm:$0xff] }
 0x2f3   : > { %v1892_v58 = vadd.f32 %v8716_v26, %v1620_v8  ;;  %v2128_v59 = vadd.f32 %v2096_v6, %v2048_v45  ;;  %v8720_v8 = vld [vmem:[#allocation115_spill] sm:$0xff]  ;;  %v1916_v32 = vadd.f32 %v6985_v40, %v1644_v14  ;;  %v7223_v31 = vadd.f32 %v8722_v37, %v2269_v21 }
 0x2f4   : > { %v8217_v39 = vrot.slane %v7204_v3, 1  ;;  %v7227_v28 = vmul.f32 %v8723_v41, %v1091_v25  ;;  %vm7229_vm13 = vcmp.lt.s32.totalorder %v1311_v48, 15  ;;  %v1516_v11 = vadd.f32 %v1484_v22, %v7040_v23  ;;  %v8728_v21 = vld [vmem:[#allocation75_spill] sm:$0xff] }
 0x2f5   : > { %v2253_v16 = vadd.f32 %v8720_v8, %v1892_v58  ;;  %v2160_v45 = vrot.slane %v2128_v59, 1  ;;  %v7236_v26 = vmul.f32 %v7078_v42, %v8726_v56  ;;  %v7239_v40 = vadd.f32 %v8722_v37, %v2273_v50  ;;  %v8730_v6 = vld [vmem:[#allocation71_spill] sm:$0xff]  ;;  %v8732_v8 = vld [vmem:[#allocation112_spill] sm:$0xff] }
 0x2f6   : > { %v8729_v14 = vrot.slane %v8728_v21, 1  ;;  %v1845_v58 = vmul.f32 %v8608_v20, %v1240_v36  ;;  %v7251_v59 = vmul.f32 %v8730_v6, %v1099_v30  ;;  %v7257_v42 = vsel %vm1077_vm0, %v6801_v35, %v7029_v62  ;;  %v1185_v62 = vpop.permute.xlu1 %1184  ;;  %v8734_v3 = vld [vmem:[#allocation79_spill] sm:$0xff] }
 0x2f7   : > { %8727 = vst [vmem:[#allocation25_spill] sm:$0xff] %v7236_v26  ;;  %v8731_v23 = vrot.slane %v6967_v24, 1  ;;  %v8733_v22 = vrot.slane %v8732_v8, 1  ;;  %v7268_v21 = vmul.f32 %v8652_v47, %v1091_v25  ;;  %v3780_v30 = vmul.f32 -1.442695, %v7223_v31 }
 0x2f8   : > { %v7247_v48 = vsel %vm2161_vm5, %v8217_v39, %v8729_v14  ;;  %v7276_v24 = vadd.f32 %v8722_v37, %v2253_v16  ;;  %v4436_v8 = vld [vmem:[#allocation7 + $0x20] ss:$0 sm:$0xff]  ;;  %v1365_v47 = vmul.f32 %v8717_v7, %v7257_v42  ;;  %v3784_v25 = vmul.f32 -1.442695, %v7239_v40 }
 0x2f9   : > { %v2165_v50 = vsel %vm2161_vm5, %v8731_v23, %v2160_v45  ;;  %v2193_v56 = vsel %vm2161_vm5, %v2160_v45, %v8733_v22  ;;  %v1548_v23 = vrot.slane %v1516_v11, 7  ;;  %v2085_v26 = vmul.f32 %v4436_v8, %v1240_v36 }
 0x2fa   : > { %v2249_v14 = vsel %vm7229_vm13, %v2193_v56, 0.0  ;;  %v2277_v35 = vadd.f32 %v2165_v50, %v1916_v32  ;;  %v7280_v45 = vmul.f32 %v7091_v49, %v8734_v3  ;;  %v1877_v32 = vadd.f32 %v1845_v58, %v7051_v27  ;;  %v8737_v50 = vld [vmem:[#allocation105_spill] sm:$0xff]  ;;  %v8739_v27 = vld [vmem:[#allocation52_spill] sm:$0xff] }
 0x2fb   : > { %v7273_v39 = vadd.f32 %v2249_v14, %v1920_v2  ;;  %v8736_v2 = vrot.slane %v6979_v9, 7  ;;  %v8738_v11 = vrot.slane %v8737_v50, 7  ;;  %v7297_v49 = vsel %vm1218_vm2, %v1185_v62, %v6943_v19 }
 0x2fc   : > { %8735 = vst [vmem:[#allocation61_spill] sm:$0xff] %v7280_v45  ;;  %v1242_v7 = vsel %vm1218_vm2, %v6894_v12, %v1185_v62  ;;  %v7303_v3 = vadd.f32 %v8739_v27, %v1357_v63  ;;  %4322 = vpow2.f32 %v3780_v30  ;;  %v2440_v56 = vadd.f32 1.0, %v7117_v57  ;;  %v8741_v63 = vld [vmem:[#allocation83_spill] sm:$0xff]  ;;  %v8746_v27 = vld [vmem:[#allocation37_spill] sm:$0xff] }
 0x2fd   : > { %v1565_v16 = vsel %vm1560_vm4, %v1548_v23, %v8736_v2  ;;  %v1569_v36 = vsel %vm1560_vm4, %v8738_v11, %v1548_v23  ;;  %v3764_v14 = vmul.f32 -1.442695, %v7276_v24  ;;  %v2117_v19 = vadd.f32 %v2085_v26, %v7061_v46  ;;  %v8740_v2 = vld [vmem:[#allocation57_spill] sm:$0xff] }
 0x2fe   : > { %v1641_v58 = vsel %vm7161_vm12, %v1565_v16, 0.0  ;;  %v1909_v22 = vadd.f32 %v1877_v32, %v1569_v36  ;;  %v1445_v50 = vadd.f32 %v8740_v2, %v1365_v47  ;;  %4324 = vpow2.f32 %v3784_v25  ;;  %v8743_v25 = vld [vmem:[#allocation111_spill] sm:$0xff] }
 0x2ff   : > { %v1913_v23 = vadd.f32 %v7012_v53, %v1641_v58  ;;  %v1492_v12 = vmul.f32 %v8603_v1, %v1242_v7  ;;  %v1493_v30 = vmul.f32 %v8741_v63, %v7297_v49  ;;  %v2444_v62 = vadd.f32 1.0, %v7136_v38 }
 0x300   : > { %v2149_v16 = vrot.slane %v2117_v19, 1  ;;  %v1853_v32 = vmul.f32 %v8608_v20, %v1242_v7  ;;  %v2093_v57 = vmul.f32 %v4436_v8, %v1242_v7  ;;  %v2441_v11 = vadd.f32 1.0, %v7129_v29 }
 0x301   : > { %v2445_v53 = vadd.f32 1.0, %v7154_v55  ;;  %v1524_v46 = vadd.f32 %v1492_v12, %v7132_v4  ;;  %v7320_v26 = vadd.f32 %v1493_v30, %v1445_v50  ;;  %4326 = vpow2.f32 %v3764_v14  ;;  %v8745_v55 = vld [vmem:[#allocation81_spill] sm:$0xff]  ;;  %v8749_v50 = vld [vmem:[#allocation116_spill] sm:$0xff] }
 0x302   : > { %v8742_v1 = vrot.slane %v6987_v17, 1  ;;  %v8744_v38 = vrot.slane %v8743_v25, 1  ;;  %v2125_v8 = vadd.f32 %v2093_v57, %v7158_v33  ;;  %4328 = vrcp.f32 %v2444_v62  ;;  %v8753_v62 = vld [vmem:[#allocation91_spill] sm:$0xff] }
 0x303   : > { %v1556_v36 = vrot.slane %v1524_v46, 7  ;;  %v8220_v7 = vrot.slane %v7320_v26, 7  ;;  %v7337_v58 = vadd.f32 %v8746_v27, %v7207_v13  ;;  %v1885_v19 = vadd.f32 %v1853_v32, %v7139_v61 }
 0x304   : > { %v2166_v47 = vsel %vm2161_vm5, %v2149_v16, %v8742_v1  ;;  %v2170_v20 = vsel %vm2161_vm5, %v8744_v38, %v2149_v16  ;;  %v8748_v2 = vrot.slane %v6979_v9, 7  ;;  %v8750_v12 = vrot.slane %v8749_v50, 7  ;;  %v8751_v16 = vld [vmem:[#allocation117_spill] sm:$0xff]  ;;  %v8756_v38 = vld [vmem:[#allocation118_spill] sm:$0xff] }
 0x305   : > { %v2238_v29 = vsel %vm7098_vm10, %v2166_v47, 0.0  ;;  %v2266_v4 = vadd.f32 %v2170_v20, %v8745_v55  ;;  %8747 = vst [vmem:[#allocation62_spill] sm:$0xff] %v7337_v58  ;;  %v8752_v57 = vrot.slane %v8751_v16, 7  ;;  %v7356_v61 = vmul.f32 %v7105_v0, %v8753_v62  ;;  %v8755_v9 = vld [vmem:[#allocation53_spill] sm:$0xff]  ;;  %v8757_v0 = vld [vmem:[#allocation78_spill] sm:$0xff] }
 0x306   : > { %v2270_v14 = vadd.f32 %v2238_v29, %v1909_v22  ;;  %v1561_v33 = vsel %vm1560_vm4, %v8748_v2, %v1556_v36  ;;  %v1589_v30 = vsel %vm1560_vm4, %v1556_v36, %v8750_v12  ;;  %v2157_v22 = vrot.slane %v2125_v8, 1  ;;  %v4323_v1 = vpop.eup %4322  ;;  %v8758_v29 = vld [vmem:[#allocation54_spill] sm:$0xff]  ;;  %v8760_v36 = vld [vmem:[#allocation119_spill] sm:$0xff] }
 0x307   : > { %v1590_v13 = vsel %vm1560_vm4, %v8220_v7, %v8752_v57  ;;  %8754 = vst [vmem:[#allocation123_spill] sm:$0xff] %v7356_v61  ;;  %4330 = vrcp.f32 %v2445_v53  ;;  %v7360_v32 = vadd.f32 %v8755_v9, %v7214_v51  ;;  %v1617_v46 = vsel %vm7149_vm11, %v1589_v30, 0.0  ;;  %v8759_v51 = vld [vmem:[#allocation23_spill] sm:$0xff]  ;;  %v8763_v30 = vld [vmem:[#allocation120_spill] sm:$0xff] }
 0x308   : > { %v7365_v47 = vadd.f32 %v8722_v37, %v2277_v35  ;;  %v1618_v25 = vsel %vm7149_vm11, %v1590_v13, 0.0  ;;  %v1889_v20 = vadd.f32 %v8756_v38, %v1617_v46  ;;  %v1917_v8 = vadd.f32 %v1885_v19, %v1561_v33  ;;  %v4325_v50 = vpop.eup %4324  ;;  %v8761_v35 = vld [vmem:[#allocation45_spill] sm:$0xff]  ;;  %v8765_v57 = vld [vmem:[#allocation87_spill] sm:$0xff] }
 0x309   : > { %v7372_v53 = vmul.f32 %v8758_v29, %v8757_v0  ;;  %4332 = vrcp.f32 %v2440_v56  ;;  %v7376_v55 = vadd.f32 %v8759_v51, %v7219_v15  ;;  %v1890_v2 = vadd.f32 %v8760_v36, %v1618_v25 }
 0x30a   : > { %4334 = vrcp.f32 %v2441_v11  ;;  %v7381_v44 = vadd.f32 %v8761_v35, %v7227_v28  ;;  %v3763_v12 = vmul.f32 -1.442695, %v7337_v58  ;;  %v8762_v19 = vrot.slane %v6987_v17, 1  ;;  %v8766_v17 = vld [vmem:[#allocation35_spill] sm:$0xff]  ;;  %v8799_v58 = vld [vmem:[#allocation94_spill] sm:$0xff] }
 0x30b   : > { %v2451_v56 = vadd.f32 1.0, %v4323_v1  ;;  %v7390_v15 = vadd.f32 %v8722_v37, %v7273_v39  ;;  %v8764_v16 = vrot.slane %v8763_v30, 1  ;;  %v2250_v28 = vadd.f32 %v8765_v57, %v1889_v20  ;;  %v4327_v39 = vpop.eup %4326  ;;  %v8767_v1 = vld [vmem:[#allocation47_spill] sm:$0xff]  ;;  %v8772_v57 = vld [vmem:[#allocation41_spill] sm:$0xff] }
 0x30c   : > { %v2162_v33 = vsel %vm2161_vm5, %v8762_v19, %v2157_v22  ;;  %v2609_v13 = vadd.f32 %v7356_v61, %v7280_v45  ;;  %v7401_v62 = vadd.f32 %v8766_v17, %v7251_v59  ;;  %v3788_v9 = vmul.f32 -1.442695, %v7365_v47  ;;  %v4329_v51 = vpop.eup %4328 }
 0x30d   : > { %v2190_v11 = vsel %vm2161_vm5, %v2157_v22, %v8764_v16  ;;  %v2455_v46 = vadd.f32 1.0, %v4325_v50  ;;  %v7407_v25 = vadd.f32 %v8767_v1, %v2266_v4  ;;  %v8768_v22 = vld [vmem:[#allocation86_spill] sm:$0xff]  ;;  %v2274_v20 = vadd.f32 %v2162_v33, %v1913_v23  ;;  %v8769_v4 = vld [vmem:[#allocation32_spill] sm:$0xff] }
 0x30e   : > { %v2246_v37 = vsel %vm7229_vm13, %v2190_v11, 0.0  ;;  %v2251_v38 = vadd.f32 %v8768_v22, %v1890_v2  ;;  %4336 = vpow2.f32 %v3763_v12  ;;  %v7411_v0 = vadd.f32 %v8767_v1, %v2270_v14 }
 0x30f   : > { %v2278_v29 = vadd.f32 %v2246_v37, %v1917_v8  ;;  %v7414_v59 = vadd.f32 %v8767_v1, %v2250_v28  ;;  %v1727_v36 = vmul.f32 %v8723_v41, %v7070_v5  ;;  %4338 = vrcp.f32 %v2451_v56  ;;  %v8771_v8 = vld [vmem:[#allocation42_spill] sm:$0xff]  ;;  %v1197_v41 = vpop.permute.xlu0 %1196 }
 0x310   : > { %v3792_v50 = vmul.f32 -1.442695, %v7390_v15  ;;  %v7420_v35 = vadd.f32 %v8769_v4, %v2251_v38  ;;  %v2610_v2 = vrot.slane %v2609_v13, 4  ;;  %4340 = vpow2.f32 %v3788_v9  ;;  %v8779_v38 = vld [vmem:[#allocation84_spill] sm:$0xff] }
 0x311   : > { %v2435_v23 = vadd.f32 1.0, %v4327_v39  ;;  %v3761_v14 = vmul.f32 -1.442695, %v7414_v59  ;;  %v4331_v12 = vpop.eup %4330  ;;  %v2039_v19 = vadd.f32 %v8771_v8, %v7268_v21  ;;  %v1966_v33 = vmul.f32 %v8730_v6, %v7257_v42  ;;  %v8775_v39 = vld [vmem:[#allocation99_spill] sm:$0xff] }
 0x312   : > { %8770 = vst [vmem:[#allocation124_spill] sm:$0xff] %v7420_v35  ;;  %4342 = vrcp.f32 %v2455_v46  ;;  %v3777_v5 = vmul.f32 -1.442695, %v7407_v25  ;;  %v1726_v56 = vmul.f32 %v8721_v34, %v7257_v42  ;;  %v3781_v30 = vmul.f32 -1.442695, %v7411_v0 }
 0x313   : > { %v7432_v16 = vadd.f32 %v8767_v1, %v2278_v29  ;;  %4344 = vpow2.f32 %v3761_v14  ;;  %v4333_v11 = vpop.eup %4332  ;;  %v1807_v28 = vadd.f32 %v8772_v57, %v1727_v36  ;;  %v7436_v21 = vadd.f32 %v8767_v1, %v2274_v20  ;;  %v7441_v34 = vld [vmem:[#allocation7 + $0x28] ss:$0 sm:$0xff]  ;;  %v8777_v1 = vld [vmem:[#allocation43_spill] sm:$0xff]  ;;  %v8787_v57 = vld [vmem:[#allocation76_spill] sm:$0xff] }
 0x314   : > { %4346 = vpow2.f32 %v3792_v50  ;;  %v3762_v6 = vmul.f32 -1.442695, %v7420_v35  ;;  %v4335_v17 = vpop.eup %4334  ;;  %v7439_v9 = vadd.f32 %v2610_v2, %v2609_v13  ;;  %v2094_v42 = vmul.f32 %v7441_v34, %v7297_v49  ;;  %v8780_v13 = vld [vmem:[#allocation110_spill] sm:$0xff]  ;;  %v8782_v50 = vld [vmem:[#allocation48_spill] sm:$0xff] }
 0x315   : > { %8773 = vst [vmem:[#allocation66_spill] sm:$0xff] %v7436_v21  ;;  %4348 = vrcp.f32 %v2435_v23  ;;  %v1232_v37 = vsel %vm1218_vm2, %v7193_v54, %v1197_v41  ;;  %v7449_v46 = vmul.f32 %v4329_v51, %v8775_v39  ;;  %v7452_v22 = vmul.f32 %v4331_v12, %v8777_v1  ;;  %v8783_v54 = vld [vmem:[#allocation104_spill] sm:$0xff]  ;;  %v1199_v12 = vpop.permute.xlu1 %1198 }
 0x316   : > { %8774 = vst [vmem:[#allocation88_spill] sm:$0xff] %v7439_v9  ;;  %v2046_v20 = vadd.f32 %v8779_v38, %v1966_v33  ;;  %4350 = vpow2.f32 %v3777_v5  ;;  %v7456_v29 = vmul.f32 %v4333_v11, %v8780_v13  ;;  %v3789_v36 = vmul.f32 -1.442695, %v7432_v16  ;;  %v8785_v5 = vld [vmem:[#allocation131_spill] sm:$0xff]  ;;  %v8786_v11 = vld [vmem:[#allocation98_spill] sm:$0xff]  ;;  %v8790_v38 = vld [vmem:[#allocation85_spill] sm:$0xff] }
 0x317   : > { %8776 = vst [vmem:[#allocation89_spill] sm:$0xff] %v7449_v46  ;;  %8778 = vst [vmem:[#allocation30_spill] sm:$0xff] %v7452_v22  ;;  %4352 = vpow2.f32 %v3781_v30  ;;  %v7462_v2 = vsel %vm1218_vm2, %v1197_v41, %v8782_v50  ;;  %v7465_v51 = vmul.f32 %v4335_v17, %v8783_v54  ;;  %v3785_v23 = vmul.f32 -1.442695, %v7436_v21  ;;  %v8791_v50 = vld [vmem:[#allocation73_spill] sm:$0xff] }
 0x318   : > { %8781 = vst [vmem:[#allocation80_spill] sm:$0xff] %v7456_v29  ;;  %4354 = vpow2.f32 %v3762_v6  ;;  %v2086_v14 = vmul.f32 %v7441_v34, %v1232_v37  ;;  %v4337_v8 = vpop.eup %4336  ;;  %v1806_v30 = vadd.f32 %v8785_v5, %v1726_v56  ;;  %v1855_v39 = vmul.f32 %v8787_v57, %v8786_v11  ;;  %v8793_v11 = vld [vmem:[#allocation132_spill] sm:$0xff]  ;;  %v8802_v21 = vld [vmem:[#allocation121_spill] sm:$0xff] }
 0x319   : > { %8784 = vst [vmem:[#allocation27_spill] sm:$0xff] %v7465_v51  ;;  %v7473_v1 = vadd.f32 %v2094_v42, %v2046_v20  ;;  %v4339_v41 = vpop.eup %4338  ;;  %v7477_v17 = vadd.f32 %v7449_v46, %v7456_v29  ;;  %v7481_v6 = vadd.f32 %v7452_v22, %v7465_v51  ;;  %v1854_v13 = vmul.f32 %v8790_v38, %v7297_v49  ;;  %v8792_v20 = vld [vmem:[#allocation58_spill] sm:$0xff] }
 0x31a   : > { %v2087_v56 = vmul.f32 %v8791_v50, %v7462_v2  ;;  %v4341_v54 = vpop.eup %4340  ;;  %4356 = vpow2.f32 %v3789_v36  ;;  %v7488_v42 = vadd.f32 %v2086_v14, %v7401_v62  ;;  %v7493_v5 = vsel %vm1218_vm2, %v1199_v12, %v8792_v20  ;;  %v8794_v62 = vld [vmem:[#allocation74_spill] sm:$0xff] }
 0x31b   : > { %8788 = vst [vmem:[#allocation108_spill] sm:$0xff] %v7477_v17  ;;  %8789 = vst [vmem:[#allocation24_spill] sm:$0xff] %v7481_v6  ;;  %v7498_v33 = vsel %vm1218_vm2, %v8793_v11, %v1199_v12  ;;  %4358 = vpow2.f32 %v3785_v23  ;;  %v1490_v14 = vmul.f32 %v8794_v62, %v7493_v5  ;;  %v1887_v61 = vadd.f32 %v1855_v39, %v1807_v28  ;;  %v8795_v23 = vld [vmem:[#allocation93_spill] sm:$0xff]  ;;  %v8796_v39 = vld [vmem:[#allocation90_spill] sm:$0xff] }
 0x31c   : > { %v4343_v7 = vpop.eup %4342  ;;  %v7500_v49 = vadd.f32 %v2087_v56, %v2039_v19  ;;  %v1489_v36 = vmul.f32 %v8741_v63, %v7498_v33  ;;  %v2434_v22 = vadd.f32 1.0, %v4337_v8  ;;  %v8237_v29 = vrot.slane %v7488_v42, 1 }
 0x31d   : > { %v4345_v46 = vpop.eup %4344  ;;  %v2459_v11 = vadd.f32 1.0, %v4341_v54  ;;  %v2248_v60 = vsel %vm7229_vm13, %v7247_v48, 0.0  ;;  %v1485_v28 = vmul.f32 %v8741_v63, %v1232_v37  ;;  %v1486_v8 = vmul.f32 %v8794_v62, %v7462_v2  ;;  %v8801_v63 = vld [vmem:[#allocation77_spill] sm:$0xff] }
 0x31e   : > { %v4347_v45 = vpop.eup %4346  ;;  %v1521_v56 = vadd.f32 %v1489_v36, %v8795_v23  ;;  %v8797_v20 = vrot.slane %v8796_v39, 1  ;;  %v1886_v19 = vadd.f32 %v1854_v13, %v1806_v30  ;;  %v2432_v36 = vadd.f32 1.0, %v4345_v46  ;;  %v8805_v46 = vld [vmem:[#allocation82_spill] sm:$0xff] }
 0x31f   : > { %v4349_v51 = vpop.eup %4348  ;;  %v8798_v23 = vrot.slane %v7500_v49, 1  ;;  %v8800_v9 = vrot.slane %v8799_v58, 1  ;;  %v1522_v35 = vadd.f32 %v1490_v14, %v8801_v63  ;;  %v2463_v17 = vadd.f32 1.0, %v4347_v45 }
 0x320   : > { %v2171_v54 = vsel %vm2161_vm5, %v8797_v20, %v8237_v29  ;;  %v4351_v12 = vpop.eup %4350  ;;  %4360 = vrcp.f32 %v2434_v22  ;;  %v8803_v39 = vrot.slane %v8802_v21, 1  ;;  %v8804_v6 = vrot.slane %v7473_v1, 1  ;;  %v8806_v29 = vld [vmem:[#allocation95_spill] sm:$0xff] }
 0x321   : > { %v2172_v48 = vsel %vm2161_vm5, %v8800_v9, %v8798_v23  ;;  %v4353_v62 = vpop.eup %4352  ;;  %v2267_v13 = vadd.f32 %v2171_v54, %v8805_v46  ;;  %4362 = vrcp.f32 %v2459_v11  ;;  %v1846_v58 = vmul.f32 %v8790_v38, %v1232_v37 }
 0x322   : > { %v2191_v30 = vsel %vm2161_vm5, %v8804_v6, %v8803_v39  ;;  %v4355_v20 = vpop.eup %4354  ;;  %v2268_v9 = vadd.f32 %v2172_v48, %v8806_v29  ;;  %v1553_v23 = vrot.slane %v1521_v56, 7  ;;  %v7540_v14 = vmul.f32 %v4349_v51, %v7276_v24 }
 0x323   : > { %v2448_v45 = vadd.f32 1.0, %v4351_v12  ;;  %v1517_v21 = vadd.f32 %v1485_v28, %v7303_v3  ;;  %v1518_v22 = vadd.f32 %v1486_v8, %v7360_v32  ;;  %v7545_v63 = vmul.f32 %v4339_v41, %v7223_v31  ;;  %v8808_v41 = vld [vmem:[#allocation55_spill] sm:$0xff] }
 0x324   : > { %v2452_v6 = vadd.f32 1.0, %v4353_v62  ;;  %4364 = vrcp.f32 %v2432_v36  ;;  %v1554_v54 = vrot.slane %v1522_v35, 7  ;;  %v4357_v11 = vpop.eup %4356  ;;  %v7548_v37 = vmul.f32 %v4343_v7, %v7239_v40 }
 0x325   : > { %4366 = vrcp.f32 %v2463_v17  ;;  %v2247_v24 = vsel %vm7229_vm13, %v2191_v30, 0.0  ;;  %v2433_v29 = vadd.f32 1.0, %v4355_v20  ;;  %v4359_v51 = vpop.eup %4358  ;;  %v1847_v3 = vmul.f32 %v8787_v57, %v7462_v2 }
 0x326   : > { %v1878_v32 = vadd.f32 %v1846_v58, %v7376_v55  ;;  %v8807_v31 = vrot.slane %v7320_v26, 7  ;;  %v8809_v12 = vrot.slane %v8808_v41, 7  ;;  %v7565_v7 = vadd.f32 %v8810_v10, %v7540_v14  ;;  %v8811_v58 = vld [vmem:[#allocation101_spill] sm:$0xff] }
 0x327   : > { %4368 = vrcp.f32 %v2448_v45  ;;  %v1549_v17 = vrot.slane %v1517_v21, 7  ;;  %v1550_v56 = vrot.slane %v1518_v22, 7  ;;  %v2460_v2 = vadd.f32 1.0, %v4357_v11  ;;  %v8815_v45 = vld [vmem:[#allocation97_spill] sm:$0xff]  ;;  %v8817_v11 = vld [vmem:[#allocation44_spill] sm:$0xff] }
 0x328   : > { %v1562_v35 = vsel %vm1560_vm4, %v1553_v23, %v8807_v31  ;;  %v1563_v40 = vsel %vm1560_vm4, %v1554_v54, %v8809_v12  ;;  %4370 = vrcp.f32 %v2452_v6  ;;  %v1850_v26 = vmul.f32 %v8790_v38, %v7498_v33  ;;  %v8818_v31 = vld [vmem:[#allocation113_spill] sm:$0xff] }
 0x329   : > { %v1851_v55 = vmul.f32 %v8787_v57, %v7493_v5  ;;  %v2456_v28 = vadd.f32 1.0, %v4359_v51  ;;  %4372 = vrcp.f32 %v2433_v29  ;;  %v1918_v8 = vadd.f32 %v1886_v19, %v1562_v35 }
 0x32a   : > { %v1919_v36 = vadd.f32 %v1887_v61, %v1563_v40  ;;  %v7572_v48 = vadd.f32 %v8769_v4, %v2267_v13  ;;  %v1566_v62 = vsel %vm1560_vm4, %v1549_v17, %v1553_v23  ;;  %v2090_v39 = vmul.f32 %v7441_v34, %v7498_v33  ;;  %v7580_v38 = vpop.eup %4360  ;;  %v8812_v34 = vld [vmem:[#allocation109_spill] sm:$0xff] }
 0x32b   : > { %v2091_v30 = vmul.f32 %v8791_v50, %v7493_v5  ;;  %v7583_v57 = vadd.f32 %v8746_v27, %v2268_v9  ;;  %v1567_v61 = vsel %vm1560_vm4, %v1550_v56, %v1554_v54  ;;  %v2279_v19 = vadd.f32 %v2247_v24, %v1918_v8  ;;  %v4363_v13 = vpop.eup %4362  ;;  %v8813_v50 = vld [vmem:[#allocation106_spill] sm:$0xff] }
 0x32c   : > { %v2280_v46 = vadd.f32 %v2248_v60, %v1919_v36  ;;  %4374 = vrcp.f32 %v2460_v2  ;;  %v1879_v20 = vadd.f32 %v1847_v3, %v7381_v44  ;;  %v2122_v23 = vadd.f32 %v2090_v39, %v8811_v58 }
 0x32d   : > { %v2123_v33 = vadd.f32 %v2091_v30, %v8812_v34  ;;  %4376 = vrcp.f32 %v2456_v28  ;;  %v8814_v5 = vrot.slane %v8813_v50, 7  ;;  %v8816_v21 = vrot.slane %v8815_v45, 7  ;;  %v8825_v34 = vld [vmem:[#allocation107_spill] sm:$0xff] }
 0x32e   : > { %v1642_v60 = vsel %vm7161_vm12, %v1566_v62, 0.0  ;;  %v4365_v6 = vpop.eup %4364  ;;  %v3778_v44 = vmul.f32 -1.442695, %v7572_v48  ;;  %v1643_v54 = vsel %vm7161_vm12, %v1567_v61, 0.0  ;;  %v1882_v24 = vadd.f32 %v1850_v26, %v8817_v11 }
 0x32f   : > { %v1570_v9 = vsel %vm1560_vm4, %v8814_v5, %v1549_v17  ;;  %v1571_v22 = vsel %vm1560_vm4, %v8816_v21, %v1550_v56  ;;  %v2154_v29 = vrot.slane %v2122_v23, 1  ;;  %v4367_v51 = vpop.eup %4366  ;;  %v3779_v3 = vmul.f32 -1.442695, %v7583_v57 }
 0x330   : > { %v1883_v35 = vadd.f32 %v1851_v55, %v8818_v31  ;;  %v2155_v41 = vrot.slane %v2123_v33, 1  ;;  %v7607_v12 = vadd.f32 %v8769_v4, %v2279_v19  ;;  %v7610_v40 = vmul.f32 %v4363_v13, %v7365_v47  ;;  %v8827_v31 = vld [vmem:[#allocation25_spill] sm:$0xff] }
 0x331   : > { %v1910_v17 = vadd.f32 %v1878_v32, %v1570_v9  ;;  %v1914_v56 = vadd.f32 %v1882_v24, %v1642_v60  ;;  %v7613_v18 = vadd.f32 %v8746_v27, %v2280_v46  ;;  %v4369_v2 = vpop.eup %4368  ;;  %v7616_v26 = vmul.f32 %v4365_v6, %v7414_v59 }
 0x332   : > { %v1915_v28 = vadd.f32 %v1883_v35, %v1643_v54  ;;  %v8819_v8 = vrot.slane %v7488_v42, 1  ;;  %v8820_v36 = vrot.slane %v7500_v49, 1  ;;  %v4371_v32 = vpop.eup %4370  ;;  %v7627_v62 = vmul.f32 %v4367_v51, %v7390_v15  ;;  %v8823_v15 = vld [vmem:[#allocation56_spill] sm:$0xff] }
 0x333   : > { %v1911_v39 = vadd.f32 %v1879_v20, %v1571_v22  ;;  %4378 = vpow2.f32 %v3778_v44  ;;  %v4373_v30 = vpop.eup %4372  ;;  %v3790_v49 = vmul.f32 -1.442695, %v7607_v12  ;;  %v8822_v19 = vrot.slane %v7473_v1, 1  ;;  %v8828_v35 = vld [vmem:[#allocation24_spill] sm:$0xff] }
 0x334   : > { %v2167_v55 = vsel %vm2161_vm5, %v8819_v8, %v2154_v29  ;;  %v2168_v47 = vsel %vm2161_vm5, %v8820_v36, %v2155_v41  ;;  %8821 = vst [vmem:[#allocation122_spill] sm:$0xff] %v7627_v62  ;;  %4380 = vpow2.f32 %v3779_v3  ;;  %v8824_v13 = vrot.slane %v8823_v15, 1  ;;  %v8831_v8 = vld [vmem:[#allocation108_spill] sm:$0xff]  ;;  %v8837_v15 = vld [vmem:[#allocation51_spill] sm:$0xff] }
 0x335   : > { %v2239_v59 = vsel %vm7098_vm10, %v2167_v55, 0.0  ;;  %v2240_v42 = vsel %vm7098_vm10, %v2168_v47, 0.0  ;;  %v2163_v46 = vsel %vm2161_vm5, %v2154_v29, %v8822_v19  ;;  %v3791_v23 = vmul.f32 -1.442695, %v7613_v18 }
 0x336   : > { %v2271_v61 = vadd.f32 %v2239_v59, %v1910_v17  ;;  %v2164_v20 = vsel %vm2161_vm5, %v2155_v41, %v8824_v13  ;;  %v2272_v58 = vadd.f32 %v2240_v42, %v1911_v39  ;;  %v2637_v52 = vadd.f32 %v7548_v37, %v7545_v63  ;;  %v4375_v1 = vpop.eup %4374  ;;  %v8834_v59 = vld [vmem:[#allocation88_spill] sm:$0xff] }
 0x337   : > { %v2560_v33 = vadd.f32 %v8825_v34, %v7616_v26  ;;  %v2275_v50 = vadd.f32 %v2163_v46, %v1914_v56  ;;  %v2276_v5 = vadd.f32 %v2164_v20, %v1915_v28  ;;  %v2582_v9 = vrot.slane %v7565_v7, 4  ;;  %v4377_v60 = vpop.eup %4376  ;;  %v8836_v46 = vld [vmem:[#allocation128_spill] sm:$0xff] }
 0x338   : > { %v2665_v45 = vadd.f32 %v7627_v62, %v7610_v40  ;;  %v7651_v21 = vadd.f32 %v8769_v4, %v2271_v61  ;;  %v7654_v22 = vadd.f32 %v8746_v27, %v2272_v58  ;;  %v7657_v6 = vmul.f32 %v4371_v32, %v7411_v0  ;;  %v8833_v32 = vld [vmem:[#allocation124_spill] sm:$0xff] }
 0x339   : > { %v7660_v44 = vadd.f32 %v8769_v4, %v2275_v50  ;;  %v7663_v54 = vadd.f32 %v8746_v27, %v2276_v5  ;;  %4382 = vpow2.f32 %v3790_v49  ;;  %v7666_v11 = vmul.f32 %v4369_v2, %v7407_v25  ;;  %v8838_v58 = vld [vmem:[#allocation28_spill] sm:$0xff] }
 0x33a   : > { %v3782_v24 = vmul.f32 -1.442695, %v7651_v21  ;;  %v3783_v29 = vmul.f32 -1.442695, %v7654_v22  ;;  %4384 = vpow2.f32 %v3791_v23  ;;  %v7671_v51 = vmul.f32 %v4375_v1, %v7432_v16  ;;  %v8829_v16 = vld [vmem:[#allocation66_spill] sm:$0xff]  ;;  %v8839_v23 = vld [vmem:[#allocation103_spill] sm:$0xff] }
 0x33b   : > { %v2561_v0 = vrot.slane %v2560_v33, 4  ;;  %v3786_v3 = vmul.f32 -1.442695, %v7660_v44  ;;  %v3787_v4 = vmul.f32 -1.442695, %v7663_v54  ;;  %v7677_v27 = vadd.f32 %v7372_v53, %v8827_v31 }
 0x33c   : > { %8826 = vst [vmem:[#allocation127_spill] sm:$0xff] %v7671_v51  ;;  %v2596_v25 = vrot.slane %v8828_v35, 4  ;;  %v2583_v41 = vadd.f32 %v2582_v9, %v7565_v7  ;;  %4386 = vpow2.f32 %v3782_v24  ;;  %v2638_v17 = vrot.slane %v2637_v52, 4 }
 0x33d   : > { %v2616_v56 = vadd.f32 %v7657_v6, %v7666_v11  ;;  %v7684_v2 = vmul.f32 %v4377_v60, %v8829_v16  ;;  %4388 = vpow2.f32 %v3783_v29  ;;  %v4379_v28 = vpop.eup %4378  ;;  %v8832_v55 = vrot.slane %v8831_v8, 4 }
 0x33e   : > { %v2666_v47 = vrot.slane %v2665_v45, 4  ;;  %v7690_v39 = vmul.f32 %v4373_v30, %v8833_v32  ;;  %4390 = vpow2.f32 %v3786_v3  ;;  %v4381_v7 = vpop.eup %4380  ;;  %v8835_v42 = vrot.slane %v8834_v59, 2 }
 0x33f   : > { %8830 = vst [vmem:[#allocation22_spill] sm:$0xff] %v7684_v2  ;;  %v2590_v36 = vadd.f32 %v8832_v55, %v8831_v8  ;;  %v2562_v49 = vadd.f32 %v2561_v0, %v2560_v33  ;;  %v2644_v19 = vadd.f32 %v7671_v51, %v7684_v2  ;;  %4392 = vpow2.f32 %v3787_v4  ;;  %v8840_v55 = vld [vmem:[#allocation62_spill] sm:$0xff] }
 0x340   : > { %v7695_v61 = vadd.f32 %v8835_v42, %v8834_v59  ;;  %v7701_v13 = vmul.f32 %v8837_v15, %v8836_v46  ;;  %v2597_v20 = vadd.f32 %v2596_v25, %v8828_v35  ;;  %v2584_v30 = vrot.slane %v2583_v41, 2 }
 0x341   : > { %v7706_v50 = vmul.f32 %v8839_v23, %v8838_v58  ;;  %v2639_v5 = vadd.f32 %v2638_v17, %v2637_v52  ;;  %v2617_v1 = vrot.slane %v2616_v56, 4  ;;  %v2449_v9 = vadd.f32 1.0, %v4379_v28 }
 0x342   : > { %v2591_v60 = vrot.slane %v2590_v36, 2  ;;  %v2667_v33 = vadd.f32 %v2666_v47, %v2665_v45  ;;  %v2567_v24 = vadd.f32 %v7701_v13, %v7690_v39  ;;  %v2450_v29 = vadd.f32 1.0, %v4381_v7 }
 0x343   : > { %v4383_v0 = vpop.eup %4382  ;;  %v2603_v3 = vrot.slane %v7677_v27, 4  ;;  %v2614_v4 = vrot.slane %v7695_v61, 1  ;;  %v2563_v35 = vrot.slane %v2562_v49, 2  ;;  %v2645_v25 = vrot.slane %v2644_v19, 4 }
 0x344   : > { %v4385_v16 = vpop.eup %4384  ;;  %v2598_v8 = vrot.slane %v2597_v20, 2  ;;  %v7714_v52 = vmul.f32 %v7580_v38, %v8840_v55  ;;  %v2585_v17 = vadd.f32 %v2584_v30, %v2583_v41  ;;  %v2461_v28 = vadd.f32 1.0, %v4383_v0 }
 0x345   : > { %v2640_v45 = vrot.slane %v2639_v5, 2  ;;  %v2618_v47 = vadd.f32 %v2617_v1, %v2616_v56  ;;  %4394 = vrcp.f32 %v2449_v9  ;;  %v2462_v32 = vadd.f32 1.0, %v4385_v16 }
 0x346   : > { %v4387_v7 = vpop.eup %4386  ;;  %v2592_v59 = vadd.f32 %v2591_v60, %v2590_v36  ;;  %v2668_v42 = vrot.slane %v2667_v33, 2  ;;  %v2568_v46 = vrot.slane %v2567_v24, 4  ;;  %4396 = vrcp.f32 %v2450_v29 }
 0x347   : > { %v4389_v15 = vpop.eup %4388  ;;  %v2564_v58 = vadd.f32 %v2563_v35, %v2562_v49  ;;  %v2646_v23 = vadd.f32 %v2645_v25, %v2644_v19  ;;  %v2453_v51 = vadd.f32 1.0, %v4387_v7  ;;  %4398 = vrcp.f32 %v2461_v28 }
 0x348   : > { %v4391_v62 = vpop.eup %4390  ;;  %v2586_v2 = vrot.slane %v2585_v17, 1  ;;  %v2454_v38 = vadd.f32 1.0, %v4389_v15  ;;  %4400 = vrcp.f32 %v2462_v32  ;;  %v2574_v41 = vadd.f32 %v7706_v50, %v7714_v52 }
 0x349   : > { %v4393_v56 = vpop.eup %4392  ;;  %v2641_v30 = vadd.f32 %v2640_v45, %v2639_v5  ;;  %v2619_v1 = vrot.slane %v2618_v47, 2  ;;  %v2457_v9 = vadd.f32 1.0, %v4391_v62  ;;  %4402 = vrcp.f32 %v2453_v51 }
 0x34a   : > { %v2669_v36 = vadd.f32 %v2668_v42, %v2667_v33  ;;  %v2569_v60 = vadd.f32 %v2568_v46, %v2567_v24  ;;  %v2458_v29 = vadd.f32 1.0, %v4393_v56  ;;  %4404 = vrcp.f32 %v2454_v38 }
 0x34b   : > { %v2647_v49 = vrot.slane %v2646_v23, 2  ;;  %4406 = vrcp.f32 %v2457_v9  ;;  %v2565_v19 = vrot.slane %v2564_v58, 1  ;;  %v2604_v0 = vadd.f32 %v2603_v3, %v7677_v27 }
 0x34c   : > { %v7719_v35 = vadd.f32 %v2586_v2, %v2585_v17  ;;  %4408 = vrcp.f32 %v2458_v29  ;;  %v2575_v25 = vrot.slane %v2574_v41, 4  ;;  %v2593_v16 = vrot.slane %v2592_v59, 1 }
 0x34d   : > { %v2642_v55 = vrot.slane %v2641_v30, 1  ;;  %v2620_v28 = vadd.f32 %v2619_v1, %v2618_v47  ;;  %v7722_v62 = vadd.f32 %v2614_v4, %v7695_v61  ;;  %v2599_v51 = vadd.f32 %v2598_v8, %v2597_v20 }
 0x34e   : > { %v2670_v5 = vrot.slane %v2669_v36, 1  ;;  %v2570_v33 = vrot.slane %v2569_v60, 2  ;;  %v2648_v45 = vadd.f32 %v2647_v49, %v2646_v23  ;;  %v7724_v32 = vadd.f32 %v2565_v19, %v2564_v58 }
 0x34f   : > { %v4395_v24 = vpop.eup %4394  ;;  %v2576_v27 = vadd.f32 %v2575_v25, %v2574_v41  ;;  %v2700_v2 = vsel %vm2688_vm14, %v7722_v62, %v7719_v35  ;;  %v7729_v17 = vadd.f32 %v2593_v16, %v2592_v59  ;;  %v7731_v47 = vadd.f32 %v2642_v55, %v2641_v30 }
 0x350   : > { %v4397_v7 = vpop.eup %4396  ;;  %v2621_v61 = vrot.slane %v2620_v28, 1  ;;  %v2600_v4 = vrot.slane %v2599_v51, 1  ;;  %v7733_v8 = vadd.f32 %v2670_v5, %v2669_v36  ;;  %v2571_v42 = vadd.f32 %v2570_v33, %v2569_v60 }
 0x351   : > { %v4399_v3 = vpop.eup %4398  ;;  %v2605_v46 = vrot.slane %v2604_v0, 2  ;;  %v2649_v58 = vrot.slane %v2648_v45, 1  ;;  %v2689_v23 = vsel %vm2688_vm14, %v7729_v17, %v7724_v32  ;;  %v2701_v59 = vsel %vm2690_vm15, %v7731_v47, %v2700_v2 }
 0x352   : > { %v4401_v20 = vpop.eup %4400  ;;  %v7741_v41 = vmul.f32 %v4395_v24, %v7572_v48  ;;  %v7747_v30 = vmul.f32 %v4399_v3, %v7607_v12  ;;  %v2577_v1 = vrot.slane %v2576_v27, 2  ;;  %v7750_v36 = vmul.f32 %v4397_v7, %v7583_v57 }
 0x353   : > { %v4403_v15 = vpop.eup %4402  ;;  %v7756_v29 = vmul.f32 %v4401_v20, %v7613_v18  ;;  %v7758_v49 = vadd.f32 %v2621_v61, %v2620_v28  ;;  %v2572_v19 = vrot.slane %v2571_v42, 1  ;;  %v2702_v57 = vsel %vm2692_vm1, %v7733_v8, %v2701_v59 }
 0x354   : > { %v4405_v38 = vpop.eup %4404  ;;  %v7744_v56 = vmul.f32 %v4403_v15, %v7651_v21  ;;  %8841 = vst [vmem:[#allocation26_spill] sm:$0xff] %v7747_v30  ;;  %v2578_v28 = vadd.f32 %v2577_v1, %v2576_v27  ;;  %v7776_v5 = vadd.f32 %v2649_v58, %v2648_v45  ;;  %v2601_v7 = vadd.f32 %v2600_v4, %v2599_v51 }
 0x355   : > { %v4407_v9 = vpop.eup %4406  ;;  %v7753_v60 = vmul.f32 %v4405_v38, %v7654_v22  ;;  %8842 = vst [vmem:[#allocation38_spill] sm:$0xff] %v7756_v29  ;;  %v2606_v22 = vadd.f32 %v2605_v46, %v2604_v0  ;;  %v2691_v16 = vsel %vm2690_vm15, %v7758_v49, %v2689_v23  ;;  %v2573_v61 = vadd.f32 %v2572_v19, %v2571_v42 }
 0x356   : > { %v4409_v48 = vpop.eup %4408  ;;  %v7761_v21 = vmul.f32 %v4407_v9, %v7660_v44  ;;  %v2623_v12 = vadd.f32 %v7744_v56, %v7741_v41  ;;  %v2693_v3 = vsel %vm2692_vm1, %v7776_v5, %v2691_v16  ;;  %v2579_v27 = vrot.slane %v2578_v28, 1 }
 0x357   : > { %v7768_v25 = vmul.f32 %v4409_v48, %v7663_v54  ;;  %v2630_v18 = vadd.f32 %v7753_v60, %v7750_v36  ;;  %v2704_v54 = vrot.slane %v2702_v57, 1  ;;  %v2607_v20 = vrot.slane %v2606_v22, 1 }
 0x358   : > { %v2624_v55 = vrot.slane %v2623_v12, 4  ;;  %v2651_v44 = vadd.f32 %v7747_v30, %v7761_v21  ;;  %v2705_v38 = vrot.slane %v2693_v3, 1  ;;  %v2580_v16 = vadd.f32 %v2579_v27, %v2578_v28 }
 0x359   : > { %8843 = vst [vmem:[#allocation39_spill] sm:$0xff] %v7768_v25  ;;  %v2658_v33 = vadd.f32 %v7756_v29, %v7768_v25  ;;  %v2631_v24 = vrot.slane %v2630_v18, 4  ;;  %v2736_v1 = vadd.f32 %v2704_v54, %v2601_v7  ;;  %v2608_v29 = vadd.f32 %v2607_v20, %v2606_v22 }
 0x35a   : > { %v2625_v0 = vadd.f32 %v2624_v55, %v2623_v12  ;;  %v2652_v2 = vrot.slane %v2651_v44, 4  ;;  %v2694_v12 = vsel %vm2688_vm14, %v2601_v7, %v2573_v61  ;;  %v2708_v19 = vrot.slane %v2702_v57, 2 }
 0x35b   : > { %v2632_v46 = vadd.f32 %v2631_v24, %v2630_v18  ;;  %v2659_v15 = vrot.slane %v2658_v33, 4  ;;  %v2737_v30 = vadd.f32 %v2705_v38, %v2608_v29  ;;  %v2732_v22 = vadd.f32 %v2702_v57, %v2573_v61 }
 0x35c   : > { %v2626_v23 = vrot.slane %v2625_v0, 2  ;;  %v2653_v59 = vadd.f32 %v2652_v2, %v2651_v44  ;;  %v2759_v44 = vrot.slane %v2736_v1, 7  ;;  %v2697_v7 = vsel %vm2688_vm14, %v2608_v29, %v2580_v16 }
 0x35d   : > { %v2633_v45 = vrot.slane %v2632_v46, 2  ;;  %v2660_v58 = vadd.f32 %v2659_v15, %v2658_v33  ;;  %v2709_v33 = vrot.slane %v2693_v3, 2  ;;  %v2713_v15 = vrot.slane %v2693_v3, 3 }
 0x35e   : > { %v2627_v9 = vadd.f32 %v2626_v23, %v2625_v0  ;;  %v2654_v48 = vrot.slane %v2653_v59, 2  ;;  %v2712_v23 = vrot.slane %v2702_v57, 3  ;;  %v2733_v57 = vadd.f32 %v2693_v3, %v2580_v16 }
 0x35f   : > { %v2634_v51 = vadd.f32 %v2633_v45, %v2632_v46  ;;  %v2661_v4 = vrot.slane %v2660_v58, 2  ;;  %v2760_v45 = vsel %vm2688_vm14, %v2759_v44, %v2732_v22 }
 0x360   : > { %v2655_v55 = vadd.f32 %v2654_v48, %v2653_v59  ;;  %v2628_v42 = vrot.slane %v2627_v9, 1 }
 0x361   : > { %v2635_v18 = vrot.slane %v2634_v51, 1  ;;  %v2662_v24 = vadd.f32 %v2661_v4, %v2660_v58  ;;  %v2765_v58 = vrot.slane %v2737_v30, 7 }
 0x362   : > { %v2629_v2 = vadd.f32 %v2628_v42, %v2627_v9  ;;  %v2656_v25 = vrot.slane %v2655_v55, 1 }
 0x363   : > { %v2636_v54 = vadd.f32 %v2635_v18, %v2634_v51  ;;  %v2663_v0 = vrot.slane %v2662_v24, 1  ;;  %v2766_v18 = vsel %vm2688_vm14, %v2765_v58, %v2733_v57 }
 0x364   : > { %v2657_v20 = vadd.f32 %v2656_v25, %v2655_v55  ;;  %v2695_v46 = vsel %vm2690_vm15, %v2629_v2, %v2694_v12  ;;  %v2740_v28 = vadd.f32 %v2708_v19, %v2629_v2 }
 0x365   : > { %v2664_v59 = vadd.f32 %v2663_v0, %v2662_v24  ;;  %v2698_v27 = vsel %vm2690_vm15, %v2636_v54, %v2697_v7  ;;  %v2741_v1 = vadd.f32 %v2709_v33, %v2636_v54 }
 0x366   : > { %v2696_v38 = vsel %vm2692_vm1, %v2657_v20, %v2695_v46  ;;  %v2744_v9 = vadd.f32 %v2712_v23, %v2657_v20  ;;  %v2761_v48 = vrot.slane %v2740_v28, 6 }
 0x367   : > { %v2699_v51 = vsel %vm2692_vm1, %v2664_v59, %v2698_v27  ;;  %v2745_v25 = vadd.f32 %v2713_v15, %v2664_v59  ;;  %v2706_v29 = vrot.slane %v2696_v38, 1  ;;  %v2710_v12 = vrot.slane %v2696_v38, 2 }
 0x368   : > { %v2762_v61 = vsel %vm2690_vm15, %v2761_v48, %v2760_v45  ;;  %v2763_v4 = vrot.slane %v2744_v9, 5  ;;  %v2714_v55 = vrot.slane %v2696_v38, 3  ;;  %v2767_v19 = vrot.slane %v2741_v1, 6 }
 0x369   : > { %v2703_v24 = vrot.slane %v2699_v51, 1  ;;  %v2707_v54 = vrot.slane %v2699_v51, 2  ;;  %v2769_v0 = vrot.slane %v2745_v25, 5  ;;  %v2711_v23 = vrot.slane %v2699_v51, 3 }
 0x36a   : > { %v2764_v42 = vsel %vm2692_vm1, %v2763_v4, %v2762_v61  ;;  %v2738_v3 = vadd.f32 %v2706_v29, %v7722_v62  ;;  %v2742_v16 = vadd.f32 %v2710_v12, %v7731_v47  ;;  %v2746_v46 = vadd.f32 %v2714_v55, %v7733_v8 }
 0x36b   : > { %v2778_v44 = vrot.slane %v2764_v42, 1  ;;  %v2781_v2 = vrot.slane %v2764_v42, 2  ;;  %v2784_v33 = vrot.slane %v2764_v42, 3  ;;  %v2734_v7 = vadd.f32 %v2696_v38, %v7719_v35 }
 0x36c   : > { %v2771_v28 = vrot.slane %v2738_v3, 7  ;;  %v2773_v59 = vrot.slane %v2742_v16, 6  ;;  %v2768_v27 = vsel %vm2690_vm15, %v2767_v19, %v2766_v18  ;;  %v2799_v45 = vadd.f32 %v2764_v42, %v2733_v57 }
 0x36d   : > { %v2802_v15 = vadd.f32 %v2778_v44, %v2737_v30  ;;  %v2805_v22 = vadd.f32 %v2781_v2, %v2741_v1  ;;  %v2808_v20 = vadd.f32 %v2784_v33, %v2745_v25  ;;  %v2735_v48 = vadd.f32 %v2703_v24, %v7729_v17 }
 0x36e   : > { %v2772_v62 = vsel %vm2688_vm14, %v2771_v28, %v2734_v7  ;;  %v2775_v47 = vrot.slane %v2746_v46, 5  ;;  %v2770_v30 = vsel %vm2692_vm1, %v2769_v0, %v2768_v27  ;;  %v2739_v57 = vadd.f32 %v2707_v54, %v7758_v49 }
 0x36f   : > { %v2828_v58 = vrot.slane %v2802_v15, 7  ;;  %v2830_v9 = vrot.slane %v2805_v22, 6  ;;  %v2832_v61 = vrot.slane %v2808_v20, 5  ;;  %v2774_v8 = vsel %vm2690_vm15, %v2773_v59, %v2772_v62 }
 0x370   : > { %v2779_v35 = vrot.slane %v2770_v30, 1  ;;  %v2782_v38 = vrot.slane %v2770_v30, 2  ;;  %v2743_v4 = vadd.f32 %v2711_v23, %v7776_v5  ;;  %v2776_v17 = vsel %vm2692_vm1, %v2775_v47, %v2774_v8 }
 0x371   : > { %v2829_v1 = vsel %vm2688_vm14, %v2828_v58, %v2799_v45  ;;  %v2777_v12 = vrot.slane %v2776_v17, 1  ;;  %v2780_v55 = vrot.slane %v2776_v17, 2  ;;  %v2783_v42 = vrot.slane %v2776_v17, 3 }
 0x372   : > { %v2831_v25 = vsel %vm2690_vm15, %v2830_v9, %v2829_v1  ;;  %v2731_v19 = vadd.f32 %v2699_v51, %v7724_v32  ;;  %v2803_v18 = vadd.f32 %v2779_v35, %v2738_v3  ;;  %v2806_v24 = vadd.f32 %v2782_v38, %v2742_v16 }
 0x373   : > { %v2833_v29 = vsel %vm2692_vm1, %v2832_v61, %v2831_v25  ;;  %v2801_v44 = vadd.f32 %v2777_v12, %v2735_v48  ;;  %v2804_v2 = vadd.f32 %v2780_v55, %v2739_v57  ;;  %v2807_v33 = vadd.f32 %v2783_v42, %v2743_v4 }
 0x374   : > { %2845 = vrot.lane.b32.xlu1 %v2833_v29, %s4676_s27  ;;  %v2785_v0 = vrot.slane %v2770_v30, 3  ;;  %v2834_v49 = vrot.slane %v2803_v18, 7  ;;  %v2798_v54 = vadd.f32 %v2776_v17, %v2731_v19  ;;  %v2800_v15 = vadd.f32 %v2770_v30, %v2734_v7  ;;  %v8844_v7 = vld [vmem:[#allocation50_spill] sm:$0xff] }
 0x375   : > { %v2822_v5 = vrot.slane %v2801_v44, 7  ;;  %v2824_v23 = vrot.slane %v2804_v2, 6  ;;  %v2836_v22 = vrot.slane %v2806_v24, 6  ;;  %v2826_v28 = vrot.slane %v2807_v33, 5 }
 0x376   : > { %v2809_v59 = vadd.f32 %v2785_v0, %v2746_v46  ;;  %v2835_v27 = vsel %vm2688_vm14, %v2834_v49, %v2800_v15  ;;  %vm2849_vm2 = vcmp.lt.s32.totalorder %v8844_v7, 64 }
 0x377   : > { %v2823_v20 = vsel %vm2688_vm14, %v2822_v5, %v2798_v54  ;;  %v2837_v3 = vsel %vm2690_vm15, %v2836_v22, %v2835_v27 }
 0x378   : > { %v2825_v32 = vsel %vm2690_vm15, %v2824_v23, %v2823_v20  ;;  %v2838_v16 = vrot.slane %v2809_v59, 5 }
 0x379   : > { %v2827_v51 = vsel %vm2692_vm1, %v2826_v28, %v2825_v32 }
 0x37a   : > { %2843 = vrot.lane.b32.xlu0 %v2827_v51, %s4676_s27  ;;  %v2839_v45 = vsel %vm2692_vm1, %v2838_v16, %v2837_v3 }
 0x37e   : > { %2847 = vrot.lane.b32.xlu0 %v2839_v45, %s4676_s27  ;;  %s8866_s27 = sld [smem:[#allocation134_spill]] }
 0x3e6   : > { %v2846_v9 = vpop.permute.xlu1 %2845 }
 0x3ec   : > { %v2844_v58 = vpop.permute.xlu0 %2843 }
 0x3f0   : > { %v2848_v48 = vpop.permute.xlu0 %2847 }
 0x3f1   : > { %v2850_v61 = vsel %vm2849_vm2, %v2846_v9, %v2848_v48  ;;  %v2851_v46 = vsel %vm2849_vm2, %v2848_v48, %v2844_v58  ;;  %v8845_v58 = vld [vmem:[#allocation18_spill] sm:$0xff] }
 0x3f2   : > { %v2854_v62 = vrot.slane %v2851_v46, 1  ;;  %v2855_v47 = vrot.slane %v2850_v61, 1  ;;  %v2856_v30 = vrot.slane %v2851_v46, 2  ;;  %v2857_v1 = vrot.slane %v2850_v61, 2 }
 0x3f3   : > { %v2858_v8 = vrot.slane %v2851_v46, 3  ;;  %v2859_v35 = vrot.slane %v2850_v61, 3  ;;  %v2868_v17 = vadd.f32 %v2851_v46, %v2798_v54  ;;  %v2869_v29 = vadd.f32 %v2850_v61, %v2800_v15  ;;  %v2919_v15 = vld [vmem:[%s8003_s5] sm:$0x3] }
 0x3f4   : > { %v2870_v38 = vadd.f32 %v2854_v62, %v2801_v44  ;;  %v2871_v25 = vadd.f32 %v2855_v47, %v2803_v18  ;;  %v2872_v57 = vadd.f32 %v2856_v30, %v2804_v2  ;;  %v2873_v4 = vadd.f32 %v2857_v1, %v2806_v24  ;;  %v8846_v61 = vld [vmem:[#allocation21_spill] sm:$0xff] }
 0x3f5   : > { %v2874_v12 = vadd.f32 %v2858_v8, %v2807_v33  ;;  %v2875_v55 = vadd.f32 %v2859_v35, %v2809_v59  ;;  %v2947_v9 = vrot.slane %v2919_v15, %v8845_v58  ;;  %v3034_v46 = vrot.slane %v2919_v15, %v8846_v61 }
 0x3f6   : > { %v2884_v42 = vrot.slane %v2870_v38, 7  ;;  %v2890_v19 = vrot.slane %v2871_v25, 7  ;;  %v2892_v0 = vrot.slane %v2873_v4, 6  ;;  %v2886_v49 = vrot.slane %v2872_v57, 6 }
 0x3f7   : > { %v2888_v23 = vrot.slane %v2874_v12, 5  ;;  %v2894_v20 = vrot.slane %v2875_v55, 5 }
 0x3f8   : > { %v2885_v5 = vsel %vm2688_vm14, %v2884_v42, %v2868_v17  ;;  %v2891_v22 = vsel %vm2688_vm14, %v2890_v19, %v2869_v29 }
 0x3f9   : > { %v2887_v28 = vsel %vm2690_vm15, %v2886_v49, %v2885_v5  ;;  %v2893_v18 = vsel %vm2690_vm15, %v2892_v0, %v2891_v22 }
 0x3fa   : > { %v2889_v24 = vsel %vm2692_vm1, %v2888_v23, %v2887_v28  ;;  %v2895_v44 = vsel %vm2692_vm1, %v2894_v20, %v2893_v18 }
 0x3fb   : > { %2898 = vrot.lane.b32.xlu1 %v2889_v24, %s4674_s15  ;;  %2900 = vrot.lane.b32.xlu0 %v2895_v44, %s4674_s15  ;;  %v4677_v24 = vmov 1   ;;  %v4678_v44 = vmov 0  }
 0x3fc   : > { %4152 = vset.pattern.permute.xlu1 %v4677_v24  ;;  %4151 = vset.pattern.permute.xlu0 %v4678_v44  ;;  %v3305_v44 = vld [vmem:[#allocation10 + $0xa8] sm:$0xff] }
 0x46d   : > { %v2899_v2 = vpop.permute.xlu1 %2898  ;;  %v2901_v33 = vpop.permute.xlu0 %2900 }
 0x46e   : > { %v2902_v54 = vsel %vm1077_vm0, %v2901_v33, %v2899_v2  ;;  %vm2963_vm0 = vcmask 257024   ;;  %v3793_v2 = vld [vmem:[%s8004_s6] ss:$0 sm:$0xff] }
 0x46f   : > { %v2904_v59 = vrot.slane %v2902_v54, 1  ;;  %v2905_v27 = vrot.slane %v2902_v54, 2  ;;  %v2906_v32 = vrot.slane %v2902_v54, 3  ;;  %v2911_v51 = vadd.f32 %v2902_v54, %v2868_v17 }
 0x471   : > { %v2912_v3 = vadd.f32 %v2904_v59, %v2870_v38  ;;  %v2913_v16 = vadd.f32 %v2905_v27, %v2872_v57  ;;  %v2914_v45 = vadd.f32 %v2906_v32, %v2874_v12  ;;  %v2915_v48 = vmul.f32 0.00390625, %v2911_v51 }
 0x473   : > { %v2916_v62 = vmul.f32 0.00390625, %v2912_v3  ;;  %v2917_v47 = vmul.f32 0.00390625, %v2913_v16  ;;  %v2918_v7 = vmul.f32 0.00390625, %v2914_v45  ;;  %v2948_v25 = vmul.f32 %v2947_v9, %v2915_v48 }
 0x474   : > { %v3035_v55 = vmul.f32 %v3034_v46, %v2915_v48 }
 0x475   : > { %v2949_v30 = vmul.f32 %v2947_v9, %v2916_v62  ;;  %v3036_v1 = vmul.f32 %v3034_v46, %v2916_v62  ;;  %v3037_v8 = vmul.f32 %v3034_v46, %v2917_v47  ;;  %v3038_v35 = vmul.f32 %v3034_v46, %v2918_v7 }
 0x476   : > { %v2950_v4 = vmul.f32 %v2947_v9, %v2917_v47  ;;  %v2951_v29 = vmul.f32 %v2947_v9, %v2918_v7  ;;  %v3300_v47 = vld [vmem:[#allocation10 + $0x80] sm:$0xff]  ;;  %v3301_v7 = vld [vmem:[#allocation10 + $0x88] sm:$0xff] }
 0x477   : > { %v3043_v17 = vrot.slane %v3036_v1, 7  ;;  %v3045_v38 = vrot.slane %v3037_v8, 6  ;;  %v2956_v57 = vrot.slane %v2949_v30, 7  ;;  %v3047_v19 = vrot.slane %v3038_v35, 5  ;;  %v3332_v30 = vld [vmem:[#allocation10 + $0x180] sm:$0xff]  ;;  %v3285_v35 = vld [vmem:[#allocation10 + $0x8] sm:$0xff] }
 0x478   : > { %v2958_v12 = vrot.slane %v2950_v4, 6  ;;  %v2960_v49 = vrot.slane %v2951_v29, 5  ;;  %v3987_v1 = vpack.c.bf16 %v3301_v7, %v3300_v47  ;;  %v3284_v8 = vld [vmem:[#allocation10] sm:$0xff]  ;;  %v3291_v47 = vld [vmem:[#allocation10 + $0x38] sm:$0xff] }
 0x479   : > { %v3044_v42 = vsel %vm2688_vm14, %v3043_v17, %v3035_v55  ;;  %v2957_v0 = vsel %vm2688_vm14, %v2956_v57, %v2948_v25  ;;  %v3333_v25 = vld [vmem:[#allocation10 + $0x188] sm:$0xff]  ;;  %v3989_v4 = vpack.c.bf16 %v3285_v35, %v3284_v8  ;;  %v3316_v55 = vld [vmem:[#allocation10 + $0x100] sm:$0xff]  ;;  %v3302_v57 = vld [vmem:[#allocation10 + $0x90] sm:$0xff] }
 0x47a   : > { %v3046_v5 = vsel %vm2690_vm15, %v3045_v38, %v3044_v42  ;;  %v2959_v23 = vsel %vm2690_vm15, %v2958_v12, %v2957_v0  ;;  %v4019_v29 = vpack.c.bf16 %v3333_v25, %v3332_v30  ;;  %v3317_v17 = vld [vmem:[#allocation10 + $0x108] sm:$0xff]  ;;  %3988 = vmatprep.subr.bf16.mxu0 %v3987_v1  ;;  %v3303_v12 = vld [vmem:[#allocation10 + $0x98] sm:$0xff]  ;;  %v3334_v42 = vld [vmem:[#allocation10 + $0x190] sm:$0xff] }
 0x47b   : > { %v3048_v22 = vsel %vm2692_vm1, %v3047_v19, %v3046_v5  ;;  %v2961_v20 = vsel %vm2692_vm1, %v2960_v49, %v2959_v23  ;;  %v4021_v38 = vpack.c.bf16 %v3317_v17, %v3316_v55  ;;  %3990 = vmatpush3.bf16.msra.mxu0 %v3989_v4  ;;  %v3991_v19 = vpack.c.bf16 %v3303_v12, %v3302_v57  ;;  %v3286_v0 = vld [vmem:[#allocation10 + $0x10] sm:$0xff]  ;;  %v3287_v49 = vld [vmem:[#allocation10 + $0x18] sm:$0xff]  ;;  %v3308_v4 = vld [vmem:[#allocation10 + $0xc0] sm:$0xff] }
 0x47c   : > { %v3050_v28 = vsel %vm2963_vm0, %v3048_v22, 0.0  ;;  %v2964_v18 = vsel %vm2963_vm0, %v2961_v20, 0.0  ;;  %4020 = vmatprep.subr.bf16.mxu1 %v4019_v29  ;;  %v3335_v5 = vld [vmem:[#allocation10 + $0x198] sm:$0xff]  ;;  %v3993_v23 = vpack.c.bf16 %v3287_v49, %v3286_v0  ;;  %v3318_v20 = vld [vmem:[#allocation10 + $0x110] sm:$0xff]  ;;  %v3309_v29 = vld [vmem:[#allocation10 + $0xc8] sm:$0xff] }
 0x47d   : > { %3051 = vadd.xlane.f32.xlu0 %v3050_v28  ;;  %2965 = vadd.xlane.f32.xlu1 %v2964_v18  ;;  %v4023_v22 = vpack.c.bf16 %v3335_v5, %v3334_v42  ;;  %v3319_v28 = vld [vmem:[#allocation10 + $0x118] sm:$0xff]  ;;  %v3322_v8 = vld [vmem:[#allocation10 + $0x130] sm:$0xff]  ;;  %v3340_v55 = vld [vmem:[#allocation10 + $0x1c0] sm:$0xff]  ;;  %v4003_v17 = vpack.c.bf16 %v3309_v29, %v3308_v4 }
 0x47e   : > { %4022 = vmatpush3.bf16.msra.mxu1 %v4021_v38  ;;  %3992 = vmatprep.subr.bf16.mxu0 %v3991_v19  ;;  %v4025_v18 = vpack.c.bf16 %v3319_v28, %v3318_v20  ;;  %v3339_v7 = vld [vmem:[#allocation10 + $0x1b8] sm:$0xff]  ;;  %v3292_v38 = vld [vmem:[#allocation10 + $0x40] sm:$0xff]  ;;  %v3293_v57 = vld [vmem:[#allocation10 + $0x48] sm:$0xff] }
 0x47f   : > { %3994 = vmatpush3.bf16.msra.mxu0 %v3993_v23  ;;  %4024 = vmatprep.subr.bf16.mxu1 %v4023_v22  ;;  %v3323_v35 = vld [vmem:[#allocation10 + $0x138] sm:$0xff]  ;;  %v3341_v12 = vld [vmem:[#allocation10 + $0x1c8] sm:$0xff]  ;;  %v4005_v42 = vpack.c.bf16 %v3293_v57, %v3292_v38  ;;  %v3324_v0 = vld [vmem:[#allocation10 + $0x140] sm:$0xff] }
 0x480   : > { %v4033_v25 = vpack.c.bf16 %v3323_v35, %v3322_v8  ;;  %v4035_v19 = vpack.c.bf16 %v3341_v12, %v3340_v55  ;;  %v3325_v49 = vld [vmem:[#allocation10 + $0x148] sm:$0xff]  ;;  %v3310_v23 = vld [vmem:[#allocation10 + $0xd0] sm:$0xff]  ;;  %v3311_v22 = vld [vmem:[#allocation10 + $0xd8] sm:$0xff] }
 0x481   : > { %v4037_v5 = vpack.c.bf16 %v3325_v49, %v3324_v0  ;;  %v3342_v20 = vld [vmem:[#allocation10 + $0x1d0] sm:$0xff]  ;;  %v4007_v28 = vpack.c.bf16 %v3311_v22, %v3310_v23  ;;  %v3347_v29 = vld [vmem:[#allocation10 + $0x1f8] sm:$0xff]  ;;  %v8847_v0 = vld [vmem:[#allocation19_spill] sm:$0xff] }
 0x482   : > { %4026 = vmatpush3.bf16.msra.mxu1 %v4025_v18  ;;  %v3294_v18 = vld [vmem:[#allocation10 + $0x50] sm:$0xff] }
 0x483   : > { %v3298_v35 = vld [vmem:[#allocation10 + $0x70] sm:$0xff] }
 0x484   : > { %v3346_v4 = vld [vmem:[#allocation10 + $0x1f0] sm:$0xff] }
 0x485   : > { %v3330_v55 = vld [vmem:[#allocation10 + $0x170] sm:$0xff]  ;;  %v4047_v57 = vpack.c.bf16 %v3347_v29, %v3346_v4 }
 0x486   : > { %v8849_v22 = vld [vmem:[#allocation40_spill] sm:$0xff] }
 0x50a   : > { %v3052_v33 = vpop.xlane.xlu0 %3051  ;;  %v2966_v54 = vpop.xlane.xlu1 %2965 }
 0x50b   : > { %v3053_v15 = vadd.f32 %v3793_v2, %v3052_v33  ;;  %v2973_v59 = vadd.f32 %v3793_v2, %v2966_v54  ;;  %v3336_v2 = vld [vmem:[#allocation10 + $0x1a0] sm:$0xff] }
 0x50c   : > { %v3288_v54 = vld [vmem:[#allocation10 + $0x20] sm:$0xff] }
 0x50d   : > { %v3795_v27 = vmul.f32 -1.442695, %v3053_v15  ;;  %v3794_v32 = vmul.f32 -1.442695, %v2973_v59 }
 0x50f   : > { %4410 = vpow2.f32 %v3795_v27 }
 0x510   : > { %4412 = vpow2.f32 %v3794_v32 }
 0x519   : > { %v4411_v51 = vpop.eup %4410 }
 0x51a   : > { %v4413_v3 = vpop.eup %4412  ;;  %v3057_v16 = vadd.f32 1.0, %v4411_v51  ;;  %v3320_v51 = vld [vmem:[#allocation10 + $0x120] sm:$0xff] }
 0x51b   : > { %v2977_v45 = vadd.f32 1.0, %v4413_v3  ;;  %v3321_v3 = vld [vmem:[#allocation10 + $0x128] sm:$0xff] }
 0x51c   : > { %4414 = vrcp.f32 %v3057_v16  ;;  %v4029_v16 = vpack.c.bf16 %v3321_v3, %v3320_v51  ;;  %v3296_v51 = vld [vmem:[#allocation10 + $0x60] sm:$0xff]  ;;  %v3297_v3 = vld [vmem:[#allocation10 + $0x68] sm:$0xff] }
 0x51d   : > { %4416 = vrcp.f32 %v2977_v45  ;;  %v3306_v45 = vld [vmem:[#allocation10 + $0xb0] sm:$0xff] }
 0x526   : > { %v4415_v9 = vpop.eup %4414 }
 0x527   : > { %v4417_v48 = vpop.eup %4416  ;;  %v3060_v46 = vmul.f32 %v4415_v9, %v3053_v15  ;;  %v3289_v15 = vld [vmem:[#allocation10 + $0x28] sm:$0xff]  ;;  %v3307_v9 = vld [vmem:[#allocation10 + $0xb8] sm:$0xff] }
 0x528   : > { %v2980_v62 = vmul.f32 %v4417_v48, %v2973_v59  ;;  %v3337_v59 = vld [vmem:[#allocation10 + $0x1a8] sm:$0xff]  ;;  %v3997_v27 = vpack.c.bf16 %v3289_v15, %v3288_v54  ;;  %v3338_v48 = vld [vmem:[#allocation10 + $0x1b0] sm:$0xff]  ;;  %v3327_v15 = vld [vmem:[#allocation10 + $0x158] sm:$0xff] }
 0x529   : > { %3063 = vperm.xlu1 %4152, %v3060_v46   ;;  %v4027_v32 = vpack.c.bf16 %v3337_v59, %v3336_v2  ;;  %v3999_v46 = vpack.c.bf16 %v3307_v9, %v3306_v45  ;;  %v4031_v1 = vpack.c.bf16 %v3339_v7, %v3338_v48  ;;  %v3326_v54 = vld [vmem:[#allocation10 + $0x150] sm:$0xff]  ;;  %v3312_v59 = vld [vmem:[#allocation10 + $0xe0] sm:$0xff]  ;;  %v4013_v45 = vpack.c.bf16 %v3297_v3, %v3296_v51  ;;  %v3345_v48 = vld [vmem:[#allocation10 + $0x1e8] sm:$0xff] }
 0x52a   : > { %2983 = vperm.xlu0 %4151, %v2980_v62   ;;  %v3290_v62 = vld [vmem:[#allocation10 + $0x30] sm:$0xff]  ;;  %v3344_v9 = vld [vmem:[#allocation10 + $0x1e0] sm:$0xff] }
 0x52b   : > { %4028 = vmatprep.subr.bf16.mxu1 %v4027_v32  ;;  %v4001_v30 = vpack.c.bf16 %v3291_v47, %v3290_v62  ;;  %v3313_v32 = vld [vmem:[#allocation10 + $0xe8] sm:$0xff]  ;;  %v4043_v62 = vpack.c.bf16 %v3345_v48, %v3344_v9  ;;  %v3314_v7 = vld [vmem:[#allocation10 + $0xf0] sm:$0xff] }
 0x52c   : > { %4030 = vmatpush3.bf16.msra.mxu1 %v4029_v16  ;;  %v4011_v16 = vpack.c.bf16 %v3313_v32, %v3312_v59  ;;  %v3329_v47 = vld [vmem:[#allocation10 + $0x168] sm:$0xff] }
 0x52d   : > { %4032 = vmatprep.subr.bf16.mxu1 %v4031_v1 }
 0x52e   : > { %4153 = vset.pattern.permute.xlu0 %v4677_v24  ;;  %v3304_v24 = vld [vmem:[#allocation10 + $0xa0] sm:$0xff] }
 0x52f   : > { %v3995_v33 = vpack.c.bf16 %v3305_v44, %v3304_v24  ;;  %v3295_v24 = vld [vmem:[#allocation10 + $0x58] sm:$0xff] }
 0x530   : > { %4034 = vmatpush3.bf16.msra.mxu1 %v4033_v25  ;;  %v3343_v44 = vld [vmem:[#allocation10 + $0x1d8] sm:$0xff]  ;;  %v4009_v2 = vpack.c.bf16 %v3295_v24, %v3294_v18  ;;  %v8850_v18 = vld [vmem:[#allocation20_spill] sm:$0xff] }
 0x531   : > { %3996 = vmatprep.subr.bf16.mxu0 %v3995_v33  ;;  %4036 = vmatprep.subr.bf16.mxu1 %v4035_v19  ;;  %v4039_v33 = vpack.c.bf16 %v3343_v44, %v3342_v20  ;;  %v3299_v25 = vld [vmem:[#allocation10 + $0x78] sm:$0xff] }
 0x532   : > { %3998 = vmatpush3.bf16.msra.mxu0 %v3997_v27  ;;  %v4041_v27 = vpack.c.bf16 %v3327_v15, %v3326_v54  ;;  %v4017_v38 = vpack.c.bf16 %v3299_v25, %v3298_v35  ;;  %v8851_v44 = vld [vmem:[#allocation65_spill] sm:$0xff] }
 0x533   : > { %4000 = vmatprep.subr.bf16.mxu0 %v3999_v46  ;;  %v3328_v46 = vld [vmem:[#allocation10 + $0x160] sm:$0xff]  ;;  %v2922_v15 = vld [vmem:[%s8853_s25] sm:$0xf]  ;;  %s4592_s25 = sshll.u32 %s4680_s21, 4  ;;  %s4593_s25 = int_to_ptr.vmem [resolvable:$false] %s4592_s25 }
 0x534   : > { %4038 = vmatpush3.bf16.msra.mxu1 %v4037_v5  ;;  %v4045_v1 = vpack.c.bf16 %v3329_v47, %v3328_v46  ;;  %v8848_v5 = vld [vmem:[#allocation34_spill] sm:$0xff]  ;;  %v2927_v48 = vrot.slane %v2922_v15, %v8845_v58  ;;  %v2931_v46 = vrot.slane %v2922_v15, %v8846_v61  ;;  %v2939_v47 = vrot.slane %v2922_v15, %v8850_v18  ;;  %s4594_s15 = scalar_lea.vmem %s4593_s25, 2048  ;;  %p4595_p12 = scmp.lt.s32.totalorder %s7952_s10, %s4593_s25 }
 0x535   : > { %4040 = vmatprep.subr.bf16.mxu1 %v4039_v33  ;;  %v8852_v33 = vld [vmem:[#allocation36_spill] sm:$0xff]  ;;  %p4596_p1 = scmp.lt.s32.totalorder %s4594_s15, %s4588_s23 }
 0x536   : > { %4002 = vmatpush3.bf16.msra.mxu0 %v4001_v30  ;;  %v3315_v30 = vld [vmem:[#allocation10 + $0xf8] sm:$0xff] }
 0x537   : > { %4004 = vmatprep.subr.bf16.mxu0 %v4003_v17  ;;  %v4015_v8 = vpack.c.bf16 %v3315_v30, %v3314_v7  ;;  %v3331_v17 = vld [vmem:[#allocation10 + $0x178] sm:$0xff]  ;;  %p4597_p2 = por %p4596_p1, %p4595_p12 }
 0x538   : > { %4042 = vmatpush3.bf16.msra.mxu1 %v4041_v27  ;;  %v4049_v12 = vpack.c.bf16 %v3331_v17, %v3330_v55 }
 0x539   : > { %4044 = vmatprep.subr.bf16.mxu1 %v4043_v62  ;;  %v2935_v62 = vrot.slane %v2922_v15, %v8847_v0  ;;  %p4598_p13 = pnand %p4597_p2, %p4591_p7 }
 0x53a   : > { %4006 = vmatpush3.bf16.msra.mxu0 %v4005_v42  ;;  %v2920_v42 = vld [vmem:[%s8005_s7] sm:$0xff] }
 0x53b   : > { %4008 = vmatprep.subr.bf16.mxu0 %v4007_v28  ;;  %v2990_v19 = vrot.slane %v2920_v42, %v8845_v58  ;;  %v2994_v49 = vrot.slane %v2920_v42, %v8847_v0  ;;  %v2998_v23 = vrot.slane %v2920_v42, %v8848_v5  ;;  %v3002_v20 = vrot.slane %v2920_v42, %v8849_v22 }
 0x53c   : > { %4046 = vmatpush3.bf16.msra.mxu1 %v4045_v1  ;;  %v3069_v28 = vrot.slane %v2920_v42, %v8846_v61  ;;  %v3073_v24 = vrot.slane %v2920_v42, %v8850_v18  ;;  %v3081_v54 = vrot.slane %v2920_v42, %v8852_v33 }
 0x53d   : > { %4048 = vmatprep.subr.bf16.mxu1 %v4047_v57  ;;  %v3010_v59 = vrot.slane %v2990_v19, %v8845_v58  ;;  %v3014_v27 = vrot.slane %v2994_v49, %v8845_v58  ;;  %v3018_v32 = vrot.slane %v2998_v23, %v8845_v58  ;;  %v3022_v51 = vrot.slane %v3002_v20, %v8845_v58 }
 0x53e   : > { %4010 = vmatpush3.bf16.msra.mxu0 %v4009_v2  ;;  %v3077_v2 = vrot.slane %v2920_v42, %v8851_v44  ;;  %v3089_v3 = vrot.slane %v3069_v28, %v8846_v61  ;;  %v3101_v9 = vrot.slane %v3081_v54, %v8846_v61 }
 0x53f   : > { %4012 = vmatprep.subr.bf16.mxu0 %v4011_v16  ;;  %v3093_v16 = vrot.slane %v3073_v24, %v8846_v61 }
 0x540   : > { %4050 = vmatpush3.bf16.msra.mxu1 %v4049_v12 }
 0x542   : > { %4014 = vmatpush3.bf16.msra.mxu0 %v4013_v45  ;;  %v3097_v45 = vrot.slane %v3077_v2, %v8846_v61 }
 0x543   : > { %4016 = vmatprep.subr.bf16.mxu0 %v4015_v8 }
 0x546   : > { %4018 = vmatpush3.bf16.msra.mxu0 %v4017_v38 }
 0x5a8   : > { %v3064_v7 = vpop.permute.xlu1 %3063 }
 0x5a9   : > { %v2984_v30 = vpop.permute.xlu0 %2983  ;;  %v3102_v4 = vmul.f32 %v3089_v3, %v3064_v7  ;;  %v3103_v29 = vmul.f32 %v3093_v16, %v3064_v7  ;;  %v3104_v55 = vmul.f32 %v3097_v45, %v3064_v7  ;;  %v3105_v17 = vmul.f32 %v3101_v9, %v3064_v7 }
 0x5aa   : > { %v3023_v1 = vmul.f32 %v3010_v59, %v2984_v30  ;;  %v3024_v8 = vmul.f32 %v3014_v27, %v2984_v30  ;;  %v3025_v35 = vmul.f32 %v3018_v32, %v2984_v30  ;;  %v3026_v25 = vmul.f32 %v3022_v51, %v2984_v30 }
 0x5ab   : > { %v4679_v51 = vmov 1966171168  }
 0x5ac   : > { %v3027_v38 = vadd.f32 %v3023_v1, %v2927_v48  ;;  %v3028_v57 = vadd.f32 %v3024_v8, %v2931_v46  ;;  %v3029_v12 = vadd.f32 %v3025_v35, %v2935_v62  ;;  %v3030_v42 = vadd.f32 %v3026_v25, %v2939_v47 }
 0x5ad   : > { %v3141_v3 = vunpack.c.l.s4 %v4679_v51 }
 0x5ae   : > { %v3106_v19 = vadd.f32 %v3102_v4, %v3027_v38  ;;  %v3107_v49 = vadd.f32 %v3103_v29, %v3028_v57  ;;  %v3108_v5 = vadd.f32 %v3104_v55, %v3029_v12  ;;  %v3109_v23 = vadd.f32 %v3105_v17, %v3030_v42 }
 0x5af   : > { %v3142_v16 = vunpack.c.0.s8 %v3141_v3 }
 0x5b0   : > { %v3796_v22 = vmul.f32 -1.442695, %v3106_v19  ;;  %v3797_v20 = vmul.f32 -1.442695, %v3107_v49  ;;  %v3798_v28 = vmul.f32 -1.442695, %v3108_v5 }
 0x5b1   : > { %v3799_v24 = vmul.f32 -1.442695, %v3109_v23  ;;  %v3145_v9 = vsub.s32 %v3142_v16, %v5011_v43 }
 0x5b2   : > { %4418 = vpow2.f32 %v3796_v22  ;;  %v8854_v22 = vld [vmem:[#allocation27_spill] sm:$0xff] }
 0x5b3   : > { %4420 = vpow2.f32 %v3797_v20 }
 0x5b4   : > { %4422 = vpow2.f32 %v3798_v28  ;;  %v8855_v28 = vld [vmem:[#allocation61_spill] sm:$0xff] }
 0x5b5   : > { %4424 = vpow2.f32 %v3799_v24 }
 0x5bc   : > { %v4419_v44 = vpop.eup %4418 }
 0x5bd   : > { %v4421_v2 = vpop.eup %4420  ;;  %v3122_v33 = vadd.f32 1.0, %v4419_v44 }
 0x5be   : > { %v4423_v54 = vpop.eup %4422  ;;  %v3123_v15 = vadd.f32 1.0, %v4421_v2 }
 0x5bf   : > { %v4425_v59 = vpop.eup %4424  ;;  %v3124_v27 = vadd.f32 1.0, %v4423_v54  ;;  %4426 = vrcp.f32 %v3122_v33 }
 0x5c0   : > { %v3125_v32 = vadd.f32 1.0, %v4425_v59  ;;  %4428 = vrcp.f32 %v3123_v15 }
 0x5c1   : > { %4430 = vrcp.f32 %v3124_v27  ;;  %v8859_v27 = vld [vmem:[#allocation89_spill] sm:$0xff] }
 0x5c2   : > { %4432 = vrcp.f32 %v3125_v32 }
 0x5c9   : > { %v4427_v45 = vpop.eup %4426 }
 0x5ca   : > { %v4429_v48 = vpop.eup %4428 }
 0x5cb   : > { %v4431_v46 = vpop.eup %4430  ;;  %v3138_v62 = vcombine.low %v4427_v45, %v4429_v48 }
 0x5cc   : > { %v4433_v47 = vpop.eup %4432 }
 0x5cd   : > { %v3139_v7 = vcombine.low %v4431_v46, %v4433_v47  ;;  %v3146_v30 = vrot.slane %v3138_v62, %v3145_v9 }
 0x5cf   : > { %v3153_v1 = vrot.slane %v3139_v7, %v3145_v9 }
 0x5d1   : > { %v3154_v8 = vcombine.low %v3146_v30, %v3153_v1  ;;  %v3155_v35 = vcombine.high %v3146_v30, %v3153_v1  ;;  %v8861_v30 = vld [vmem:[#allocation39_spill] sm:$0xff] }
 0x5d3   : > { %v3162_v25 = vrot.slane %v3154_v8, %v3145_v9  ;;  %v3169_v4 = vrot.slane %v3155_v35, %v3145_v9  ;;  %v8862_v8 = vld [vmem:[#allocation26_spill] sm:$0xff] }
 0x5d4   : > { %v8863_v35 = vld [vmem:[#allocation122_spill] sm:$0xff] }
 0x5d5   : > { %v3179_v29 = vrot.slane %v3162_v25, %v8846_v61  ;;  %v3187_v55 = vrot.slane %v3162_v25, %v8850_v18  ;;  %v3175_v17 = vrot.slane %v3162_v25, %v8845_v58  ;;  %v3183_v38 = vrot.slane %v3162_v25, %v8847_v0 }
 0x5d6   : > { %v3195_v19 = vrot.slane %v3169_v4, %v8846_v61  ;;  %v3203_v23 = vrot.slane %v3169_v4, %v8850_v18  ;;  %v3170_v24 = vcombine.high %v3162_v25, %v3162_v25  ;;  %v3171_v9 = vcombine.high %v3169_v4, %v3169_v4 }
 0x5d7   : > { %v3253_v43 = vmul.f32 %v3179_v29, %v7690_v39  ;;  %v3255_v57 = vmul.f32 %v3187_v55, %v7540_v14  ;;  %v3252_v12 = vmul.f32 %v3175_v17, %v7616_v26  ;;  %v3254_v42 = vmul.f32 %v3183_v38, %v7714_v52 }
 0x5d8   : > { %v3257_v49 = vmul.f32 %v3179_v29, %v7701_v13  ;;  %v3259_v5 = vmul.f32 %v3187_v55, %v8810_v10  ;;  %v3256_v14 = vmul.f32 %v3175_v17, %v8825_v34  ;;  %v3258_v26 = vmul.f32 %v3183_v38, %v7706_v50  ;;  %v8856_v10 = vld [vmem:[#allocation80_spill] sm:$0xff]  ;;  %v8857_v34 = vld [vmem:[#allocation30_spill] sm:$0xff]  ;;  %v8858_v50 = vld [vmem:[#allocation123_spill] sm:$0xff] }
 0x5d9   : > { %3419 = vmatprep.mubr.f32.mxu0 %v3253_v43  ;;  %3524 = vmatprep.mubr.f32.mxu1 %v3255_v57  ;;  %v3191_v39 = vrot.slane %v3169_v4, %v8845_v58  ;;  %v3199_v52 = vrot.slane %v3169_v4, %v8847_v0  ;;  %v3261_v20 = vmul.f32 %v3195_v19, %v8854_v22  ;;  %v7917_v29 = vld [vmem:[%s8866_s27] ss:$0 sm:$0xff] }
 0x5da   : > { %3420 = vmatmul.mubr.f32.vlgmr.msra.gmra.mrb[16].mxu0 %v3252_v12  ;;  %3525 = vmatmul.mubr.f32.vlgmr.msra.gmra.mrb[16].mxu1 %v3254_v42  ;;  %v3263_v13 = vmul.f32 %v3203_v23, %v8855_v28  ;;  %v3265_v33 = vmul.f32 %v3195_v19, %v8857_v34  ;;  %v3267_v54 = vmul.f32 %v3203_v23, %v8858_v50 }
 0x5db   : > { %3424 = vmatprep.mubr.f32.mxu0 %v3257_v49  ;;  %3529 = vmatprep.mubr.f32.mxu1 %v3259_v5  ;;  %v3260_v44 = vmul.f32 %v3191_v39, %v8856_v10  ;;  %v3262_v2 = vmul.f32 %v3199_v52, %v8827_v31  ;;  %v3211_v15 = vrot.slane %v3170_v24, %v8846_v61 }
 0x5dc   : > { %v3219_v59 = vrot.slane %v3170_v24, %v8850_v18  ;;  %v3264_v32 = vmul.f32 %v3191_v39, %v8859_v27  ;;  %v3266_v51 = vmul.f32 %v3199_v52, %v7372_v53  ;;  %v3207_v3 = vrot.slane %v3170_v24, %v8845_v58 }
 0x5dd   : > { %v3215_v31 = vrot.slane %v3170_v24, %v8847_v0  ;;  %v3269_v16 = vmul.f32 %v3211_v15, %v7741_v41  ;;  %v3273_v62 = vmul.f32 %v3211_v15, %v7744_v56  ;;  %v3227_v47 = vrot.slane %v3171_v9, %v8846_v61  ;;  %v8860_v61 = vld [vmem:[#allocation22_spill] sm:$0xff] }
 0x5de   : > { %3425 = vmatmul.mubr.f32.gmra.mrb[18].mxu0 %v3256_v14  ;;  %3530 = vmatmul.mubr.f32.gmra.mrb[18].mxu1 %v3258_v26  ;;  %v3271_v45 = vmul.f32 %v3219_v59, %v7545_v63  ;;  %v3268_v48 = vmul.f32 %v3207_v3, %v7666_v11  ;;  %v3275_v53 = vmul.f32 %v3219_v59, %v7548_v37  ;;  %v4438_v26 = vld [vmem:[%s4972_s30] sm:$0xff] }
 0x5df   : > { %3429 = vmatprep.mubr.f32.mxu0 %v3261_v20  ;;  %3534 = vmatprep.mubr.f32.mxu1 %v3263_v13  ;;  %v3270_v46 = vmul.f32 %v3215_v31, %v7750_v36  ;;  %v3235_v7 = vrot.slane %v3171_v9, %v8850_v18  ;;  %v3272_v63 = vmul.f32 %v3207_v3, %v7657_v6  ;;  %v4440_v3 = vld [vmem:[%s4972_s30 + $0x10] sm:$0xff] }
 0x5e0   : > { %v3274_v41 = vmul.f32 %v3215_v31, %v7753_v60  ;;  %v3223_v11 = vrot.slane %v3171_v9, %v8845_v58  ;;  %v3231_v36 = vrot.slane %v3171_v9, %v8847_v0  ;;  %v3277_v56 = vmul.f32 %v3227_v47, %v7761_v21  ;;  %v8864_v58 = vld [vmem:[#allocation127_spill] sm:$0xff]  ;;  %v8865_v0 = vld [vmem:[#allocation38_spill] sm:$0xff] }
 0x5e1   : > { %v3279_v37 = vmul.f32 %v3235_v7, %v7610_v40  ;;  %v3281_v6 = vmul.f32 %v3227_v47, %v8862_v8  ;;  %v3283_v60 = vmul.f32 %v3235_v7, %v8863_v35  ;;  %v4441_v7 = vld [vmem:[%s4972_s30 + $0x18] sm:$0xff] }
 0x5e2   : > { %3430 = vmatmul.mubr.f32.gmra.mrb[20].mxu0 %v3260_v44  ;;  %3535 = vmatmul.mubr.f32.gmra.mrb[20].mxu1 %v3262_v2  ;;  %v3276_v18 = vmul.f32 %v3223_v11, %v8860_v61  ;;  %v3278_v1 = vmul.f32 %v3231_v36, %v8861_v30  ;;  %v3280_v21 = vmul.f32 %v3223_v11, %v8864_v58  ;;  %v4439_v2 = vld [vmem:[%s4972_s30 + $0x8] sm:$0xff] }
 0x5e3   : > { %3434 = vmatprep.mubr.f32.mxu0 %v3265_v33  ;;  %3539 = vmatprep.mubr.f32.mxu1 %v3267_v54  ;;  %v3282_v40 = vmul.f32 %v3231_v36, %v8865_v0 }
 0x5e6   : > { %3435 = vmatmul.mubr.f32.gmra.mrb[22].mxu0 %v3264_v32  ;;  %3540 = vmatmul.mubr.f32.gmra.mrb[22].mxu1 %v3266_v51 }
 0x5e7   : > { %3439 = vmatprep.mubr.f32.mxu0 %v3269_v16  ;;  %3544 = vmatprep.mubr.f32.mxu1 %v3271_v45 }
 0x5ea   : > { %3440 = vmatmul.mubr.f32.gmra.mrb[24].mxu0 %v3268_v48  ;;  %3545 = vmatmul.mubr.f32.gmra.mrb[24].mxu1 %v3270_v46 }
 0x5eb   : > { %3444 = vmatprep.mubr.f32.mxu0 %v3273_v62  ;;  %3549 = vmatprep.mubr.f32.mxu1 %v3275_v53 }
 0x5ee   : > { %3445 = vmatmul.mubr.f32.gmra.mrb[26].mxu0 %v3272_v63  ;;  %3550 = vmatmul.mubr.f32.gmra.mrb[26].mxu1 %v3274_v41 }
 0x5ef   : > { %3449 = vmatprep.mubr.f32.mxu0 %v3277_v56  ;;  %3554 = vmatprep.mubr.f32.mxu1 %v3279_v37 }
 0x5f2   : > { %3450 = vmatmul.mubr.f32.gmra.mrb[28].mxu0 %v3276_v18  ;;  %3555 = vmatmul.mubr.f32.gmra.mrb[28].mxu1 %v3278_v1  ;;  %v4442_v1 = vld [vmem:[%s4972_s30 + $0x20] sm:$0xff] }
 0x5f3   : > { %3454 = vmatprep.mubr.f32.mxu0 %v3281_v6  ;;  %3559 = vmatprep.mubr.f32.mxu1 %v3283_v60 }
 0x5f6   : > { %3455 = vmatmul.mubr.f32.gmra.mrb[30].mxu0 %v3280_v21  ;;  %3560 = vmatmul.mubr.f32.gmra.mrb[30].mxu1 %v3282_v40 }
 0x6ad   : > { %v3843_v25 = vpop.f32.mrb[16].mxu0  ;;  %v3899_v4 = vpop.f32.mrb[16].mxu1 }
 0x6ae   : > { %v3844_v55 = vpop.f32.mrb[17].mxu0  ;;  %v3900_v17 = vpop.f32.mrb[17].mxu1 }
 0x6af   : > { %v3845_v38 = vadd.f32 %v3844_v55, %v3843_v25  ;;  %v3901_v43 = vadd.f32 %v3900_v17, %v3899_v4  ;;  %v4443_v4 = vld [vmem:[%s4972_s30 + $0x28] sm:$0xff] }
 0x6b1   : > { %v3422_v57 = vadd.f32 %v3845_v38, %v7917_v29  ;;  %v3846_v12 = vpop.f32.mrb[18].mxu0  ;;  %v3902_v42 = vpop.f32.mrb[18].mxu1 }
 0x6b2   : > { %v3847_v19 = vpop.f32.mrb[19].mxu0  ;;  %v3903_v49 = vpop.f32.mrb[19].mxu1 }
 0x6b3   : > { %v3527_v5 = vadd.f32 %v3901_v43, %v3422_v57  ;;  %v3848_v23 = vadd.f32 %v3847_v19, %v3846_v12  ;;  %v3904_v14 = vadd.f32 %v3903_v49, %v3902_v42 }
 0x6b5   : > { %v3565_v39 = vadd.f32 %v4438_v26, %v3527_v5  ;;  %v3427_v52 = vadd.f32 %v3848_v23, %v7917_v29  ;;  %v3849_v22 = vpop.f32.mrb[20].mxu0  ;;  %v3905_v20 = vpop.f32.mrb[20].mxu1  ;;  %v4444_v5 = vld [vmem:[%s4972_s30 + $0x30] sm:$0xff] }
 0x6b6   : > { %v3850_v28 = vpop.f32.mrb[21].mxu0  ;;  %v3906_v13 = vpop.f32.mrb[21].mxu1 }
 0x6b7   : > { %3573 = vst [vmem:[%s7924_s16] sm:$0xff] %v3565_v39  ;;  %v3532_v24 = vadd.f32 %v3904_v14, %v3427_v52  ;;  %v3851_v10 = vadd.f32 %v3850_v28, %v3849_v22  ;;  %v3907_v44 = vadd.f32 %v3906_v13, %v3905_v20  ;;  %v4445_v39 = vld [vmem:[%s4972_s30 + $0x38] sm:$0xff] }
 0x6b9   : > { %v3566_v34 = vadd.f32 %v4439_v2, %v3532_v24  ;;  %v3432_v33 = vadd.f32 %v3851_v10, %v7917_v29  ;;  %v3852_v50 = vpop.f32.mrb[22].mxu0  ;;  %v3908_v54 = vpop.f32.mrb[22].mxu1 }
 0x6ba   : > { %v3853_v15 = vpop.f32.mrb[23].mxu0  ;;  %v3909_v59 = vpop.f32.mrb[23].mxu1 }
 0x6bb   : > { %3574 = vst [vmem:[%s7924_s16 + $0x8] sm:$0xff] %v3566_v34  ;;  %v3537_v27 = vadd.f32 %v3907_v44, %v3432_v33  ;;  %v3854_v32 = vadd.f32 %v3853_v15, %v3852_v50  ;;  %v3910_v51 = vadd.f32 %v3909_v59, %v3908_v54 }
 0x6bd   : > { %v3567_v31 = vadd.f32 %v4440_v3, %v3537_v27  ;;  %v3437_v16 = vadd.f32 %v3854_v32, %v7917_v29  ;;  %v3855_v45 = vpop.f32.mrb[24].mxu0  ;;  %v3911_v9 = vpop.f32.mrb[24].mxu1 }
 0x6be   : > { %v3856_v48 = vpop.f32.mrb[25].mxu0  ;;  %v3912_v46 = vpop.f32.mrb[25].mxu1 }
 0x6bf   : > { %3575 = vst [vmem:[%s7924_s16 + $0x10] sm:$0xff] %v3567_v31  ;;  %v3542_v62 = vadd.f32 %v3910_v51, %v3437_v16  ;;  %v3857_v53 = vadd.f32 %v3856_v48, %v3855_v45  ;;  %v3913_v47 = vadd.f32 %v3912_v46, %v3911_v9 }
 0x6c1   : > { %v3568_v63 = vadd.f32 %v4441_v7, %v3542_v62  ;;  %v3442_v41 = vadd.f32 %v3857_v53, %v7917_v29  ;;  %v3858_v11 = vpop.f32.mrb[26].mxu0  ;;  %v3914_v36 = vpop.f32.mrb[26].mxu1 }
 0x6c2   : > { %v3859_v56 = vpop.f32.mrb[27].mxu0  ;;  %v3915_v37 = vpop.f32.mrb[27].mxu1 }
 0x6c3   : > { %3576 = vst [vmem:[%s7924_s16 + $0x18] sm:$0xff] %v3568_v63  ;;  %v3547_v61 = vadd.f32 %v3913_v47, %v3442_v41  ;;  %v3860_v18 = vadd.f32 %v3859_v56, %v3858_v11  ;;  %v3916_v30 = vadd.f32 %v3915_v37, %v3914_v36 }
 0x6c5   : > { %v3569_v8 = vadd.f32 %v4442_v1, %v3547_v61  ;;  %v3447_v6 = vadd.f32 %v3860_v18, %v7917_v29  ;;  %v3861_v35 = vpop.f32.mrb[28].mxu0  ;;  %v3917_v60 = vpop.f32.mrb[28].mxu1 }
 0x6c6   : > { %v3862_v58 = vpop.f32.mrb[29].mxu0  ;;  %v3918_v21 = vpop.f32.mrb[29].mxu1 }
 0x6c7   : > { %3577 = vst [vmem:[%s7924_s16 + $0x20] sm:$0xff] %v3569_v8  ;;  %v3552_v0 = vadd.f32 %v3916_v30, %v3447_v6  ;;  %v3863_v40 = vadd.f32 %v3862_v58, %v3861_v35  ;;  %v3919_v25 = vadd.f32 %v3918_v21, %v3917_v60 }
 0x6c9   : > { %v3570_v55 = vadd.f32 %v4443_v4, %v3552_v0  ;;  %v3452_v17 = vadd.f32 %v3863_v40, %v7917_v29  ;;  %v3864_v38 = vpop.f32.mrb[30].mxu0  ;;  %v3920_v43 = vpop.f32.mrb[30].mxu1 }
 0x6ca   : > { %v3865_v57 = vpop.f32.mrb[31].mxu0  ;;  %v3921_v12 = vpop.f32.mrb[31].mxu1 }
 0x6cb   : > { %3578 = vst [vmem:[%s7924_s16 + $0x28] sm:$0xff] %v3570_v55  ;;  %v3557_v42 = vadd.f32 %v3919_v25, %v3452_v17  ;;  %v3866_v19 = vadd.f32 %v3865_v57, %v3864_v38  ;;  %v3922_v49 = vadd.f32 %v3921_v12, %v3920_v43 }
 0x6cd   : > { %v3571_v23 = vadd.f32 %v4444_v5, %v3557_v42  ;;  %v3457_v14 = vadd.f32 %v3866_v19, %v7917_v29 }
 0x6cf   : > { %3579 = vst [vmem:[%s7924_s16 + $0x30] sm:$0xff] %v3571_v23  ;;  %v3562_v26 = vadd.f32 %v3922_v49, %v3457_v14 }
 0x6d1   : > { %v3572_v52 = vadd.f32 %v4445_v39, %v3562_v26 }
 0x6d3   : > { %3580 = vst [vmem:[%s7924_s16 + $0x38] sm:$0xff] %v3572_v52 }
 0x6d4   : > { %4601 = shalt.err (!%p4598_p13)
}
 0x6d5   : > { %s4602_s30 = scalar_lea.hbm %s7950_s14, 1024  ;;  %s4606_s16 = scalar_lea.hbm %s8867_s11, 2048 }
 0x6d6   : > { %p4603_p9 = scmp.ne.s32.totalorder %s7950_s14, %s4602_s30  ;;  %p4607_p4 = scmp.lt.u32.totalorder %s7950_s14, %s8867_s11 }
 0x6d7   : > { %p4608_p8 = scmp.lt.u32.totalorder %s4606_s16, %s4602_s30  ;;  %p4610_p10 = scmp.lt.u32.totalorder %s4602_s30, %s7950_s14 }
 0x6d8   : > { %p4604_p0 = pnand %p4603_p9, %p4914_p3 }
 0x6d9   : > { %p4609_p6 = por %p4608_p8, %p4607_p4 }
 0x6da   : > { %p4605_p11 = pneg %p4604_p0 }
 0x6db   : > { %p4611_p5 = por %p4610_p10, %p4609_p6 }
 0x6dd   : > { %p4612_p7 = pnand %p4611_p5, %p4605_p11 }
 0x6df   : > { %4615 = shalt.err (!%p4612_p7)
}
 0x6e0   : > { %s4681_s29 = smov 128   ;;  %s4682_s23 = smov 8  }
 0x6e1   : > { %4069 = dma.vmem_to_hbm [thread:$0]  (%p4914_p3), %s7952_s10, 1024, %s7950_s14, %s3582_s13, %s4681_s29, %s4681_s29, %s4682_s23  }
 0x6e2 PF: > { %s8868_s21 = sld [smem:[#allocation16_spill]]  ;;  %s8869_s25 = sld [smem:[#allocation17_spill]] }
 0x6e3   : > { %p8871_p1 = scmp.ge.s32.totalorder %s4662_s20, 2 }
 0x6e8   : > { %s3611_s15 = sand.u32 1, %s8868_s21   ;;  %p8870_p12 = scmp.ne.s32.totalorder %s8869_s25, 0 }
 0x6e9   : > { %s3612_s30 = scalar_lea.sflag [#allocation4], %s3611_s15 }
 0x6ea   : > { %p4089_p2 = pnand %p8871_p1, %p8870_p12 }
 0x6ec   : > { %4645 = dma.done.wait (!%p4089_p2), %s3612_s30, 1024  }
 0x6ed   : > { %4647 = vsyncadd (!%p4089_p2), %s3612_s30, 4294966272  ;;  %p26_p13 = scmp.ge.s32.totalorder %s4901_s8, 4   ;;  %s8872_s17 = smov %s4654_s18 }
 0x6ee   : > { %s8873_s18 = smov %s4658_s19  ;;  %s8874_s19 = smov %s4910_s22 }
 0x6ef   : > { %s8875_s20 = smov %s4901_s8  ;;  %28 = sbr.rel (!%p26_p13) target bundleno = 11 (0xb), region = 125 }
 0x6f6   :  { %3617 = vsyncpa [#allocation3], 1 }
 0x6f7   :  { %3619 = vsyncpa [#allocation3 + $0x1], 1 }
 0x6f8   :  { %3620 = vsyncpa [#allocation6], 1 }
 0x6f9   :  { %3621 = vsyncpa [#allocation9], 1 }
 0x6fa   :  { %3622 = vsyncpa [#allocation4], 1 }
 0x6fb   :  { %3624 = vsyncpa [#allocation4 + $0x1], 1 }

</bundles_post_ra>
